<compile_context>
chip_gen: v7x
topology: tpu7x:2x2x1
jax: 0.10.0
libtpu: 0.0.40
codegen_flags: <defaults>
</compile_context>

<pallas_src>
import functools

import jax
import jax.numpy as jnp
from jax.experimental import pallas as pl
from jax.experimental.pallas import tpu as pltpu


def _round_up(x, m):
    return ((x + m - 1) // m) * m


# --------------------------------------------------------------------------
# Fused BasicBlock kernel
# --------------------------------------------------------------------------
def _basic_block_kernel(xpad_ref, xres_ref, mask_ref,
                        w1_ref, s1_ref, b1_ref,
                        w2_ref, s2_ref, b2_ref,
                        o_ref, y1pad_ref, acc_ref, *, H, P):
    """One grid step = one batch element.

    Layout: activations are zero-padded spatially to width P = W+2 and
    flattened to 2D (rows, C) with row stride P.  Output position (r, c)
    lives at flat row r*P + c (columns c >= W are scratch/garbage and are
    masked out / sliced off).  Tap (di, dj) of a 3x3 conv is then just the
    row-offset slice  [di*P + dj : di*P + dj + H*P]  of the padded map.
    """
    HP = H * P

    def conv3x3(load_patch, w_ref):
        # 9 accumulated bf16 MXU matmuls (full-channel contraction, one pass).
        acc_ref[...] = jnp.zeros_like(acc_ref)
        for di in range(3):
            for dj in range(3):
                off = di * P + dj
                patch = load_patch(off).astype(jnp.bfloat16)
                acc_ref[...] += jnp.dot(patch, w_ref[di * 3 + dj],
                                        preferred_element_type=jnp.float32)
        return acc_ref[...]

    # ---- conv1 + bn1 + ReLU (f32 epilogue) --------------------------------
    c1 = conv3x3(lambda off: xpad_ref[0, off:off + HP, :], w1_ref)
    y1 = jnp.maximum(c1 * s1_ref[...] + b1_ref[...], 0.0)

    # Re-pad conv1 output for conv2: zero the padded scratch map, then write
    # the (column-masked) activation into its interior at flat offset P+1.
    y1pad_ref[...] = jnp.zeros_like(y1pad_ref)
    y1pad_ref[P + 1:P + 1 + HP, :] = y1 * mask_ref[...]

    # ---- conv2 + bn2 + residual add + ReLU --------------------------------
    c2 = conv3x3(lambda off: y1pad_ref[off:off + HP, :], w2_ref)
    o_ref[0] = jnp.maximum(c2 * s2_ref[...] + b2_ref[...] + xres_ref[0], 0.0)


# --------------------------------------------------------------------------
# Parameters: init + one-time (hoisted) preparation
# --------------------------------------------------------------------------
def fold_bn(bn, eps=1e-5):
    s = bn["gamma"] * jax.lax.rsqrt(bn["var"] + eps)
    return s, bn["beta"] - bn["mean"] * s


def init_params(key, planes):
    ks = jax.random.split(key, 10)
    std = (2.0 / (planes * 9)) ** 0.5

    def bn(k1, k2, k3, k4, c):
        return dict(
            gamma=1.0 + 0.1 * jax.random.normal(k1, (c,), jnp.float32),
            beta=0.1 * jax.random.normal(k2, (c,), jnp.float32),
            mean=0.1 * jax.random.normal(k3, (c,), jnp.float32),
            var=jax.random.uniform(k4, (c,), jnp.float32, 0.5, 1.5))

    return dict(
        conv1_w=std * jax.random.normal(ks[0], (planes, planes, 3, 3), jnp.float32),
        bn1=bn(ks[1], ks[2], ks[3], ks[4], planes),
        conv2_w=std * jax.random.normal(ks[5], (planes, planes, 3, 3), jnp.float32),
        bn2=bn(ks[6], ks[7], ks[8], ks[9], planes))


def prepare_block_params(raw):
    """Hoisted one-time prep: fold BN, rearrange OIHW -> tap-major (9, IC, OC),
    cast the matmul operands (weights) to bf16."""
    def taps(w_oihw):
        oc, ic, kh, kw = w_oihw.shape
        return (jnp.transpose(w_oihw, (2, 3, 1, 0))
                .reshape(kh * kw, ic, oc).astype(jnp.bfloat16))

    s1, b1 = fold_bn(raw["bn1"])
    s2, b2 = fold_bn(raw["bn2"])
    row = lambda v: v.reshape(1, -1).astype(jnp.float32)
    return dict(w1=taps(raw["conv1_w"]), s1=row(s1), b1=row(b1),
                w2=taps(raw["conv2_w"]), s2=row(s2), b2=row(b2))


# --------------------------------------------------------------------------
# Forward wrapper (NCHW in / NCHW out, matching the PyTorch module)
# --------------------------------------------------------------------------
def basic_block_forward(x_nchw, prep):
    N, C, H, W = x_nchw.shape
    assert prep["w1"].shape[1] == C and prep["w1"].shape[2] == C, \
        "identity shortcut requires inplanes == planes"
    P = W + 2                       # row stride of the padded flattened map
    HP = H * P
    R = _round_up((H + 2) * P + 2, 8)   # rows of the padded flattened maps

    x = jnp.transpose(x_nchw, (0, 2, 3, 1)).astype(jnp.float32)          # NHWC
    xpad = jnp.pad(x, ((0, 0), (1, 1), (1, 1), (0, 0)))                  # (N,H+2,P,C)
    xpad = xpad.reshape(N, (H + 2) * P, C)
    xpad = jnp.pad(xpad, ((0, 0), (0, R - (H + 2) * P), (0, 0)))         # (N,R,C)
    xres = jnp.pad(x, ((0, 0), (0, 0), (0, P - W), (0, 0))).reshape(N, HP, C)
    mask = (jnp.arange(HP, dtype=jnp.int32) % P < W)
    mask = mask.astype(jnp.float32).reshape(HP, 1)                       # valid cols

    kernel = functools.partial(_basic_block_kernel, H=H, P=P)
    out = pl.pallas_call(
        kernel,
        out_shape=jax.ShapeDtypeStruct((N, HP, C), jnp.float32),
        grid_spec=pltpu.PrefetchScalarGridSpec(
            num_scalar_prefetch=0,
            grid=(N,),
            in_specs=[
                pl.BlockSpec((1, R, C), lambda n: (n, 0, 0)),    # padded input
                pl.BlockSpec((1, HP, C), lambda n: (n, 0, 0)),   # residual
                pl.BlockSpec((HP, 1), lambda n: (0, 0)),         # valid-col mask
                pl.BlockSpec((9, C, C), lambda n: (0, 0, 0)),    # conv1 taps (bf16)
                pl.BlockSpec((1, C), lambda n: (0, 0)),          # bn1 scale
                pl.BlockSpec((1, C), lambda n: (0, 0)),          # bn1 bias
                pl.BlockSpec((9, C, C), lambda n: (0, 0, 0)),    # conv2 taps (bf16)
                pl.BlockSpec((1, C), lambda n: (0, 0)),          # bn2 scale
                pl.BlockSpec((1, C), lambda n: (0, 0)),          # bn2 bias
            ],
            out_specs=pl.BlockSpec((1, HP, C), lambda n: (n, 0, 0)),
            scratch_shapes=[
                pltpu.VMEM((R, C), jnp.float32),   # padded conv1 output (conv2 input)
                pltpu.VMEM((HP, C), jnp.float32),  # MXU f32 accumulator
            ],
        ),
        compiler_params=pltpu.CompilerParams(
            dimension_semantics=("parallel",)),
    )(xpad, xres, mask,
      prep["w1"], prep["s1"], prep["b1"],
      prep["w2"], prep["s2"], prep["b2"])

    out = out.reshape(N, H, P, C)[:, :, :W, :]       # drop the garbage columns
    return jnp.transpose(out, (0, 3, 1, 2))          # back to NCHW


# --------------------------------------------------------------------------
# Plain-JAX reference (same bf16 matmul operands as the kernel)
# --------------------------------------------------------------------------
def basic_block_reference(x_nchw, raw):
    s1, b1 = fold_bn(raw["bn1"])
    s2, b2 = fold_bn(raw["bn2"])

    def conv(x, w):
        return jax.lax.conv_general_dilated(
            x.astype(jnp.bfloat16), w.astype(jnp.bfloat16),
            window_strides=(1, 1), padding=((1, 1), (1, 1)),
            dimension_numbers=("NCHW", "OIHW", "NCHW"),
            preferred_element_type=jnp.float32)

    bcast = lambda v: v[None, :, None, None]
    y = jnp.maximum(conv(x_nchw, raw["conv1_w"]) * bcast(s1) + bcast(b1), 0.0)
    y = jnp.maximum(conv(y, raw["conv2_w"]) * bcast(s2) + bcast(b2) + x_nchw, 0.0)
    return y


# --------------------------------------------------------------------------
if __name__ == "__main__":
    key = jax.random.PRNGKey(0)
    pkey, xkey = jax.random.split(key)

    batch, planes, hw = 2, 128, 16
    raw = init_params(pkey, planes)
    prep = prepare_block_params(raw)          # hoisted one-time weight prep
    x = jax.random.normal(xkey, (batch, planes, hw, hw), jnp.float32)

    fwd = jax.jit(lambda inp: basic_block_forward(inp, prep))
    y = fwd(x)
    jax.block_until_ready(y)
    assert y.shape == (batch, planes, hw, hw) and y.dtype == jnp.float32

    y_ref = jax.jit(lambda inp: basic_block_reference(inp, raw))(x)
    err = float(jnp.max(jnp.abs(y - y_ref)) / (jnp.max(jnp.abs(y_ref)) + 1e-6))
    assert err < 5e-2, f"mismatch vs reference: rel-to-max err {err}"

    print("KERNEL_OK")
</pallas_src>

<mosaic_0001>
module attributes {stable_mosaic.version = 11 : i64} {
  func.func @_basic_block_kernel(%arg0: i32, %arg1: memref<1x328x128xf32, #tpu.memory_space<vmem>>, %arg2: memref<1x288x128xf32, #tpu.memory_space<vmem>>, %arg3: memref<288x1xf32, #tpu.memory_space<vmem>>, %arg4: memref<9x128x128xbf16, #tpu.memory_space<vmem>>, %arg5: memref<1x128xf32, #tpu.memory_space<vmem>>, %arg6: memref<1x128xf32, #tpu.memory_space<vmem>>, %arg7: memref<9x128x128xbf16, #tpu.memory_space<vmem>>, %arg8: memref<1x128xf32, #tpu.memory_space<vmem>>, %arg9: memref<1x128xf32, #tpu.memory_space<vmem>>, %arg10: memref<1x288x128xf32, #tpu.memory_space<vmem>>, %arg11: memref<328x128xf32, #tpu.memory_space<vmem>>, %arg12: memref<288x128xf32, #tpu.memory_space<vmem>>) attributes {dimension_semantics = [#tpu.dimension_semantics<parallel>], iteration_bounds = array<i64: 2>, scalar_prefetch = 0 : i64, scratch_operands = 2 : i64, tpu.core_type = #tpu.core_type<tc>, window_params = [{transform_indices = @transform_0, window_bounds = array<i64: 1, 328, 128>}, {transform_indices = @transform_1, window_bounds = array<i64: 1, 288, 128>}, {pipeline_mode = #tpu.pipeline_mode<synchronous>, transform_indices = @transform_2, window_bounds = array<i64: 288, 1>}, {pipeline_mode = #tpu.pipeline_mode<synchronous>, transform_indices = @transform_3, window_bounds = array<i64: 9, 128, 128>}, {pipeline_mode = #tpu.pipeline_mode<synchronous>, transform_indices = @transform_4, window_bounds = array<i64: 1, 128>}, {pipeline_mode = #tpu.pipeline_mode<synchronous>, transform_indices = @transform_5, window_bounds = array<i64: 1, 128>}, {pipeline_mode = #tpu.pipeline_mode<synchronous>, transform_indices = @transform_6, window_bounds = array<i64: 9, 128, 128>}, {pipeline_mode = #tpu.pipeline_mode<synchronous>, transform_indices = @transform_7, window_bounds = array<i64: 1, 128>}, {pipeline_mode = #tpu.pipeline_mode<synchronous>, transform_indices = @transform_8, window_bounds = array<i64: 1, 128>}, {transform_indices = @transform_9, window_bounds = array<i64: 1, 288, 128>}]} {
    %cst = arith.constant 0.000000e+00 : f32
    %0 = vector.broadcast %cst : f32 to vector<288x128xf32>
    %c0 = arith.constant 0 : index
    %c0_0 = arith.constant 0 : index
    %1 = vector.load %arg12[%c0, %c0_0] : memref<288x128xf32, #tpu.memory_space<vmem>>, vector<288x128xf32>
    tpu.vector_store %arg12[%c0, %c0_0], %0 {strides = array<i32>} : memref<288x128xf32, #tpu.memory_space<vmem>>, vector<288x128xf32>,
    %c0_1 = arith.constant 0 : index
    %c0_2 = arith.constant 0 : index
    %c0_3 = arith.constant 0 : index
    %2 = vector.load %arg1[%c0_1, %c0_2, %c0_3] : memref<1x328x128xf32, #tpu.memory_space<vmem>>, vector<1x288x128xf32>
    %3 = vector.shape_cast %2 : vector<1x288x128xf32> to vector<288x128xf32>
    %4 = arith.truncf %3 : vector<288x128xf32> to vector<288x128xbf16>
    %c0_4 = arith.constant 0 : index
    %c0_5 = arith.constant 0 : index
    %5 = vector.load %arg12[%c0_4, %c0_5] : memref<288x128xf32, #tpu.memory_space<vmem>>, vector<288x128xf32>
    %c0_6 = arith.constant 0 : index
    %c0_7 = arith.constant 0 : index
    %c0_8 = arith.constant 0 : index
    %6 = vector.load %arg4[%c0_6, %c0_7, %c0_8] : memref<9x128x128xbf16, #tpu.memory_space<vmem>>, vector<1x128x128xbf16>
    %7 = vector.shape_cast %6 : vector<1x128x128xbf16> to vector<128x128xbf16>
    %cst_9 = arith.constant dense<0.000000e+00> : vector<288x128xf32>
    %8 = tpu.matmul %4, %7, %cst_9 {dimension_numbers = #tpu.dot_dimension_numbers<[1], [0], [0], [1], [0, 0, 1, 1], [], []>} : vector<288x128xbf16>, vector<128x128xbf16>, vector<288x128xf32> -> vector<288x128xf32>
    %9 = arith.addf %5, %8 : vector<288x128xf32>
    %c0_10 = arith.constant 0 : index
    %c0_11 = arith.constant 0 : index
    %10 = vector.load %arg12[%c0_10, %c0_11] : memref<288x128xf32, #tpu.memory_space<vmem>>, vector<288x128xf32>
    tpu.vector_store %arg12[%c0_10, %c0_11], %9 {strides = array<i32>} : memref<288x128xf32, #tpu.memory_space<vmem>>, vector<288x128xf32>,
    %c0_12 = arith.constant 0 : index
    %c1 = arith.constant 1 : index
    %c0_13 = arith.constant 0 : index
    %11 = vector.load %arg1[%c0_12, %c1, %c0_13] : memref<1x328x128xf32, #tpu.memory_space<vmem>>, vector<1x288x128xf32>
    %12 = vector.shape_cast %11 : vector<1x288x128xf32> to vector<288x128xf32>
    %13 = arith.truncf %12 : vector<288x128xf32> to vector<288x128xbf16>
    %c0_14 = arith.constant 0 : index
    %c0_15 = arith.constant 0 : index
    %14 = vector.load %arg12[%c0_14, %c0_15] : memref<288x128xf32, #tpu.memory_space<vmem>>, vector<288x128xf32>
    %c1_16 = arith.constant 1 : index
    %c0_17 = arith.constant 0 : index
    %c0_18 = arith.constant 0 : index
    %15 = vector.load %arg4[%c1_16, %c0_17, %c0_18] : memref<9x128x128xbf16, #tpu.memory_space<vmem>>, vector<1x128x128xbf16>
    %16 = vector.shape_cast %15 : vector<1x128x128xbf16> to vector<128x128xbf16>
    %cst_19 = arith.constant dense<0.000000e+00> : vector<288x128xf32>
    %17 = tpu.matmul %13, %16, %cst_19 {dimension_numbers = #tpu.dot_dimension_numbers<[1], [0], [0], [1], [0, 0, 1, 1], [], []>} : vector<288x128xbf16>, vector<128x128xbf16>, vector<288x128xf32> -> vector<288x128xf32>
    %18 = arith.addf %14, %17 : vector<288x128xf32>
    %c0_20 = arith.constant 0 : index
    %c0_21 = arith.constant 0 : index
    %19 = vector.load %arg12[%c0_20, %c0_21] : memref<288x128xf32, #tpu.memory_space<vmem>>, vector<288x128xf32>
    tpu.vector_store %arg12[%c0_20, %c0_21], %18 {strides = array<i32>} : memref<288x128xf32, #tpu.memory_space<vmem>>, vector<288x128xf32>,
    %c0_22 = arith.constant 0 : index
    %c2 = arith.constant 2 : index
    %c0_23 = arith.constant 0 : index
    %20 = vector.load %arg1[%c0_22, %c2, %c0_23] : memref<1x328x128xf32, #tpu.memory_space<vmem>>, vector<1x288x128xf32>
    %21 = vector.shape_cast %20 : vector<1x288x128xf32> to vector<288x128xf32>
    %22 = arith.truncf %21 : vector<288x128xf32> to vector<288x128xbf16>
    %c0_24 = arith.constant 0 : index
    %c0_25 = arith.constant 0 : index
    %23 = vector.load %arg12[%c0_24, %c0_25] : memref<288x128xf32, #tpu.memory_space<vmem>>, vector<288x128xf32>
    %c2_26 = arith.constant 2 : index
    %c0_27 = arith.constant 0 : index
    %c0_28 = arith.constant 0 : index
    %24 = vector.load %arg4[%c2_26, %c0_27, %c0_28] : memref<9x128x128xbf16, #tpu.memory_space<vmem>>, vector<1x128x128xbf16>
    %25 = vector.shape_cast %24 : vector<1x128x128xbf16> to vector<128x128xbf16>
    %cst_29 = arith.constant dense<0.000000e+00> : vector<288x128xf32>
    %26 = tpu.matmul %22, %25, %cst_29 {dimension_numbers = #tpu.dot_dimension_numbers<[1], [0], [0], [1], [0, 0, 1, 1], [], []>} : vector<288x128xbf16>, vector<128x128xbf16>, vector<288x128xf32> -> vector<288x128xf32>
    %27 = arith.addf %23, %26 : vector<288x128xf32>
    %c0_30 = arith.constant 0 : index
    %c0_31 = arith.constant 0 : index
    %28 = vector.load %arg12[%c0_30, %c0_31] : memref<288x128xf32, #tpu.memory_space<vmem>>, vector<288x128xf32>
    tpu.vector_store %arg12[%c0_30, %c0_31], %27 {strides = array<i32>} : memref<288x128xf32, #tpu.memory_space<vmem>>, vector<288x128xf32>,
    %c0_32 = arith.constant 0 : index
    %c18 = arith.constant 18 : index
    %c0_33 = arith.constant 0 : index
    %29 = vector.load %arg1[%c0_32, %c18, %c0_33] : memref<1x328x128xf32, #tpu.memory_space<vmem>>, vector<1x288x128xf32>
    %30 = vector.shape_cast %29 : vector<1x288x128xf32> to vector<288x128xf32>
    %31 = arith.truncf %30 : vector<288x128xf32> to vector<288x128xbf16>
    %c0_34 = arith.constant 0 : index
    %c0_35 = arith.constant 0 : index
    %32 = vector.load %arg12[%c0_34, %c0_35] : memref<288x128xf32, #tpu.memory_space<vmem>>, vector<288x128xf32>
    %c3 = arith.constant 3 : index
    %c0_36 = arith.constant 0 : index
    %c0_37 = arith.constant 0 : index
    %33 = vector.load %arg4[%c3, %c0_36, %c0_37] : memref<9x128x128xbf16, #tpu.memory_space<vmem>>, vector<1x128x128xbf16>
    %34 = vector.shape_cast %33 : vector<1x128x128xbf16> to vector<128x128xbf16>
    %cst_38 = arith.constant dense<0.000000e+00> : vector<288x128xf32>
    %35 = tpu.matmul %31, %34, %cst_38 {dimension_numbers = #tpu.dot_dimension_numbers<[1], [0], [0], [1], [0, 0, 1, 1], [], []>} : vector<288x128xbf16>, vector<128x128xbf16>, vector<288x128xf32> -> vector<288x128xf32>
    %36 = arith.addf %32, %35 : vector<288x128xf32>
    %c0_39 = arith.constant 0 : index
    %c0_40 = arith.constant 0 : index
    %37 = vector.load %arg12[%c0_39, %c0_40] : memref<288x128xf32, #tpu.memory_space<vmem>>, vector<288x128xf32>
    tpu.vector_store %arg12[%c0_39, %c0_40], %36 {strides = array<i32>} : memref<288x128xf32, #tpu.memory_space<vmem>>, vector<288x128xf32>,
    %c0_41 = arith.constant 0 : index
    %c19 = arith.constant 19 : index
    %c0_42 = arith.constant 0 : index
    %38 = vector.load %arg1[%c0_41, %c19, %c0_42] : memref<1x328x128xf32, #tpu.memory_space<vmem>>, vector<1x288x128xf32>
    %39 = vector.shape_cast %38 : vector<1x288x128xf32> to vector<288x128xf32>
    %40 = arith.truncf %39 : vector<288x128xf32> to vector<288x128xbf16>
    %c0_43 = arith.constant 0 : index
    %c0_44 = arith.constant 0 : index
    %41 = vector.load %arg12[%c0_43, %c0_44] : memref<288x128xf32, #tpu.memory_space<vmem>>, vector<288x128xf32>
    %c4 = arith.constant 4 : index
    %c0_45 = arith.constant 0 : index
    %c0_46 = arith.constant 0 : index
    %42 = vector.load %arg4[%c4, %c0_45, %c0_46] : memref<9x128x128xbf16, #tpu.memory_space<vmem>>, vector<1x128x128xbf16>
    %43 = vector.shape_cast %42 : vector<1x128x128xbf16> to vector<128x128xbf16>
    %cst_47 = arith.constant dense<0.000000e+00> : vector<288x128xf32>
    %44 = tpu.matmul %40, %43, %cst_47 {dimension_numbers = #tpu.dot_dimension_numbers<[1], [0], [0], [1], [0, 0, 1, 1], [], []>} : vector<288x128xbf16>, vector<128x128xbf16>, vector<288x128xf32> -> vector<288x128xf32>
    %45 = arith.addf %41, %44 : vector<288x128xf32>
    %c0_48 = arith.constant 0 : index
    %c0_49 = arith.constant 0 : index
    %46 = vector.load %arg12[%c0_48, %c0_49] : memref<288x128xf32, #tpu.memory_space<vmem>>, vector<288x128xf32>
    tpu.vector_store %arg12[%c0_48, %c0_49], %45 {strides = array<i32>} : memref<288x128xf32, #tpu.memory_space<vmem>>, vector<288x128xf32>,
    %c0_50 = arith.constant 0 : index
    %c20 = arith.constant 20 : index
    %c0_51 = arith.constant 0 : index
    %47 = vector.load %arg1[%c0_50, %c20, %c0_51] : memref<1x328x128xf32, #tpu.memory_space<vmem>>, vector<1x288x128xf32>
    %48 = vector.shape_cast %47 : vector<1x288x128xf32> to vector<288x128xf32>
    %49 = arith.truncf %48 : vector<288x128xf32> to vector<288x128xbf16>
    %c0_52 = arith.constant 0 : index
    %c0_53 = arith.constant 0 : index
    %50 = vector.load %arg12[%c0_52, %c0_53] : memref<288x128xf32, #tpu.memory_space<vmem>>, vector<288x128xf32>
    %c5 = arith.constant 5 : index
    %c0_54 = arith.constant 0 : index
    %c0_55 = arith.constant 0 : index
    %51 = vector.load %arg4[%c5, %c0_54, %c0_55] : memref<9x128x128xbf16, #tpu.memory_space<vmem>>, vector<1x128x128xbf16>
    %52 = vector.shape_cast %51 : vector<1x128x128xbf16> to vector<128x128xbf16>
    %cst_56 = arith.constant dense<0.000000e+00> : vector<288x128xf32>
    %53 = tpu.matmul %49, %52, %cst_56 {dimension_numbers = #tpu.dot_dimension_numbers<[1], [0], [0], [1], [0, 0, 1, 1], [], []>} : vector<288x128xbf16>, vector<128x128xbf16>, vector<288x128xf32> -> vector<288x128xf32>
    %54 = arith.addf %50, %53 : vector<288x128xf32>
    %c0_57 = arith.constant 0 : index
    %c0_58 = arith.constant 0 : index
    %55 = vector.load %arg12[%c0_57, %c0_58] : memref<288x128xf32, #tpu.memory_space<vmem>>, vector<288x128xf32>
    tpu.vector_store %arg12[%c0_57, %c0_58], %54 {strides = array<i32>} : memref<288x128xf32, #tpu.memory_space<vmem>>, vector<288x128xf32>,
    %c0_59 = arith.constant 0 : index
    %c36 = arith.constant 36 : index
    %c0_60 = arith.constant 0 : index
    %56 = vector.load %arg1[%c0_59, %c36, %c0_60] : memref<1x328x128xf32, #tpu.memory_space<vmem>>, vector<1x288x128xf32>
    %57 = vector.shape_cast %56 : vector<1x288x128xf32> to vector<288x128xf32>
    %58 = arith.truncf %57 : vector<288x128xf32> to vector<288x128xbf16>
    %c0_61 = arith.constant 0 : index
    %c0_62 = arith.constant 0 : index
    %59 = vector.load %arg12[%c0_61, %c0_62] : memref<288x128xf32, #tpu.memory_space<vmem>>, vector<288x128xf32>
    %c6 = arith.constant 6 : index
    %c0_63 = arith.constant 0 : index
    %c0_64 = arith.constant 0 : index
    %60 = vector.load %arg4[%c6, %c0_63, %c0_64] : memref<9x128x128xbf16, #tpu.memory_space<vmem>>, vector<1x128x128xbf16>
    %61 = vector.shape_cast %60 : vector<1x128x128xbf16> to vector<128x128xbf16>
    %cst_65 = arith.constant dense<0.000000e+00> : vector<288x128xf32>
    %62 = tpu.matmul %58, %61, %cst_65 {dimension_numbers = #tpu.dot_dimension_numbers<[1], [0], [0], [1], [0, 0, 1, 1], [], []>} : vector<288x128xbf16>, vector<128x128xbf16>, vector<288x128xf32> -> vector<288x128xf32>
    %63 = arith.addf %59, %62 : vector<288x128xf32>
    %c0_66 = arith.constant 0 : index
    %c0_67 = arith.constant 0 : index
    %64 = vector.load %arg12[%c0_66, %c0_67] : memref<288x128xf32, #tpu.memory_space<vmem>>, vector<288x128xf32>
    tpu.vector_store %arg12[%c0_66, %c0_67], %63 {strides = array<i32>} : memref<288x128xf32, #tpu.memory_space<vmem>>, vector<288x128xf32>,
    %c0_68 = arith.constant 0 : index
    %c37 = arith.constant 37 : index
    %c0_69 = arith.constant 0 : index
    %65 = vector.load %arg1[%c0_68, %c37, %c0_69] : memref<1x328x128xf32, #tpu.memory_space<vmem>>, vector<1x288x128xf32>
    %66 = vector.shape_cast %65 : vector<1x288x128xf32> to vector<288x128xf32>
    %67 = arith.truncf %66 : vector<288x128xf32> to vector<288x128xbf16>
    %c0_70 = arith.constant 0 : index
    %c0_71 = arith.constant 0 : index
    %68 = vector.load %arg12[%c0_70, %c0_71] : memref<288x128xf32, #tpu.memory_space<vmem>>, vector<288x128xf32>
    %c7 = arith.constant 7 : index
    %c0_72 = arith.constant 0 : index
    %c0_73 = arith.constant 0 : index
    %69 = vector.load %arg4[%c7, %c0_72, %c0_73] : memref<9x128x128xbf16, #tpu.memory_space<vmem>>, vector<1x128x128xbf16>
    %70 = vector.shape_cast %69 : vector<1x128x128xbf16> to vector<128x128xbf16>
    %cst_74 = arith.constant dense<0.000000e+00> : vector<288x128xf32>
    %71 = tpu.matmul %67, %70, %cst_74 {dimension_numbers = #tpu.dot_dimension_numbers<[1], [0], [0], [1], [0, 0, 1, 1], [], []>} : vector<288x128xbf16>, vector<128x128xbf16>, vector<288x128xf32> -> vector<288x128xf32>
    %72 = arith.addf %68, %71 : vector<288x128xf32>
    %c0_75 = arith.constant 0 : index
    %c0_76 = arith.constant 0 : index
    %73 = vector.load %arg12[%c0_75, %c0_76] : memref<288x128xf32, #tpu.memory_space<vmem>>, vector<288x128xf32>
    tpu.vector_store %arg12[%c0_75, %c0_76], %72 {strides = array<i32>} : memref<288x128xf32, #tpu.memory_space<vmem>>, vector<288x128xf32>,
    %c0_77 = arith.constant 0 : index
    %c38 = arith.constant 38 : index
    %c0_78 = arith.constant 0 : index
    %74 = vector.load %arg1[%c0_77, %c38, %c0_78] : memref<1x328x128xf32, #tpu.memory_space<vmem>>, vector<1x288x128xf32>
    %75 = vector.shape_cast %74 : vector<1x288x128xf32> to vector<288x128xf32>
    %76 = arith.truncf %75 : vector<288x128xf32> to vector<288x128xbf16>
    %c0_79 = arith.constant 0 : index
    %c0_80 = arith.constant 0 : index
    %77 = vector.load %arg12[%c0_79, %c0_80] : memref<288x128xf32, #tpu.memory_space<vmem>>, vector<288x128xf32>
    %c8 = arith.constant 8 : index
    %c0_81 = arith.constant 0 : index
    %c0_82 = arith.constant 0 : index
    %78 = vector.load %arg4[%c8, %c0_81, %c0_82] : memref<9x128x128xbf16, #tpu.memory_space<vmem>>, vector<1x128x128xbf16>
    %79 = vector.shape_cast %78 : vector<1x128x128xbf16> to vector<128x128xbf16>
    %cst_83 = arith.constant dense<0.000000e+00> : vector<288x128xf32>
    %80 = tpu.matmul %76, %79, %cst_83 {dimension_numbers = #tpu.dot_dimension_numbers<[1], [0], [0], [1], [0, 0, 1, 1], [], []>} : vector<288x128xbf16>, vector<128x128xbf16>, vector<288x128xf32> -> vector<288x128xf32>
    %81 = arith.addf %77, %80 : vector<288x128xf32>
    %c0_84 = arith.constant 0 : index
    %c0_85 = arith.constant 0 : index
    %82 = vector.load %arg12[%c0_84, %c0_85] : memref<288x128xf32, #tpu.memory_space<vmem>>, vector<288x128xf32>
    tpu.vector_store %arg12[%c0_84, %c0_85], %81 {strides = array<i32>} : memref<288x128xf32, #tpu.memory_space<vmem>>, vector<288x128xf32>,
    %c0_86 = arith.constant 0 : index
    %c0_87 = arith.constant 0 : index
    %83 = vector.load %arg12[%c0_86, %c0_87] : memref<288x128xf32, #tpu.memory_space<vmem>>, vector<288x128xf32>
    %c0_88 = arith.constant 0 : index
    %c0_89 = arith.constant 0 : index
    %84 = vector.load %arg5[%c0_88, %c0_89] : memref<1x128xf32, #tpu.memory_space<vmem>>, vector<1x128xf32>
    %85 = vector.broadcast %84 : vector<1x128xf32> to vector<288x128xf32>
    %86 = arith.mulf %83, %85 : vector<288x128xf32>
    %c0_90 = arith.constant 0 : index
    %c0_91 = arith.constant 0 : index
    %87 = vector.load %arg6[%c0_90, %c0_91] : memref<1x128xf32, #tpu.memory_space<vmem>>, vector<1x128xf32>
    %88 = vector.broadcast %87 : vector<1x128xf32> to vector<288x128xf32>
    %89 = arith.addf %86, %88 : vector<288x128xf32>
    %cst_92 = arith.constant 0.000000e+00 : f32
    %90 = vector.broadcast %cst_92 : f32 to vector<288x128xf32>
    %91 = arith.maximumf %89, %90 : vector<288x128xf32>
    %cst_93 = arith.constant 0.000000e+00 : f32
    %92 = vector.broadcast %cst_93 : f32 to vector<328x128xf32>
    %c0_94 = arith.constant 0 : index
    %c0_95 = arith.constant 0 : index
    %93 = vector.load %arg11[%c0_94, %c0_95] : memref<328x128xf32, #tpu.memory_space<vmem>>, vector<328x128xf32>
    tpu.vector_store %arg11[%c0_94, %c0_95], %92 {strides = array<i32>} : memref<328x128xf32, #tpu.memory_space<vmem>>, vector<328x128xf32>,
    %c0_96 = arith.constant 0 : index
    %c0_97 = arith.constant 0 : index
    %94 = vector.load %arg3[%c0_96, %c0_97] : memref<288x1xf32, #tpu.memory_space<vmem>>, vector<288x1xf32>
    %95 = vector.broadcast %94 : vector<288x1xf32> to vector<288x128xf32>
    %96 = arith.mulf %91, %95 : vector<288x128xf32>
    %c19_98 = arith.constant 19 : index
    %c0_99 = arith.constant 0 : index
    %97 = vector.load %arg11[%c19_98, %c0_99] : memref<328x128xf32, #tpu.memory_space<vmem>>, vector<288x128xf32>
    tpu.vector_store %arg11[%c19_98, %c0_99], %96 {strides = array<i32>} : memref<328x128xf32, #tpu.memory_space<vmem>>, vector<288x128xf32>,
    %cst_100 = arith.constant 0.000000e+00 : f32
    %98 = vector.broadcast %cst_100 : f32 to vector<288x128xf32>
    %c0_101 = arith.constant 0 : index
    %c0_102 = arith.constant 0 : index
    %99 = vector.load %arg12[%c0_101, %c0_102] : memref<288x128xf32, #tpu.memory_space<vmem>>, vector<288x128xf32>
    tpu.vector_store %arg12[%c0_101, %c0_102], %98 {strides = array<i32>} : memref<288x128xf32, #tpu.memory_space<vmem>>, vector<288x128xf32>,
    %c0_103 = arith.constant 0 : index
    %c0_104 = arith.constant 0 : index
    %100 = vector.load %arg11[%c0_103, %c0_104] : memref<328x128xf32, #tpu.memory_space<vmem>>, vector<288x128xf32>
    %101 = arith.truncf %100 : vector<288x128xf32> to vector<288x128xbf16>
    %c0_105 = arith.constant 0 : index
    %c0_106 = arith.constant 0 : index
    %102 = vector.load %arg12[%c0_105, %c0_106] : memref<288x128xf32, #tpu.memory_space<vmem>>, vector<288x128xf32>
    %c0_107 = arith.constant 0 : index
    %c0_108 = arith.constant 0 : index
    %c0_109 = arith.constant 0 : index
    %103 = vector.load %arg7[%c0_107, %c0_108, %c0_109] : memref<9x128x128xbf16, #tpu.memory_space<vmem>>, vector<1x128x128xbf16>
    %104 = vector.shape_cast %103 : vector<1x128x128xbf16> to vector<128x128xbf16>
    %cst_110 = arith.constant dense<0.000000e+00> : vector<288x128xf32>
    %105 = tpu.matmul %101, %104, %cst_110 {dimension_numbers = #tpu.dot_dimension_numbers<[1], [0], [0], [1], [0, 0, 1, 1], [], []>} : vector<288x128xbf16>, vector<128x128xbf16>, vector<288x128xf32> -> vector<288x128xf32>
    %106 = arith.addf %102, %105 : vector<288x128xf32>
    %c0_111 = arith.constant 0 : index
    %c0_112 = arith.constant 0 : index
    %107 = vector.load %arg12[%c0_111, %c0_112] : memref<288x128xf32, #tpu.memory_space<vmem>>, vector<288x128xf32>
    tpu.vector_store %arg12[%c0_111, %c0_112], %106 {strides = array<i32>} : memref<288x128xf32, #tpu.memory_space<vmem>>, vector<288x128xf32>,
    %c1_113 = arith.constant 1 : index
    %c0_114 = arith.constant 0 : index
    %108 = vector.load %arg11[%c1_113, %c0_114] : memref<328x128xf32, #tpu.memory_space<vmem>>, vector<288x128xf32>
    %109 = arith.truncf %108 : vector<288x128xf32> to vector<288x128xbf16>
    %c0_115 = arith.constant 0 : index
    %c0_116 = arith.constant 0 : index
    %110 = vector.load %arg12[%c0_115, %c0_116] : memref<288x128xf32, #tpu.memory_space<vmem>>, vector<288x128xf32>
    %c1_117 = arith.constant 1 : index
    %c0_118 = arith.constant 0 : index
    %c0_119 = arith.constant 0 : index
    %111 = vector.load %arg7[%c1_117, %c0_118, %c0_119] : memref<9x128x128xbf16, #tpu.memory_space<vmem>>, vector<1x128x128xbf16>
    %112 = vector.shape_cast %111 : vector<1x128x128xbf16> to vector<128x128xbf16>
    %cst_120 = arith.constant dense<0.000000e+00> : vector<288x128xf32>
    %113 = tpu.matmul %109, %112, %cst_120 {dimension_numbers = #tpu.dot_dimension_numbers<[1], [0], [0], [1], [0, 0, 1, 1], [], []>} : vector<288x128xbf16>, vector<128x128xbf16>, vector<288x128xf32> -> vector<288x128xf32>
    %114 = arith.addf %110, %113 : vector<288x128xf32>
    %c0_121 = arith.constant 0 : index
    %c0_122 = arith.constant 0 : index
    %115 = vector.load %arg12[%c0_121, %c0_122] : memref<288x128xf32, #tpu.memory_space<vmem>>, vector<288x128xf32>
    tpu.vector_store %arg12[%c0_121, %c0_122], %114 {strides = array<i32>} : memref<288x128xf32, #tpu.memory_space<vmem>>, vector<288x128xf32>,
    %c2_123 = arith.constant 2 : index
    %c0_124 = arith.constant 0 : index
    %116 = vector.load %arg11[%c2_123, %c0_124] : memref<328x128xf32, #tpu.memory_space<vmem>>, vector<288x128xf32>
    %117 = arith.truncf %116 : vector<288x128xf32> to vector<288x128xbf16>
    %c0_125 = arith.constant 0 : index
    %c0_126 = arith.constant 0 : index
    %118 = vector.load %arg12[%c0_125, %c0_126] : memref<288x128xf32, #tpu.memory_space<vmem>>, vector<288x128xf32>
    %c2_127 = arith.constant 2 : index
    %c0_128 = arith.constant 0 : index
    %c0_129 = arith.constant 0 : index
    %119 = vector.load %arg7[%c2_127, %c0_128, %c0_129] : memref<9x128x128xbf16, #tpu.memory_space<vmem>>, vector<1x128x128xbf16>
    %120 = vector.shape_cast %119 : vector<1x128x128xbf16> to vector<128x128xbf16>
    %cst_130 = arith.constant dense<0.000000e+00> : vector<288x128xf32>
    %121 = tpu.matmul %117, %120, %cst_130 {dimension_numbers = #tpu.dot_dimension_numbers<[1], [0], [0], [1], [0, 0, 1, 1], [], []>} : vector<288x128xbf16>, vector<128x128xbf16>, vector<288x128xf32> -> vector<288x128xf32>
    %122 = arith.addf %118, %121 : vector<288x128xf32>
    %c0_131 = arith.constant 0 : index
    %c0_132 = arith.constant 0 : index
    %123 = vector.load %arg12[%c0_131, %c0_132] : memref<288x128xf32, #tpu.memory_space<vmem>>, vector<288x128xf32>
    tpu.vector_store %arg12[%c0_131, %c0_132], %122 {strides = array<i32>} : memref<288x128xf32, #tpu.memory_space<vmem>>, vector<288x128xf32>,
    %c18_133 = arith.constant 18 : index
    %c0_134 = arith.constant 0 : index
    %124 = vector.load %arg11[%c18_133, %c0_134] : memref<328x128xf32, #tpu.memory_space<vmem>>, vector<288x128xf32>
    %125 = arith.truncf %124 : vector<288x128xf32> to vector<288x128xbf16>
    %c0_135 = arith.constant 0 : index
    %c0_136 = arith.constant 0 : index
    %126 = vector.load %arg12[%c0_135, %c0_136] : memref<288x128xf32, #tpu.memory_space<vmem>>, vector<288x128xf32>
    %c3_137 = arith.constant 3 : index
    %c0_138 = arith.constant 0 : index
    %c0_139 = arith.constant 0 : index
    %127 = vector.load %arg7[%c3_137, %c0_138, %c0_139] : memref<9x128x128xbf16, #tpu.memory_space<vmem>>, vector<1x128x128xbf16>
    %128 = vector.shape_cast %127 : vector<1x128x128xbf16> to vector<128x128xbf16>
    %cst_140 = arith.constant dense<0.000000e+00> : vector<288x128xf32>
    %129 = tpu.matmul %125, %128, %cst_140 {dimension_numbers = #tpu.dot_dimension_numbers<[1], [0], [0], [1], [0, 0, 1, 1], [], []>} : vector<288x128xbf16>, vector<128x128xbf16>, vector<288x128xf32> -> vector<288x128xf32>
    %130 = arith.addf %126, %129 : vector<288x128xf32>
    %c0_141 = arith.constant 0 : index
    %c0_142 = arith.constant 0 : index
    %131 = vector.load %arg12[%c0_141, %c0_142] : memref<288x128xf32, #tpu.memory_space<vmem>>, vector<288x128xf32>
    tpu.vector_store %arg12[%c0_141, %c0_142], %130 {strides = array<i32>} : memref<288x128xf32, #tpu.memory_space<vmem>>, vector<288x128xf32>,
    %c19_143 = arith.constant 19 : index
    %c0_144 = arith.constant 0 : index
    %132 = vector.load %arg11[%c19_143, %c0_144] : memref<328x128xf32, #tpu.memory_space<vmem>>, vector<288x128xf32>
    %133 = arith.truncf %132 : vector<288x128xf32> to vector<288x128xbf16>
    %c0_145 = arith.constant 0 : index
    %c0_146 = arith.constant 0 : index
    %134 = vector.load %arg12[%c0_145, %c0_146] : memref<288x128xf32, #tpu.memory_space<vmem>>, vector<288x128xf32>
    %c4_147 = arith.constant 4 : index
    %c0_148 = arith.constant 0 : index
    %c0_149 = arith.constant 0 : index
    %135 = vector.load %arg7[%c4_147, %c0_148, %c0_149] : memref<9x128x128xbf16, #tpu.memory_space<vmem>>, vector<1x128x128xbf16>
    %136 = vector.shape_cast %135 : vector<1x128x128xbf16> to vector<128x128xbf16>
    %cst_150 = arith.constant dense<0.000000e+00> : vector<288x128xf32>
    %137 = tpu.matmul %133, %136, %cst_150 {dimension_numbers = #tpu.dot_dimension_numbers<[1], [0], [0], [1], [0, 0, 1, 1], [], []>} : vector<288x128xbf16>, vector<128x128xbf16>, vector<288x128xf32> -> vector<288x128xf32>
    %138 = arith.addf %134, %137 : vector<288x128xf32>
    %c0_151 = arith.constant 0 : index
    %c0_152 = arith.constant 0 : index
    %139 = vector.load %arg12[%c0_151, %c0_152] : memref<288x128xf32, #tpu.memory_space<vmem>>, vector<288x128xf32>
    tpu.vector_store %arg12[%c0_151, %c0_152], %138 {strides = array<i32>} : memref<288x128xf32, #tpu.memory_space<vmem>>, vector<288x128xf32>,
    %c20_153 = arith.constant 20 : index
    %c0_154 = arith.constant 0 : index
    %140 = vector.load %arg11[%c20_153, %c0_154] : memref<328x128xf32, #tpu.memory_space<vmem>>, vector<288x128xf32>
    %141 = arith.truncf %140 : vector<288x128xf32> to vector<288x128xbf16>
    %c0_155 = arith.constant 0 : index
    %c0_156 = arith.constant 0 : index
    %142 = vector.load %arg12[%c0_155, %c0_156] : memref<288x128xf32, #tpu.memory_space<vmem>>, vector<288x128xf32>
    %c5_157 = arith.constant 5 : index
    %c0_158 = arith.constant 0 : index
    %c0_159 = arith.constant 0 : index
    %143 = vector.load %arg7[%c5_157, %c0_158, %c0_159] : memref<9x128x128xbf16, #tpu.memory_space<vmem>>, vector<1x128x128xbf16>
    %144 = vector.shape_cast %143 : vector<1x128x128xbf16> to vector<128x128xbf16>
    %cst_160 = arith.constant dense<0.000000e+00> : vector<288x128xf32>
    %145 = tpu.matmul %141, %144, %cst_160 {dimension_numbers = #tpu.dot_dimension_numbers<[1], [0], [0], [1], [0, 0, 1, 1], [], []>} : vector<288x128xbf16>, vector<128x128xbf16>, vector<288x128xf32> -> vector<288x128xf32>
    %146 = arith.addf %142, %145 : vector<288x128xf32>
    %c0_161 = arith.constant 0 : index
    %c0_162 = arith.constant 0 : index
    %147 = vector.load %arg12[%c0_161, %c0_162] : memref<288x128xf32, #tpu.memory_space<vmem>>, vector<288x128xf32>
    tpu.vector_store %arg12[%c0_161, %c0_162], %146 {strides = array<i32>} : memref<288x128xf32, #tpu.memory_space<vmem>>, vector<288x128xf32>,
    %c36_163 = arith.constant 36 : index
    %c0_164 = arith.constant 0 : index
    %148 = vector.load %arg11[%c36_163, %c0_164] : memref<328x128xf32, #tpu.memory_space<vmem>>, vector<288x128xf32>
    %149 = arith.truncf %148 : vector<288x128xf32> to vector<288x128xbf16>
    %c0_165 = arith.constant 0 : index
    %c0_166 = arith.constant 0 : index
    %150 = vector.load %arg12[%c0_165, %c0_166] : memref<288x128xf32, #tpu.memory_space<vmem>>, vector<288x128xf32>
    %c6_167 = arith.constant 6 : index
    %c0_168 = arith.constant 0 : index
    %c0_169 = arith.constant 0 : index
    %151 = vector.load %arg7[%c6_167, %c0_168, %c0_169] : memref<9x128x128xbf16, #tpu.memory_space<vmem>>, vector<1x128x128xbf16>
    %152 = vector.shape_cast %151 : vector<1x128x128xbf16> to vector<128x128xbf16>
    %cst_170 = arith.constant dense<0.000000e+00> : vector<288x128xf32>
    %153 = tpu.matmul %149, %152, %cst_170 {dimension_numbers = #tpu.dot_dimension_numbers<[1], [0], [0], [1], [0, 0, 1, 1], [], []>} : vector<288x128xbf16>, vector<128x128xbf16>, vector<288x128xf32> -> vector<288x128xf32>
    %154 = arith.addf %150, %153 : vector<288x128xf32>
    %c0_171 = arith.constant 0 : index
    %c0_172 = arith.constant 0 : index
    %155 = vector.load %arg12[%c0_171, %c0_172] : memref<288x128xf32, #tpu.memory_space<vmem>>, vector<288x128xf32>
    tpu.vector_store %arg12[%c0_171, %c0_172], %154 {strides = array<i32>} : memref<288x128xf32, #tpu.memory_space<vmem>>, vector<288x128xf32>,
    %c37_173 = arith.constant 37 : index
    %c0_174 = arith.constant 0 : index
    %156 = vector.load %arg11[%c37_173, %c0_174] : memref<328x128xf32, #tpu.memory_space<vmem>>, vector<288x128xf32>
    %157 = arith.truncf %156 : vector<288x128xf32> to vector<288x128xbf16>
    %c0_175 = arith.constant 0 : index
    %c0_176 = arith.constant 0 : index
    %158 = vector.load %arg12[%c0_175, %c0_176] : memref<288x128xf32, #tpu.memory_space<vmem>>, vector<288x128xf32>
    %c7_177 = arith.constant 7 : index
    %c0_178 = arith.constant 0 : index
    %c0_179 = arith.constant 0 : index
    %159 = vector.load %arg7[%c7_177, %c0_178, %c0_179] : memref<9x128x128xbf16, #tpu.memory_space<vmem>>, vector<1x128x128xbf16>
    %160 = vector.shape_cast %159 : vector<1x128x128xbf16> to vector<128x128xbf16>
    %cst_180 = arith.constant dense<0.000000e+00> : vector<288x128xf32>
    %161 = tpu.matmul %157, %160, %cst_180 {dimension_numbers = #tpu.dot_dimension_numbers<[1], [0], [0], [1], [0, 0, 1, 1], [], []>} : vector<288x128xbf16>, vector<128x128xbf16>, vector<288x128xf32> -> vector<288x128xf32>
    %162 = arith.addf %158, %161 : vector<288x128xf32>
    %c0_181 = arith.constant 0 : index
    %c0_182 = arith.constant 0 : index
    %163 = vector.load %arg12[%c0_181, %c0_182] : memref<288x128xf32, #tpu.memory_space<vmem>>, vector<288x128xf32>
    tpu.vector_store %arg12[%c0_181, %c0_182], %162 {strides = array<i32>} : memref<288x128xf32, #tpu.memory_space<vmem>>, vector<288x128xf32>,
    %c38_183 = arith.constant 38 : index
    %c0_184 = arith.constant 0 : index
    %164 = vector.load %arg11[%c38_183, %c0_184] : memref<328x128xf32, #tpu.memory_space<vmem>>, vector<288x128xf32>
    %165 = arith.truncf %164 : vector<288x128xf32> to vector<288x128xbf16>
    %c0_185 = arith.constant 0 : index
    %c0_186 = arith.constant 0 : index
    %166 = vector.load %arg12[%c0_185, %c0_186] : memref<288x128xf32, #tpu.memory_space<vmem>>, vector<288x128xf32>
    %c8_187 = arith.constant 8 : index
    %c0_188 = arith.constant 0 : index
    %c0_189 = arith.constant 0 : index
    %167 = vector.load %arg7[%c8_187, %c0_188, %c0_189] : memref<9x128x128xbf16, #tpu.memory_space<vmem>>, vector<1x128x128xbf16>
    %168 = vector.shape_cast %167 : vector<1x128x128xbf16> to vector<128x128xbf16>
    %cst_190 = arith.constant dense<0.000000e+00> : vector<288x128xf32>
    %169 = tpu.matmul %165, %168, %cst_190 {dimension_numbers = #tpu.dot_dimension_numbers<[1], [0], [0], [1], [0, 0, 1, 1], [], []>} : vector<288x128xbf16>, vector<128x128xbf16>, vector<288x128xf32> -> vector<288x128xf32>
    %170 = arith.addf %166, %169 : vector<288x128xf32>
    %c0_191 = arith.constant 0 : index
    %c0_192 = arith.constant 0 : index
    %171 = vector.load %arg12[%c0_191, %c0_192] : memref<288x128xf32, #tpu.memory_space<vmem>>, vector<288x128xf32>
    tpu.vector_store %arg12[%c0_191, %c0_192], %170 {strides = array<i32>} : memref<288x128xf32, #tpu.memory_space<vmem>>, vector<288x128xf32>,
    %c0_193 = arith.constant 0 : index
    %c0_194 = arith.constant 0 : index
    %172 = vector.load %arg12[%c0_193, %c0_194] : memref<288x128xf32, #tpu.memory_space<vmem>>, vector<288x128xf32>
    %c0_195 = arith.constant 0 : index
    %c0_196 = arith.constant 0 : index
    %173 = vector.load %arg8[%c0_195, %c0_196] : memref<1x128xf32, #tpu.memory_space<vmem>>, vector<1x128xf32>
    %174 = vector.broadcast %173 : vector<1x128xf32> to vector<288x128xf32>
    %175 = arith.mulf %172, %174 : vector<288x128xf32>
    %c0_197 = arith.constant 0 : index
    %c0_198 = arith.constant 0 : index
    %176 = vector.load %arg9[%c0_197, %c0_198] : memref<1x128xf32, #tpu.memory_space<vmem>>, vector<1x128xf32>
    %177 = vector.broadcast %176 : vector<1x128xf32> to vector<288x128xf32>
    %178 = arith.addf %175, %177 : vector<288x128xf32>
    %c0_199 = arith.constant 0 : index
    %c0_200 = arith.constant 0 : index
    %c0_201 = arith.constant 0 : index
    %179 = vector.load %arg2[%c0_199, %c0_200, %c0_201] : memref<1x288x128xf32, #tpu.memory_space<vmem>>, vector<1x288x128xf32>
    %180 = vector.shape_cast %179 : vector<1x288x128xf32> to vector<288x128xf32>
    %181 = arith.addf %178, %180 : vector<288x128xf32>
    %cst_202 = arith.constant 0.000000e+00 : f32
    %182 = vector.broadcast %cst_202 : f32 to vector<288x128xf32>
    %183 = arith.maximumf %181, %182 : vector<288x128xf32>
    %c0_203 = arith.constant 0 : index
    %c0_204 = arith.constant 0 : index
    %c0_205 = arith.constant 0 : index
    %184 = vector.load %arg10[%c0_203, %c0_204, %c0_205] : memref<1x288x128xf32, #tpu.memory_space<vmem>>, vector<1x288x128xf32>
    %185 = vector.shape_cast %184 : vector<1x288x128xf32> to vector<288x128xf32>
    %186 = vector.shape_cast %183 : vector<288x128xf32> to vector<1x288x128xf32>
    tpu.vector_store %arg10[%c0_203, %c0_204, %c0_205], %186 {strides = array<i32>} : memref<1x288x128xf32, #tpu.memory_space<vmem>>, vector<1x288x128xf32>,
    return
  }
  func.func @transform_0(%arg0: i32) -> (i32, i32, i32) {
    %c0_i32 = arith.constant 0 : i32
    %c0_i32_0 = arith.constant 0 : i32
    %c0_i32_1 = arith.constant 0 : i32
    return %arg0, %c0_i32, %c0_i32_0 : i32, i32, i32
  }
  func.func @transform_1(%arg0: i32) -> (i32, i32, i32) {
    %c0_i32 = arith.constant 0 : i32
    %c0_i32_0 = arith.constant 0 : i32
    %c0_i32_1 = arith.constant 0 : i32
    return %arg0, %c0_i32, %c0_i32_0 : i32, i32, i32
  }
  func.func @transform_2(%arg0: i32) -> (i32, i32) {
    %c0_i32 = arith.constant 0 : i32
    %c0_i32_0 = arith.constant 0 : i32
    %c0_i32_1 = arith.constant 0 : i32
    return %c0_i32, %c0_i32_0 : i32, i32
  }
  func.func @transform_3(%arg0: i32) -> (i32, i32, i32) {
    %c0_i32 = arith.constant 0 : i32
    %c0_i32_0 = arith.constant 0 : i32
    %c0_i32_1 = arith.constant 0 : i32
    %c0_i32_2 = arith.constant 0 : i32
    return %c0_i32, %c0_i32_0, %c0_i32_1 : i32, i32, i32
  }
  func.func @transform_4(%arg0: i32) -> (i32, i32) {
    %c0_i32 = arith.constant 0 : i32
    %c0_i32_0 = arith.constant 0 : i32
    %c0_i32_1 = arith.constant 0 : i32
    return %c0_i32, %c0_i32_0 : i32, i32
  }
  func.func @transform_5(%arg0: i32) -> (i32, i32) {
    %c0_i32 = arith.constant 0 : i32
    %c0_i32_0 = arith.constant 0 : i32
    %c0_i32_1 = arith.constant 0 : i32
    return %c0_i32, %c0_i32_0 : i32, i32
  }
  func.func @transform_6(%arg0: i32) -> (i32, i32, i32) {
    %c0_i32 = arith.constant 0 : i32
    %c0_i32_0 = arith.constant 0 : i32
    %c0_i32_1 = arith.constant 0 : i32
    %c0_i32_2 = arith.constant 0 : i32
    return %c0_i32, %c0_i32_0, %c0_i32_1 : i32, i32, i32
  }
  func.func @transform_7(%arg0: i32) -> (i32, i32) {
    %c0_i32 = arith.constant 0 : i32
    %c0_i32_0 = arith.constant 0 : i32
    %c0_i32_1 = arith.constant 0 : i32
    return %c0_i32, %c0_i32_0 : i32, i32
  }
  func.func @transform_8(%arg0: i32) -> (i32, i32) {
    %c0_i32 = arith.constant 0 : i32
    %c0_i32_0 = arith.constant 0 : i32
    %c0_i32_1 = arith.constant 0 : i32
    return %c0_i32, %c0_i32_0 : i32, i32
  }
  func.func @transform_9(%arg0: i32) -> (i32, i32, i32) {
    %c0_i32 = arith.constant 0 : i32
    %c0_i32_0 = arith.constant 0 : i32
    %c0_i32_1 = arith.constant 0 : i32
    return %arg0, %c0_i32, %c0_i32_0 : i32, i32, i32
  }
}

</mosaic_0001>

<bundles_post_ra>
// kernel: _lambda_.1
= control target key start
LH: loop header
LB: loop body
LE: loop exit
PB: predicated region body
PF: predicated region fallthrough
CT: control target
= control target key end

     0   :  { %s11129_s30 = smov 0   ;;  %s12453_s0 = inlined_call_operand.vmem [shape: f32[2,328,128], index: 0, kind: input, shape index: {}]   ;;  %s12454_s1 = inlined_call_operand.vmem [shape: f32[2,288,128], index: 1, kind: input, shape index: {}]   ;;  %s12455_s2 = inlined_call_operand.vmem [shape: f32[288,1], index: 2, kind: input, shape index: {}]   ;;  %s12456_s3 = inlined_call_operand.vmem [shape: bf16[9,128,128], index: 3, kind: input, shape index: {}]   ;;  %s12457_s4 = inlined_call_operand.vmem [shape: f32[1,128], index: 4, kind: input, shape index: {}]   ;;  %s12458_s5 = inlined_call_operand.vmem [shape: f32[1,128], index: 5, kind: input, shape index: {}]   ;;  %s12459_s6 = inlined_call_operand.vmem [shape: bf16[9,128,128], index: 6, kind: input, shape index: {}]   ;;  %s12460_s7 = inlined_call_operand.vmem [shape: f32[1,128], index: 7, kind: input, shape index: {}]   ;;  %s12461_s8 = inlined_call_operand.vmem [shape: f32[1,128], index: 8, kind: input, shape index: {}]   ;;  %s12462_s9 = inlined_call_operand.vmem [shape: f32[2,288,128], index: 9, kind: output, shape index: {}]  }
   0x1 LB: > { %s8516_s10 = sadd.s32 4294967295, %s11074_s30   ;;  %p8520_p0 = scmp.ge.s32.totalorder %s11074_s30, 1  ;;  %s11074_s30 = sphi %s11129_s30, %s19_s30  }
   0x2   : > { %p297_p1 = scmp.lt.s32.totalorder %s11074_s30, 3 }
   0x4   : > { %p298_p2 = pnand %p8520_p0, %p297_p1 }
   0x5   : > { %v10924_v0 = vld [vmem:[%s12456_s3] sm:$0xff] (!%p298_p2)   ;;  %p338_p3 = scmp.lt.s32.totalorder (!%p298_p2), %s8516_s10, 1  ;;  %v10925_v1 = vld [vmem:[%s12456_s3 + $0x8] sm:$0xff] (!%p298_p2)   ;;  %v10926_v2 = vld [vmem:[%s12456_s3 + $0x10] sm:$0xff] (!%p298_p2)  }
   0x6   : > { %301 = sbr.rel (%p298_p2) target bundleno = 1711 (0x6af), region = 56  ;;  %9398 = vmatprep.subr.bf16.mxu0 (!%p298_p2), %v10924_v0  ;;  %v10927_v3 = vld [vmem:[%s12456_s3 + $0x18] sm:$0xff] (!%p298_p2)   ;;  %v10928_v7 = vld [vmem:[%s12456_s3 + $0x20] sm:$0xff] (!%p298_p2)   ;;  %v10929_v8 = vld [vmem:[%s12456_s3 + $0x28] sm:$0xff] (!%p298_p2)  }
   0x7   : > { %9399 = vmatpush3.bf16.msra.mxu0 (!%p298_p2), %v10924_v0  ;;  %v10930_v9 = vld [vmem:[%s12456_s3 + $0x30] sm:$0xff] (!%p298_p2)   ;;  %v10931_v10 = vld [vmem:[%s12456_s3 + $0x38] sm:$0xff] (!%p298_p2)   ;;  %v10932_v13 = vld [vmem:[%s12456_s3 + $0x40] sm:$0xff] (!%p298_p2)  }
   0x8   : > { %9400 = vmatprep.subr.bf16.mxu0 (!%p298_p2), %v10925_v1  ;;  %v10933_v18 = vld [vmem:[%s12456_s3 + $0x48] sm:$0xff] (!%p298_p2)   ;;  %v10934_v23 = vld [vmem:[%s12456_s3 + $0x50] sm:$0xff] (!%p298_p2)   ;;  %v10935_v26 = vld [vmem:[%s12456_s3 + $0x58] sm:$0xff] (!%p298_p2)  }
   0x9   : > { %v10936_v31 = vld [vmem:[%s12456_s3 + $0x60] sm:$0xff] (!%p298_p2)   ;;  %v10937_v34 = vld [vmem:[%s12456_s3 + $0x68] sm:$0xff] (!%p298_p2)   ;;  %v10938_v39 = vld [vmem:[%s12456_s3 + $0x70] sm:$0xff] (!%p298_p2)  }
   0xa   : > { %v10939_v41 = vld [vmem:[%s12456_s3 + $0x78] sm:$0xff] (!%p298_p2)   ;;  %v10940_v47 = vld [vmem:[%s12456_s3 + $0x80] sm:$0xff] (!%p298_p2)  }
   0xb   : > { %9401 = vmatpush3.bf16.msra.mxu0 (!%p298_p2), %v10925_v1 }
   0xc   : > { %9402 = vmatprep.subr.bf16.mxu0 (!%p298_p2), %v10926_v2 }
   0xd   : > { %s12464_s10 = smov (!%p338_p3, %s8516_s10), 1 }
   0xe   : > { %s10910_s17 = smul.u32 328, %s12464_s10 }
   0xf   : > { %9403 = vmatpush3.bf16.msra.mxu0 %v10926_v2  ;;  %s10911_s29 = smul.u32 288, %s12464_s10 }
  0x10   : > { %s11152_s20 = scalar_lea.vmem %s12453_s0, %s10910_s17  ;;  %9404 = vmatprep.subr.bf16.mxu0 %v10927_v3 }
  0x11   : > { %v390_v4 = vld [vmem:[%s11152_s20] sm:$0xff]  ;;  %v391_v5 = vld [vmem:[%s11152_s20 + $0x8] sm:$0xff]  ;;  %v392_v11 = vld [vmem:[%s11152_s20 + $0x10] sm:$0xff]  ;;  %s12294_s15 = scalar_lea.vmem %s12454_s1, %s10911_s29  ;;  %s12315_s19 = scalar_lea.vmem %s12462_s9, %s10911_s29 }
  0x12   : > { %v426_v6 = vpack.c.bf16 %v391_v5, %v390_v4  ;;  %v393_v12 = vld [vmem:[%s11152_s20 + $0x18] sm:$0xff]  ;;  %v394_v14 = vld [vmem:[%s11152_s20 + $0x20] sm:$0xff]  ;;  %v395_v15 = vld [vmem:[%s11152_s20 + $0x28] sm:$0xff] }
  0x13   : > { %9405 = vmatpush3.bf16.msra.mxu0 %v10927_v3  ;;  %v427_v16 = vpack.c.bf16 %v393_v12, %v392_v11  ;;  %v428_v17 = vpack.c.bf16 %v395_v15, %v394_v14  ;;  %v396_v19 = vld [vmem:[%s11152_s20 + $0x30] sm:$0xff]  ;;  %v397_v20 = vld [vmem:[%s11152_s20 + $0x38] sm:$0xff]  ;;  %v398_v21 = vld [vmem:[%s11152_s20 + $0x40] sm:$0xff] }
  0x14   : > { %9414 = vmatprep.mubr.bf16.mxu0 %v426_v6  ;;  %9406 = vmatprep.subr.bf16.mxu0 %v10928_v7  ;;  %v399_v22 = vld [vmem:[%s11152_s20 + $0x48] sm:$0xff]  ;;  %v429_v24 = vpack.c.bf16 %v397_v20, %v396_v19  ;;  %v400_v27 = vld [vmem:[%s11152_s20 + $0x50] sm:$0xff]  ;;  %v401_v28 = vld [vmem:[%s11152_s20 + $0x58] sm:$0xff] }
  0x15   : > { %v430_v25 = vpack.c.bf16 %v399_v22, %v398_v21  ;;  %v402_v29 = vld [vmem:[%s11152_s20 + $0x60] sm:$0xff]  ;;  %v403_v30 = vld [vmem:[%s11152_s20 + $0x68] sm:$0xff]  ;;  %v431_v32 = vpack.c.bf16 %v401_v28, %v400_v27  ;;  %v404_v35 = vld [vmem:[%s11152_s20 + $0x70] sm:$0xff] }
  0x16   : > { %v432_v33 = vpack.c.bf16 %v403_v30, %v402_v29  ;;  %v405_v36 = vld [vmem:[%s11152_s20 + $0x78] sm:$0xff]  ;;  %v406_v37 = vld [vmem:[%s11152_s20 + $0x80] sm:$0xff]  ;;  %v407_v38 = vld [vmem:[%s11152_s20 + $0x88] sm:$0xff] }
  0x17   : > { %9407 = vmatpush3.bf16.msra.mxu0 %v10928_v7  ;;  %v433_v40 = vpack.c.bf16 %v405_v36, %v404_v35  ;;  %v434_v42 = vpack.c.bf16 %v407_v38, %v406_v37  ;;  %v408_v43 = vld [vmem:[%s11152_s20 + $0x90] sm:$0xff]  ;;  %v409_v44 = vld [vmem:[%s11152_s20 + $0x98] sm:$0xff]  ;;  %v410_v45 = vld [vmem:[%s11152_s20 + $0xa0] sm:$0xff] }
  0x18   : > { %9408 = vmatprep.subr.bf16.mxu0 %v10929_v8  ;;  %v411_v46 = vld [vmem:[%s11152_s20 + $0xa8] sm:$0xff]  ;;  %v435_v48 = vpack.c.bf16 %v409_v44, %v408_v43  ;;  %v412_v50 = vld [vmem:[%s11152_s20 + $0xb0] sm:$0xff]  ;;  %v413_v51 = vld [vmem:[%s11152_s20 + $0xb8] sm:$0xff] }
  0x19   : > { %v436_v49 = vpack.c.bf16 %v411_v46, %v410_v45  ;;  %v414_v52 = vld [vmem:[%s11152_s20 + $0xc0] sm:$0xff]  ;;  %v415_v53 = vld [vmem:[%s11152_s20 + $0xc8] sm:$0xff]  ;;  %v437_v54 = vpack.c.bf16 %v413_v51, %v412_v50  ;;  %v416_v56 = vld [vmem:[%s11152_s20 + $0xd0] sm:$0xff] }
  0x1a   : > { %v438_v55 = vpack.c.bf16 %v415_v53, %v414_v52  ;;  %v417_v57 = vld [vmem:[%s11152_s20 + $0xd8] sm:$0xff]  ;;  %v418_v58 = vld [vmem:[%s11152_s20 + $0xe0] sm:$0xff]  ;;  %v419_v59 = vld [vmem:[%s11152_s20 + $0xe8] sm:$0xff] }
  0x1b   : > { %9409 = vmatpush3.bf16.msra.mxu0 %v10929_v8  ;;  %v439_v60 = vpack.c.bf16 %v417_v57, %v416_v56  ;;  %v440_v61 = vpack.c.bf16 %v419_v59, %v418_v58  ;;  %v420_v62 = vld [vmem:[%s11152_s20 + $0xf0] sm:$0xff]  ;;  %v421_v63 = vld [vmem:[%s11152_s20 + $0xf8] sm:$0xff]  ;;  %v422_v0 = vld [vmem:[%s11152_s20 + $0x100] sm:$0xff] }
  0x1c   : > { %9410 = vmatprep.subr.bf16.mxu0 %v10930_v9  ;;  %v423_v1 = vld [vmem:[%s11152_s20 + $0x108] sm:$0xff]  ;;  %v441_v2 = vpack.c.bf16 %v421_v63, %v420_v62  ;;  %v424_v4 = vld [vmem:[%s11152_s20 + $0x110] sm:$0xff]  ;;  %v425_v5 = vld [vmem:[%s11152_s20 + $0x118] sm:$0xff] }
  0x1d   : > { %v442_v3 = vpack.c.bf16 %v423_v1, %v422_v0  ;;  %v793_v6 = vld [vmem:[%s11152_s20 + $0x1] sm:$0xff]  ;;  %v794_v7 = vld [vmem:[%s11152_s20 + $0x9] sm:$0xff]  ;;  %v443_v8 = vpack.c.bf16 %v425_v5, %v424_v4  ;;  %v796_v11 = vld [vmem:[%s11152_s20 + $0x19] sm:$0xff] }
  0x1e   : > { %v797_v12 = vld [vmem:[%s11152_s20 + $0x21] sm:$0xff]  ;;  %v802_v20 = vld [vmem:[%s11152_s20 + $0x49] sm:$0xff] }
  0x1f   : > { %9411 = vmatpush3.bf16.msra.mxu0 %v10930_v9  ;;  %v829_v9 = vpack.c.bf16 %v794_v7, %v793_v6  ;;  %v10941_v15 = vld [vmem:[%s12456_s3 + $0x88] sm:$0xff]   ;;  %v10942_v21 = vld [vmem:[%s12456_s3 + $0x90] sm:$0xff]   ;;  %v10944_v29 = vld [vmem:[%s12456_s3 + $0xa0] sm:$0xff]  }
  0x20   : > { %9412 = vmatprep.subr.bf16.mxu0 %v10931_v10  ;;  %v801_v19 = vld [vmem:[%s11152_s20 + $0x41] sm:$0xff]  ;;  %v806_v28 = vld [vmem:[%s11152_s20 + $0x69] sm:$0xff] }
  0x21   : > { %v805_v27 = vld [vmem:[%s11152_s20 + $0x61] sm:$0xff]  ;;  %v810_v36 = vld [vmem:[%s11152_s20 + $0x89] sm:$0xff] }
  0x22   : > { %v809_v35 = vld [vmem:[%s11152_s20 + $0x81] sm:$0xff]  ;;  %v10946_v37 = vld [vmem:[%s12456_s3 + $0xb0] sm:$0xff]  }
  0x23   : > { %9413 = vmatpush3.bf16.msra.mxu0 %v10931_v10  ;;  %v795_v10 = vld [vmem:[%s11152_s20 + $0x11] sm:$0xff]  ;;  %v813_v43 = vld [vmem:[%s11152_s20 + $0xa1] sm:$0xff]  ;;  %v814_v44 = vld [vmem:[%s11152_s20 + $0xa9] sm:$0xff] }
  0x24   : > { %9450 = vmatprep.subr.bf16.mxu0 %v10932_v13  ;;  %v830_v14 = vpack.c.bf16 %v796_v11, %v795_v10  ;;  %v10948_v45 = vld [vmem:[%s12456_s3 + $0xc0] sm:$0xff]   ;;  %v818_v51 = vld [vmem:[%s11152_s20 + $0xc9] sm:$0xff] }
  0x25   : > { %v817_v50 = vld [vmem:[%s11152_s20 + $0xc1] sm:$0xff]  ;;  %v822_v57 = vld [vmem:[%s11152_s20 + $0xe9] sm:$0xff] }
  0x26   : > { %9415 = vmatmul.mubr.bf16.vlgmr.msra.gmra.mrb[0].mxu0 %v427_v16  ;;  %v841_v53 = vpack.c.bf16 %v818_v51, %v817_v50  ;;  %v821_v56 = vld [vmem:[%s11152_s20 + $0xe1] sm:$0xff]  ;;  %v826_v63 = vld [vmem:[%s11152_s20 + $0x109] sm:$0xff] }
  0x27   : > { %9451 = vmatpush3.bf16.msra.mxu0 %v10932_v13  ;;  %9418 = vmatprep.mubr.bf16.mxu0 %v428_v17  ;;  %v798_v13 = vld [vmem:[%s11152_s20 + $0x29] sm:$0xff]  ;;  %v799_v17 = vld [vmem:[%s11152_s20 + $0x31] sm:$0xff]  ;;  %v843_v59 = vpack.c.bf16 %v822_v57, %v821_v56  ;;  %v825_v62 = vld [vmem:[%s11152_s20 + $0x101] sm:$0xff] }
  0x28   : > { %9452 = vmatprep.subr.bf16.mxu0 %v10933_v18  ;;  %v831_v16 = vpack.c.bf16 %v798_v13, %v797_v12  ;;  %v845_v1 = vpack.c.bf16 %v826_v63, %v825_v62  ;;  %v1197_v4 = vld [vmem:[%s11152_s20 + $0x2] sm:$0xff]  ;;  %v1198_v5 = vld [vmem:[%s11152_s20 + $0xa] sm:$0xff] }
  0x29   : > { %v1233_v7 = vpack.c.bf16 %v1198_v5, %v1197_v4  ;;  %v1201_v10 = vld [vmem:[%s11152_s20 + $0x22] sm:$0xff]  ;;  %v1202_v11 = vld [vmem:[%s11152_s20 + $0x2a] sm:$0xff]  ;;  %v10959_v5 = vld [vmem:[%s12456_s3 + $0x118] sm:$0xff]  }
  0x2a   : > { %v11300_v13 = vpack.c.bf16 %v1202_v11, %v1201_v10  ;;  %v10958_v4 = vld [vmem:[%s12456_s3 + $0x110] sm:$0xff]   ;;  %v10964_v10 = vld [vmem:[%s12456_s3 + $0x140] sm:$0xff]  }
  0x2b   : > { %9453 = vmatpush3.bf16.msra.mxu0 %v10933_v18  ;;  %v800_v18 = vld [vmem:[%s11152_s20 + $0x39] sm:$0xff]  ;;  %v1635_v11 = vld [vmem:[%s11152_s20 + $0x122] sm:$0xff] }
  0x2c   : > { %9454 = vmatprep.subr.bf16.mxu0 %v10934_v23  ;;  %v832_v22 = vpack.c.bf16 %v800_v18, %v799_v17  ;;  %v1205_v17 = vld [vmem:[%s11152_s20 + $0x42] sm:$0xff]  ;;  %v1206_v18 = vld [vmem:[%s11152_s20 + $0x4a] sm:$0xff] }
  0x2e   : > { %9419 = vmatmul.mubr.bf16.gmra.mrb[4].mxu0 %v429_v24  ;;  %v833_v24 = vpack.c.bf16 %v802_v20, %v801_v19  ;;  %v10950_v19 = vld [vmem:[%s12456_s3 + $0xd0] sm:$0xff]  }
  0x2f   : > { %9422 = vmatprep.mubr.bf16.mxu0 %v430_v25  ;;  %9455 = vmatpush3.bf16.msra.mxu0 %v10934_v23  ;;  %v10943_v23 = vld [vmem:[%s12456_s3 + $0x98] sm:$0xff]  }
  0x30   : > { %9456 = vmatprep.subr.bf16.mxu0 %v10935_v26  ;;  %v803_v25 = vld [vmem:[%s11152_s20 + $0x51] sm:$0xff] }
  0x33   : > { %9457 = vmatpush3.bf16.msra.mxu0 %v10935_v26  ;;  %v804_v26 = vld [vmem:[%s11152_s20 + $0x59] sm:$0xff] }
  0x34   : > { %9458 = vmatprep.subr.bf16.mxu0 %v10936_v31  ;;  %v834_v30 = vpack.c.bf16 %v804_v26, %v803_v25  ;;  %v1209_v25 = vld [vmem:[%s11152_s20 + $0x62] sm:$0xff]  ;;  %v1210_v26 = vld [vmem:[%s11152_s20 + $0x6a] sm:$0xff] }
  0x36   : > { %9423 = vmatmul.mubr.bf16.gmra.mrb[8].mxu0 %v431_v32  ;;  %v835_v32 = vpack.c.bf16 %v806_v28, %v805_v27  ;;  %v10952_v27 = vld [vmem:[%s12456_s3 + $0xe0] sm:$0xff]  }
  0x37   : > { %9426 = vmatprep.mubr.bf16.mxu0 %v432_v33  ;;  %9459 = vmatpush3.bf16.msra.mxu0 %v10936_v31  ;;  %v10945_v31 = vld [vmem:[%s12456_s3 + $0xa8] sm:$0xff]   ;;  %v807_v33 = vld [vmem:[%s11152_s20 + $0x71] sm:$0xff] }
  0x38   : > { %9460 = vmatprep.subr.bf16.mxu0 %v10937_v34 }
  0x3b   : > { %9461 = vmatpush3.bf16.msra.mxu0 %v10937_v34  ;;  %v808_v34 = vld [vmem:[%s11152_s20 + $0x79] sm:$0xff] }
  0x3c   : > { %9462 = vmatprep.subr.bf16.mxu0 %v10938_v39  ;;  %v836_v38 = vpack.c.bf16 %v808_v34, %v807_v33  ;;  %v1213_v33 = vld [vmem:[%s11152_s20 + $0x82] sm:$0xff]  ;;  %v1214_v34 = vld [vmem:[%s11152_s20 + $0x8a] sm:$0xff] }
  0x3e   : > { %9427 = vmatmul.mubr.bf16.gmra.mrb[12].mxu0 %v433_v40  ;;  %v837_v40 = vpack.c.bf16 %v810_v36, %v809_v35  ;;  %v10954_v35 = vld [vmem:[%s12456_s3 + $0xf0] sm:$0xff]  }
  0x3f   : > { %9430 = vmatprep.mubr.bf16.mxu0 %v434_v42  ;;  %9463 = vmatpush3.bf16.msra.mxu0 %v10938_v39  ;;  %v10947_v39 = vld [vmem:[%s12456_s3 + $0xb8] sm:$0xff]  }
  0x40   : > { %9464 = vmatprep.subr.bf16.mxu0 %v10939_v41  ;;  %v812_v42 = vld [vmem:[%s11152_s20 + $0x99] sm:$0xff] }
  0x43   : > { %9465 = vmatpush3.bf16.msra.mxu0 %v10939_v41  ;;  %v811_v41 = vld [vmem:[%s11152_s20 + $0x91] sm:$0xff] }
  0x44   : > { %9502 = vmatprep.subr.bf16.mxu0 %v10940_v47  ;;  %v838_v46 = vpack.c.bf16 %v812_v42, %v811_v41  ;;  %v1217_v41 = vld [vmem:[%s11152_s20 + $0xa2] sm:$0xff]  ;;  %v1218_v42 = vld [vmem:[%s11152_s20 + $0xaa] sm:$0xff] }
  0x46   : > { %9431 = vmatmul.mubr.bf16.gmra.mrb[16].mxu0 %v435_v48  ;;  %v815_v48 = vld [vmem:[%s11152_s20 + $0xb1] sm:$0xff] }
  0x47   : > { %9434 = vmatprep.mubr.bf16.mxu0 %v436_v49  ;;  %v816_v49 = vld [vmem:[%s11152_s20 + $0xb9] sm:$0xff] }
  0x48   : > { %v840_v52 = vpack.c.bf16 %v816_v49, %v815_v48  ;;  %v1221_v48 = vld [vmem:[%s11152_s20 + $0xc2] sm:$0xff]  ;;  %v1222_v49 = vld [vmem:[%s11152_s20 + $0xca] sm:$0xff] }
  0x49   : > { %v1245_v51 = vpack.c.bf16 %v1222_v49, %v1221_v48  ;;  %v2023_v48 = vld [vmem:[%s11152_s20 + $0xa3] sm:$0xff]  ;;  %v2024_v49 = vld [vmem:[%s11152_s20 + $0xab] sm:$0xff] }
  0x4e   : > { %9435 = vmatmul.mubr.bf16.gmra.mrb[20].mxu0 %v437_v54  ;;  %v819_v54 = vld [vmem:[%s11152_s20 + $0xd1] sm:$0xff] }
  0x4f   : > { %9438 = vmatprep.mubr.bf16.mxu0 %v438_v55  ;;  %v820_v55 = vld [vmem:[%s11152_s20 + $0xd9] sm:$0xff] }
  0x50   : > { %v842_v58 = vpack.c.bf16 %v820_v55, %v819_v54  ;;  %v1225_v54 = vld [vmem:[%s11152_s20 + $0xe2] sm:$0xff]  ;;  %v1226_v55 = vld [vmem:[%s11152_s20 + $0xea] sm:$0xff] }
  0x51   : > { %v1247_v57 = vpack.c.bf16 %v1226_v55, %v1225_v54  ;;  %v2027_v55 = vld [vmem:[%s11152_s20 + $0xc3] sm:$0xff] }
  0x56   : > { %9439 = vmatmul.mubr.bf16.gmra.mrb[24].mxu0 %v439_v60  ;;  %v823_v60 = vld [vmem:[%s11152_s20 + $0xf1] sm:$0xff] }
  0x57   : > { %9442 = vmatprep.mubr.bf16.mxu0 %v440_v61  ;;  %v824_v61 = vld [vmem:[%s11152_s20 + $0xf9] sm:$0xff] }
  0x58   : > { %v844_v0 = vpack.c.bf16 %v824_v61, %v823_v60  ;;  %v1229_v60 = vld [vmem:[%s11152_s20 + $0x102] sm:$0xff]  ;;  %v1230_v61 = vld [vmem:[%s11152_s20 + $0x10a] sm:$0xff] }
  0x59   : > { %v1249_v63 = vpack.c.bf16 %v1230_v61, %v1229_v60  ;;  %v2031_v61 = vld [vmem:[%s11152_s20 + $0xe3] sm:$0xff] }
  0x5e   : > { %9443 = vmatmul.mubr.bf16.gmra.mrb[28].mxu0 %v441_v2  ;;  %v827_v2 = vld [vmem:[%s11152_s20 + $0x111] sm:$0xff] }
  0x5f   : > { %9446 = vmatprep.mubr.bf16.mxu0 %v442_v3  ;;  %v828_v3 = vld [vmem:[%s11152_s20 + $0x119] sm:$0xff] }
  0x60   : > { %v846_v6 = vpack.c.bf16 %v828_v3, %v827_v2  ;;  %v10957_v3 = vld [vmem:[%s12456_s3 + $0x108] sm:$0xff]  }
  0x66   : > { %9447 = vmatmul.mubr.bf16.gmra.mrb[32].mxu0 %v443_v8  ;;  %v1199_v8 = vld [vmem:[%s11152_s20 + $0x12] sm:$0xff] }
  0x67   : > { %9466 = vmatprep.mubr.bf16.mxu0 %v829_v9  ;;  %v1200_v9 = vld [vmem:[%s11152_s20 + $0x1a] sm:$0xff] }
  0x68   : > { %v11298_v12 = vpack.c.bf16 %v1200_v9, %v1199_v8  ;;  %v10962_v8 = vld [vmem:[%s12456_s3 + $0x130] sm:$0xff]   ;;  %v10963_v9 = vld [vmem:[%s12456_s3 + $0x138] sm:$0xff]  }
  0x6e   : > { %9467 = vmatmul.mubr.bf16.vlgmr.msra.gmra.mrb[0].mxu0 %v830_v14  ;;  %v10949_v14 = vld [vmem:[%s12456_s3 + $0xc8] sm:$0xff]  }
  0x6f   : > { %9503 = vmatpush3.bf16.msra.mxu0 %v10940_v47  ;;  %9470 = vmatprep.mubr.bf16.mxu0 %v831_v16  ;;  %v839_v47 = vpack.c.bf16 %v814_v44, %v813_v43  ;;  %v1204_v16 = vld [vmem:[%s11152_s20 + $0x3a] sm:$0xff] }
  0x70   : > { %9504 = vmatprep.subr.bf16.mxu0 %v10941_v15  ;;  %v10956_v43 = vld [vmem:[%s12456_s3 + $0x100] sm:$0xff]  }
  0x73   : > { %9505 = vmatpush3.bf16.msra.mxu0 %v10941_v15  ;;  %v1203_v15 = vld [vmem:[%s11152_s20 + $0x32] sm:$0xff] }
  0x74   : > { %9506 = vmatprep.subr.bf16.mxu0 %v10942_v21  ;;  %v11314_v20 = vpack.c.bf16 %v1204_v16, %v1203_v15 }
  0x76   : > { %9471 = vmatmul.mubr.bf16.gmra.mrb[4].mxu0 %v832_v22  ;;  %v10951_v22 = vld [vmem:[%s12456_s3 + $0xd8] sm:$0xff]  }
  0x77   : > { %9474 = vmatprep.mubr.bf16.mxu0 %v833_v24  ;;  %9507 = vmatpush3.bf16.msra.mxu0 %v10942_v21  ;;  %v11316_v21 = vpack.c.bf16 %v1206_v18, %v1205_v17  ;;  %v1208_v24 = vld [vmem:[%s11152_s20 + $0x5a] sm:$0xff]  ;;  %v2007_v17 = vld [vmem:[%s11152_s20 + $0x23] sm:$0xff]  ;;  %v2008_v18 = vld [vmem:[%s11152_s20 + $0x2b] sm:$0xff] }
  0x78   : > { %9508 = vmatprep.subr.bf16.mxu0 %v10943_v23 }
  0x7b   : > { %9509 = vmatpush3.bf16.msra.mxu0 %v10943_v23  ;;  %v1207_v23 = vld [vmem:[%s11152_s20 + $0x52] sm:$0xff] }
  0x7c   : > { %9510 = vmatprep.subr.bf16.mxu0 %v10944_v29  ;;  %v11330_v28 = vpack.c.bf16 %v1208_v24, %v1207_v23  ;;  %v10965_v23 = vld [vmem:[%s12456_s3 + $0x148] sm:$0xff]  }
  0x7d   : > { %v2011_v24 = vld [vmem:[%s11152_s20 + $0x43] sm:$0xff] }
  0x7e   : > { %9475 = vmatmul.mubr.bf16.gmra.mrb[8].mxu0 %v834_v30  ;;  %v10953_v30 = vld [vmem:[%s12456_s3 + $0xe8] sm:$0xff]  }
  0x7f   : > { %9478 = vmatprep.mubr.bf16.mxu0 %v835_v32  ;;  %9511 = vmatpush3.bf16.msra.mxu0 %v10944_v29  ;;  %v11332_v29 = vpack.c.bf16 %v1210_v26, %v1209_v25  ;;  %v1212_v32 = vld [vmem:[%s11152_s20 + $0x7a] sm:$0xff]  ;;  %v2012_v25 = vld [vmem:[%s11152_s20 + $0x4b] sm:$0xff] }
  0x80   : > { %9512 = vmatprep.subr.bf16.mxu0 %v10945_v31  ;;  %v2013_v26 = vld [vmem:[%s11152_s20 + $0x53] sm:$0xff] }
  0x83   : > { %9513 = vmatpush3.bf16.msra.mxu0 %v10945_v31  ;;  %v1211_v31 = vld [vmem:[%s11152_s20 + $0x72] sm:$0xff] }
  0x84   : > { %9514 = vmatprep.subr.bf16.mxu0 %v10946_v37  ;;  %v11346_v36 = vpack.c.bf16 %v1212_v32, %v1211_v31  ;;  %v10967_v31 = vld [vmem:[%s12456_s3 + $0x158] sm:$0xff]   ;;  %v2015_v32 = vld [vmem:[%s11152_s20 + $0x63] sm:$0xff] }
  0x86   : > { %9479 = vmatmul.mubr.bf16.gmra.mrb[12].mxu0 %v836_v38  ;;  %v10955_v38 = vld [vmem:[%s12456_s3 + $0xf8] sm:$0xff]  }
  0x87   : > { %9482 = vmatprep.mubr.bf16.mxu0 %v837_v40  ;;  %9515 = vmatpush3.bf16.msra.mxu0 %v10946_v37  ;;  %v11348_v37 = vpack.c.bf16 %v1214_v34, %v1213_v33  ;;  %v1216_v40 = vld [vmem:[%s11152_s20 + $0x9a] sm:$0xff]  ;;  %v2016_v33 = vld [vmem:[%s11152_s20 + $0x6b] sm:$0xff] }
  0x88   : > { %9516 = vmatprep.subr.bf16.mxu0 %v10947_v39  ;;  %v2017_v34 = vld [vmem:[%s11152_s20 + $0x73] sm:$0xff] }
  0x8b   : > { %9517 = vmatpush3.bf16.msra.mxu0 %v10947_v39  ;;  %v1215_v39 = vld [vmem:[%s11152_s20 + $0x92] sm:$0xff] }
  0x8c   : > { %9554 = vmatprep.subr.bf16.mxu0 %v10948_v45  ;;  %v1242_v44 = vpack.c.bf16 %v1216_v40, %v1215_v39  ;;  %v10969_v39 = vld [vmem:[%s12456_s3 + $0x168] sm:$0xff]  }
  0x8d   : > { %v2019_v40 = vld [vmem:[%s11152_s20 + $0x83] sm:$0xff] }
  0x8e   : > { %9483 = vmatmul.mubr.bf16.gmra.mrb[16].mxu0 %v838_v46  ;;  %v1219_v46 = vld [vmem:[%s11152_s20 + $0xb2] sm:$0xff] }
  0x8f   : > { %9486 = vmatprep.mubr.bf16.mxu0 %v839_v47  ;;  %v1220_v47 = vld [vmem:[%s11152_s20 + $0xba] sm:$0xff] }
  0x90   : > { %v1244_v50 = vpack.c.bf16 %v1220_v47, %v1219_v46  ;;  %v10971_v47 = vld [vmem:[%s12456_s3 + $0x178] sm:$0xff]  }
  0x96   : > { %9487 = vmatmul.mubr.bf16.gmra.mrb[20].mxu0 %v840_v52  ;;  %v1223_v52 = vld [vmem:[%s11152_s20 + $0xd2] sm:$0xff] }
  0x97   : > { %9490 = vmatprep.mubr.bf16.mxu0 %v841_v53  ;;  %v1224_v53 = vld [vmem:[%s11152_s20 + $0xda] sm:$0xff] }
  0x98   : > { %v1246_v56 = vpack.c.bf16 %v1224_v53, %v1223_v52  ;;  %v10972_v52 = vld [vmem:[%s12456_s3 + $0x180] sm:$0xff]   ;;  %v2050_v53 = vpack.c.bf16 %v2024_v49, %v2023_v48  ;;  %v2429_v48 = vld [vmem:[%s11152_s20 + $0xb4] sm:$0xff] }
  0x99   : > { %v2430_v49 = vld [vmem:[%s11152_s20 + $0xbc] sm:$0xff] }
  0x9e   : > { %9491 = vmatmul.mubr.bf16.gmra.mrb[24].mxu0 %v842_v58  ;;  %v1227_v58 = vld [vmem:[%s11152_s20 + $0xf2] sm:$0xff] }
  0x9f   : > { %9494 = vmatprep.mubr.bf16.mxu0 %v843_v59  ;;  %v1228_v59 = vld [vmem:[%s11152_s20 + $0xfa] sm:$0xff] }
  0xa0   : > { %v1248_v62 = vpack.c.bf16 %v1228_v59, %v1227_v58  ;;  %v2030_v58 = vld [vmem:[%s11152_s20 + $0xdb] sm:$0xff] }
  0xa6   : > { %9495 = vmatmul.mubr.bf16.gmra.mrb[28].mxu0 %v844_v0  ;;  %v1231_v0 = vld [vmem:[%s11152_s20 + $0x112] sm:$0xff] }
  0xa7   : > { %9498 = vmatprep.mubr.bf16.mxu0 %v845_v1  ;;  %v1232_v1 = vld [vmem:[%s11152_s20 + $0x11a] sm:$0xff] }
  0xa8   : > { %v1250_v2 = vpack.c.bf16 %v1232_v1, %v1231_v0  ;;  %v2034_v0 = vld [vmem:[%s11152_s20 + $0xfb] sm:$0xff] }
  0xae   : > { %9499 = vmatmul.mubr.bf16.gmra.mrb[32].mxu0 %v846_v6  ;;  %v10960_v6 = vld [vmem:[%s12456_s3 + $0x120] sm:$0xff]  }
  0xaf   : > { %9518 = vmatprep.mubr.bf16.mxu0 %v1233_v7  ;;  %v10961_v7 = vld [vmem:[%s12456_s3 + $0x128] sm:$0xff]  }
  0xb6   : > { %9519 = vmatmul.mubr.bf16.vlgmr.msra.gmra.mrb[0].mxu0 %v11298_v12 }
  0xb7   : > { %9555 = vmatpush3.bf16.msra.mxu0 %v10948_v45  ;;  %9522 = vmatprep.mubr.bf16.mxu0 %v11300_v13  ;;  %v11362_v45 = vpack.c.bf16 %v1218_v42, %v1217_v41  ;;  %v2020_v41 = vld [vmem:[%s11152_s20 + $0x8b] sm:$0xff]  ;;  %v2021_v42 = vld [vmem:[%s11152_s20 + $0x93] sm:$0xff] }
  0xb8   : > { %9556 = vmatprep.subr.bf16.mxu0 %v10949_v14 }
  0xbb   : > { %9557 = vmatpush3.bf16.msra.mxu0 %v10949_v14  ;;  %v2006_v14 = vld [vmem:[%s11152_s20 + $0x1b] sm:$0xff] }
  0xbc   : > { %9558 = vmatprep.subr.bf16.mxu0 %v10950_v19 }
  0xbe   : > { %9523 = vmatmul.mubr.bf16.gmra.mrb[4].mxu0 %v11314_v20 }
  0xbf   : > { %9526 = vmatprep.mubr.bf16.mxu0 %v11316_v21  ;;  %9559 = vmatpush3.bf16.msra.mxu0 %v10950_v19  ;;  %v2009_v19 = vld [vmem:[%s11152_s20 + $0x33] sm:$0xff] }
  0xc0   : > { %9560 = vmatprep.subr.bf16.mxu0 %v10951_v22 }
  0xc3   : > { %9561 = vmatpush3.bf16.msra.mxu0 %v10951_v22 }
  0xc4   : > { %9562 = vmatprep.subr.bf16.mxu0 %v10952_v27 }
  0xc6   : > { %9527 = vmatmul.mubr.bf16.gmra.mrb[8].mxu0 %v11330_v28 }
  0xc7   : > { %9530 = vmatprep.mubr.bf16.mxu0 %v11332_v29  ;;  %9563 = vmatpush3.bf16.msra.mxu0 %v10952_v27  ;;  %v2014_v27 = vld [vmem:[%s11152_s20 + $0x5b] sm:$0xff] }
  0xc8   : > { %9564 = vmatprep.subr.bf16.mxu0 %v10953_v30 }
  0xcb   : > { %9565 = vmatpush3.bf16.msra.mxu0 %v10953_v30  ;;  %v2045_v30 = vpack.c.bf16 %v2014_v27, %v2013_v26  ;;  %v10974_v26 = vld [vmem:[%s12456_s3 + $0x190] sm:$0xff]  }
  0xcc   : > { %9566 = vmatprep.subr.bf16.mxu0 %v10954_v35 }
  0xce   : > { %9531 = vmatmul.mubr.bf16.gmra.mrb[12].mxu0 %v11346_v36 }
  0xcf   : > { %9534 = vmatprep.mubr.bf16.mxu0 %v11348_v37  ;;  %9567 = vmatpush3.bf16.msra.mxu0 %v10954_v35  ;;  %v2018_v35 = vld [vmem:[%s11152_s20 + $0x7b] sm:$0xff] }
  0xd0   : > { %9568 = vmatprep.subr.bf16.mxu0 %v10955_v38 }
  0xd3   : > { %9569 = vmatpush3.bf16.msra.mxu0 %v10955_v38  ;;  %v2047_v38 = vpack.c.bf16 %v2018_v35, %v2017_v34  ;;  %v10976_v34 = vld [vmem:[%s12456_s3 + $0x1a0] sm:$0xff]  }
  0xd4   : > { %9606 = vmatprep.subr.bf16.mxu0 %v10956_v43 }
  0xd6   : > { %9535 = vmatmul.mubr.bf16.gmra.mrb[16].mxu0 %v1242_v44 }
  0xd7   : > { %9538 = vmatprep.mubr.bf16.mxu0 %v11362_v45 }
  0xde   : > { %9539 = vmatmul.mubr.bf16.gmra.mrb[20].mxu0 %v1244_v50 }
  0xdf   : > { %9542 = vmatprep.mubr.bf16.mxu0 %v1245_v51 }
  0xe6   : > { %9543 = vmatmul.mubr.bf16.gmra.mrb[24].mxu0 %v1246_v56 }
  0xe7   : > { %9546 = vmatprep.mubr.bf16.mxu0 %v1247_v57 }
  0xee   : > { %9547 = vmatmul.mubr.bf16.gmra.mrb[28].mxu0 %v1248_v62 }
  0xef   : > { %9550 = vmatprep.mubr.bf16.mxu0 %v1249_v63 }
  0xf6   : > { %9551 = vmatmul.mubr.bf16.gmra.mrb[32].mxu0 %v1250_v2 }
  0xf7   : > { %9570 = vmatprep.mubr.bf16.mxu0 %v11298_v12  ;;  %v1636_v12 = vld [vmem:[%s11152_s20 + $0x12a] sm:$0xff] }
  0xf8   : > { %v1654_v15 = vpack.c.bf16 %v1636_v12, %v1635_v11  ;;  %v2409_v11 = vld [vmem:[%s11152_s20 + $0x14] sm:$0xff]  ;;  %v2410_v12 = vld [vmem:[%s11152_s20 + $0x1c] sm:$0xff] }
  0xfe   : > { %9571 = vmatmul.mubr.bf16.vlgmr.msra.gmra.mrb[0].mxu0 %v11300_v13  ;;  %v2005_v13 = vld [vmem:[%s11152_s20 + $0x13] sm:$0xff] }
  0xff   : > { %9607 = vmatpush3.bf16.msra.mxu0 %v10956_v43  ;;  %9574 = vmatprep.mubr.bf16.mxu0 %v11314_v20  ;;  %v2041_v16 = vpack.c.bf16 %v2006_v14, %v2005_v13  ;;  %v2010_v20 = vld [vmem:[%s11152_s20 + $0x3b] sm:$0xff]  ;;  %v2445_v14 = vpack.c.bf16 %v2410_v12, %v2409_v11  ;;  %v10982_v11 = vld [vmem:[%s12456_s3 + $0x1d0] sm:$0xff]  }
 0x100   : > { %9608 = vmatprep.subr.bf16.mxu0 %v10957_v3  ;;  %v2043_v22 = vpack.c.bf16 %v2010_v20, %v2009_v19  ;;  %v2022_v43 = vld [vmem:[%s11152_s20 + $0x9b] sm:$0xff] }
 0x101   : > { %v2049_v46 = vpack.c.bf16 %v2022_v43, %v2021_v42  ;;  %v10978_v42 = vld [vmem:[%s12456_s3 + $0x1b0] sm:$0xff]   ;;  %v10983_v12 = vld [vmem:[%s12456_s3 + $0x1d8] sm:$0xff]  }
 0x103   : > { %9609 = vmatpush3.bf16.msra.mxu0 %v10957_v3  ;;  %v2035_v3 = vld [vmem:[%s11152_s20 + $0x103] sm:$0xff] }
 0x104   : > { %9610 = vmatprep.subr.bf16.mxu0 %v10958_v4 }
 0x106   : > { %9575 = vmatmul.mubr.bf16.gmra.mrb[4].mxu0 %v11316_v21  ;;  %v2042_v21 = vpack.c.bf16 %v2008_v18, %v2007_v17  ;;  %v2413_v17 = vld [vmem:[%s11152_s20 + $0x34] sm:$0xff]  ;;  %v2414_v18 = vld [vmem:[%s11152_s20 + $0x3c] sm:$0xff] }
 0x107   : > { %9578 = vmatprep.mubr.bf16.mxu0 %v11330_v28  ;;  %9611 = vmatpush3.bf16.msra.mxu0 %v10958_v4  ;;  %v10966_v28 = vld [vmem:[%s12456_s3 + $0x150] sm:$0xff]   ;;  %v11482_v20 = vpack.c.bf16 %v2414_v18, %v2413_v17  ;;  %v11602_v17 = vld [vmem:[%s12456_s3 + $0x200] sm:$0xff]  }
 0x108   : > { %9612 = vmatprep.subr.bf16.mxu0 %v10959_v5  ;;  %v2036_v4 = vld [vmem:[%s11152_s20 + $0x10b] sm:$0xff]  ;;  %v4224_v18 = vld [vmem:[%s12455_s2] sm:$0xff] }
 0x10b   : > { %9613 = vmatpush3.bf16.msra.mxu0 %v10959_v5  ;;  %v2037_v5 = vld [vmem:[%s11152_s20 + $0x113] sm:$0xff] }
 0x10c   : > { %9614 = vmatprep.subr.bf16.mxu0 %v10960_v6 }
 0x10e   : > { %9579 = vmatmul.mubr.bf16.gmra.mrb[8].mxu0 %v11332_v29  ;;  %v2044_v29 = vpack.c.bf16 %v2012_v25, %v2011_v24  ;;  %v2417_v24 = vld [vmem:[%s11152_s20 + $0x54] sm:$0xff]  ;;  %v2418_v25 = vld [vmem:[%s11152_s20 + $0x5c] sm:$0xff] }
 0x10f   : > { %9582 = vmatprep.mubr.bf16.mxu0 %v11346_v36  ;;  %9615 = vmatpush3.bf16.msra.mxu0 %v10960_v6  ;;  %v10968_v36 = vld [vmem:[%s12456_s3 + $0x160] sm:$0xff]  }
 0x110   : > { %9616 = vmatprep.subr.bf16.mxu0 %v10961_v7  ;;  %v2038_v6 = vld [vmem:[%s11152_s20 + $0x11b] sm:$0xff] }
 0x113   : > { %9617 = vmatpush3.bf16.msra.mxu0 %v10961_v7  ;;  %v2056_v7 = vpack.c.bf16 %v2036_v4, %v2035_v3  ;;  %v2441_v3 = vld [vmem:[%s11152_s20 + $0x114] sm:$0xff]  ;;  %v2442_v4 = vld [vmem:[%s11152_s20 + $0x11c] sm:$0xff] }
 0x114   : > { %9618 = vmatprep.subr.bf16.mxu0 %v10962_v8 }
 0x116   : > { %9583 = vmatmul.mubr.bf16.gmra.mrb[12].mxu0 %v11348_v37  ;;  %v2046_v37 = vpack.c.bf16 %v2016_v33, %v2015_v32  ;;  %v2421_v32 = vld [vmem:[%s11152_s20 + $0x74] sm:$0xff]  ;;  %v2422_v33 = vld [vmem:[%s11152_s20 + $0x7c] sm:$0xff] }
 0x117   : > { %9586 = vmatprep.mubr.bf16.mxu0 %v1242_v44  ;;  %9619 = vmatpush3.bf16.msra.mxu0 %v10962_v8  ;;  %v10970_v44 = vld [vmem:[%s12456_s3 + $0x170] sm:$0xff]   ;;  %v2057_v8 = vpack.c.bf16 %v2038_v6, %v2037_v5  ;;  %v11562_v6 = vpack.c.bf16 %v2442_v4, %v2441_v3  ;;  %v10992_v3 = vld [vmem:[%s12456_s3 + $0x220] sm:$0xff]   ;;  %v4247_v4 = vld [vmem:[%s12455_s2 + $0xb8] sm:$0xff] }
 0x118   : > { %9620 = vmatprep.subr.bf16.mxu0 %v10963_v9 }
 0x11b   : > { %9621 = vmatpush3.bf16.msra.mxu0 %v10963_v9  ;;  %v2039_v9 = vld [vmem:[%s11152_s20 + $0x123] sm:$0xff] }
 0x11c   : > { %9658 = vmatprep.subr.bf16.mxu0 %v10964_v10 }
 0x11e   : > { %9587 = vmatmul.mubr.bf16.gmra.mrb[16].mxu0 %v11362_v45  ;;  %v2048_v45 = vpack.c.bf16 %v2020_v41, %v2019_v40  ;;  %v2425_v40 = vld [vmem:[%s11152_s20 + $0x94] sm:$0xff]  ;;  %v2426_v41 = vld [vmem:[%s11152_s20 + $0x9c] sm:$0xff] }
 0x11f   : > { %9590 = vmatprep.mubr.bf16.mxu0 %v1244_v50  ;;  %v2025_v50 = vld [vmem:[%s11152_s20 + $0xb3] sm:$0xff] }
 0x126   : > { %9591 = vmatmul.mubr.bf16.gmra.mrb[20].mxu0 %v1245_v51  ;;  %v2026_v51 = vld [vmem:[%s11152_s20 + $0xbb] sm:$0xff] }
 0x127   : > { %9594 = vmatprep.mubr.bf16.mxu0 %v1246_v56  ;;  %v2051_v54 = vpack.c.bf16 %v2026_v51, %v2025_v50  ;;  %v2028_v56 = vld [vmem:[%s11152_s20 + $0xcb] sm:$0xff]  ;;  %v10980_v50 = vld [vmem:[%s12456_s3 + $0x1c0] sm:$0xff]  }
 0x128   : > { %v2052_v59 = vpack.c.bf16 %v2028_v56, %v2027_v55  ;;  %v2433_v55 = vld [vmem:[%s11152_s20 + $0xd4] sm:$0xff]  ;;  %v2434_v56 = vld [vmem:[%s11152_s20 + $0xdc] sm:$0xff] }
 0x12e   : > { %9595 = vmatmul.mubr.bf16.gmra.mrb[24].mxu0 %v1247_v57  ;;  %v2029_v57 = vld [vmem:[%s11152_s20 + $0xd3] sm:$0xff] }
 0x12f   : > { %9598 = vmatprep.mubr.bf16.mxu0 %v1248_v62  ;;  %v2053_v60 = vpack.c.bf16 %v2030_v58, %v2029_v57  ;;  %v2032_v62 = vld [vmem:[%s11152_s20 + $0xeb] sm:$0xff]  ;;  %v2457_v58 = vpack.c.bf16 %v2434_v56, %v2433_v55  ;;  %v4243_v56 = vld [vmem:[%s12455_s2 + $0x98] sm:$0xff] }
 0x130   : > { %v2054_v1 = vpack.c.bf16 %v2032_v62, %v2031_v61  ;;  %v2437_v61 = vld [vmem:[%s11152_s20 + $0xf4] sm:$0xff]  ;;  %v2438_v62 = vld [vmem:[%s11152_s20 + $0xfc] sm:$0xff] }
 0x131   : > { %v10990_v55 = vld [vmem:[%s12456_s3 + $0x210] sm:$0xff]  }
 0x136   : > { %9599 = vmatmul.mubr.bf16.gmra.mrb[28].mxu0 %v1249_v63  ;;  %v2033_v63 = vld [vmem:[%s11152_s20 + $0xf3] sm:$0xff] }
 0x137   : > { %9602 = vmatprep.mubr.bf16.mxu0 %v1250_v2  ;;  %v2055_v2 = vpack.c.bf16 %v2034_v0, %v2033_v63  ;;  %v11555_v0 = vpack.c.bf16 %v2438_v62, %v2437_v61  ;;  %v4245_v61 = vld [vmem:[%s12455_s2 + $0xa8] sm:$0xff]  ;;  %v4246_v62 = vld [vmem:[%s12455_s2 + $0xb0] sm:$0xff] }
 0x13e   : > { %9603 = vmatmul.mubr.bf16.gmra.mrb[32].mxu0 %v1654_v15  ;;  %v2411_v15 = vld [vmem:[%s11152_s20 + $0x24] sm:$0xff] }
 0x13f   : > { %9622 = vmatprep.mubr.bf16.mxu0 %v2041_v16  ;;  %v2412_v16 = vld [vmem:[%s11152_s20 + $0x2c] sm:$0xff] }
 0x140   : > { %v11480_v19 = vpack.c.bf16 %v2412_v16, %v2411_v15  ;;  %v10986_v15 = vld [vmem:[%s12456_s3 + $0x1f0] sm:$0xff]   ;;  %v10987_v16 = vld [vmem:[%s12456_s3 + $0x1f8] sm:$0xff]  }
 0x146   : > { %9623 = vmatmul.mubr.bf16.vlgmr.msra.gmra.mrb[0].mxu0 %v2042_v21  ;;  %v10973_v21 = vld [vmem:[%s12456_s3 + $0x188] sm:$0xff]  }
 0x147   : > { %9659 = vmatpush3.bf16.msra.mxu0 %v10964_v10  ;;  %9626 = vmatprep.mubr.bf16.mxu0 %v2043_v22  ;;  %v2040_v10 = vld [vmem:[%s11152_s20 + $0x12b] sm:$0xff] }
 0x148   : > { %9660 = vmatprep.subr.bf16.mxu0 %v10965_v23  ;;  %v2058_v13 = vpack.c.bf16 %v2040_v10, %v2039_v9  ;;  %v2415_v22 = vld [vmem:[%s11152_s20 + $0x44] sm:$0xff] }
 0x149   : > { %v10981_v10 = vld [vmem:[%s12456_s3 + $0x1c8] sm:$0xff]  }
 0x14b   : > { %9661 = vmatpush3.bf16.msra.mxu0 %v10965_v23  ;;  %v2416_v23 = vld [vmem:[%s11152_s20 + $0x4c] sm:$0xff] }
 0x14c   : > { %9662 = vmatprep.subr.bf16.mxu0 %v10966_v28  ;;  %v11496_v27 = vpack.c.bf16 %v2416_v23, %v2415_v22  ;;  %v4227_v22 = vld [vmem:[%s12455_s2 + $0x18] sm:$0xff]  ;;  %v4228_v23 = vld [vmem:[%s12455_s2 + $0x20] sm:$0xff] }
 0x14e   : > { %9627 = vmatmul.mubr.bf16.gmra.mrb[4].mxu0 %v2044_v29  ;;  %v10975_v29 = vld [vmem:[%s12456_s3 + $0x198] sm:$0xff]  }
 0x14f   : > { %9630 = vmatprep.mubr.bf16.mxu0 %v2045_v30  ;;  %9663 = vmatpush3.bf16.msra.mxu0 %v10966_v28  ;;  %v11498_v28 = vpack.c.bf16 %v2418_v25, %v2417_v24  ;;  %v2419_v30 = vld [vmem:[%s11152_s20 + $0x64] sm:$0xff]  ;;  %v4230_v25 = vld [vmem:[%s12455_s2 + $0x30] sm:$0xff] }
 0x150   : > { %9664 = vmatprep.subr.bf16.mxu0 %v10967_v31  ;;  %v4229_v24 = vld [vmem:[%s12455_s2 + $0x28] sm:$0xff] }
 0x153   : > { %9665 = vmatpush3.bf16.msra.mxu0 %v10967_v31  ;;  %v2420_v31 = vld [vmem:[%s11152_s20 + $0x6c] sm:$0xff] }
 0x154   : > { %9666 = vmatprep.subr.bf16.mxu0 %v10968_v36  ;;  %v11512_v35 = vpack.c.bf16 %v2420_v31, %v2419_v30  ;;  %v2847_v30 = vld [vmem:[%s11152_s20 + $0x134] sm:$0xff]  ;;  %v2848_v31 = vld [vmem:[%s11152_s20 + $0x13c] sm:$0xff] }
 0x156   : > { %9631 = vmatmul.mubr.bf16.gmra.mrb[8].mxu0 %v2046_v37  ;;  %v10977_v37 = vld [vmem:[%s12456_s3 + $0x1a8] sm:$0xff]  }
 0x157   : > { %9634 = vmatprep.mubr.bf16.mxu0 %v2047_v38  ;;  %9667 = vmatpush3.bf16.msra.mxu0 %v10968_v36  ;;  %v11514_v36 = vpack.c.bf16 %v2422_v33, %v2421_v32  ;;  %v2423_v38 = vld [vmem:[%s11152_s20 + $0x84] sm:$0xff]  ;;  %v3218_v33 = vld [vmem:[%s11152_s20 + $0x2d] sm:$0xff] }
 0x158   : > { %9668 = vmatprep.subr.bf16.mxu0 %v10969_v39  ;;  %v3217_v32 = vld [vmem:[%s11152_s20 + $0x25] sm:$0xff] }
 0x15b   : > { %9669 = vmatpush3.bf16.msra.mxu0 %v10969_v39  ;;  %v2424_v39 = vld [vmem:[%s11152_s20 + $0x8c] sm:$0xff] }
 0x15c   : > { %9670 = vmatprep.subr.bf16.mxu0 %v10970_v44  ;;  %v11528_v43 = vpack.c.bf16 %v2424_v39, %v2423_v38  ;;  %v4237_v38 = vld [vmem:[%s12455_s2 + $0x68] sm:$0xff]  ;;  %v4238_v39 = vld [vmem:[%s12455_s2 + $0x70] sm:$0xff] }
 0x15e   : > { %9635 = vmatmul.mubr.bf16.gmra.mrb[12].mxu0 %v2048_v45  ;;  %v10979_v45 = vld [vmem:[%s12456_s3 + $0x1b8] sm:$0xff]  }
 0x15f   : > { %9638 = vmatprep.mubr.bf16.mxu0 %v2049_v46  ;;  %9671 = vmatpush3.bf16.msra.mxu0 %v10970_v44  ;;  %v11530_v44 = vpack.c.bf16 %v2426_v41, %v2425_v40  ;;  %v2427_v46 = vld [vmem:[%s11152_s20 + $0xa4] sm:$0xff]  ;;  %v3219_v40 = vld [vmem:[%s11152_s20 + $0x35] sm:$0xff] }
 0x160   : > { %9672 = vmatprep.subr.bf16.mxu0 %v10971_v47  ;;  %v3220_v41 = vld [vmem:[%s11152_s20 + $0x3d] sm:$0xff] }
 0x163   : > { %9673 = vmatpush3.bf16.msra.mxu0 %v10971_v47  ;;  %v2428_v47 = vld [vmem:[%s11152_s20 + $0xac] sm:$0xff] }
 0x164   : > { %9710 = vmatprep.subr.bf16.mxu0 %v10972_v52  ;;  %v2454_v51 = vpack.c.bf16 %v2428_v47, %v2427_v46  ;;  %v3254_v46 = vpack.c.bf16 %v3220_v41, %v3219_v40  ;;  %v4259_v40 = vld [vmem:[%s12455_s2 + $0x118] sm:$0xff] }
 0x166   : > { %9639 = vmatmul.mubr.bf16.gmra.mrb[16].mxu0 %v2050_v53  ;;  %v2431_v53 = vld [vmem:[%s11152_s20 + $0xc4] sm:$0xff] }
 0x167   : > { %9642 = vmatprep.mubr.bf16.mxu0 %v2051_v54  ;;  %v2432_v54 = vld [vmem:[%s11152_s20 + $0xcc] sm:$0xff] }
 0x168   : > { %v2456_v57 = vpack.c.bf16 %v2432_v54, %v2431_v53  ;;  %v3225_v53 = vld [vmem:[%s11152_s20 + $0x65] sm:$0xff]  ;;  %v3226_v54 = vld [vmem:[%s11152_s20 + $0x6d] sm:$0xff] }
 0x16e   : > { %9643 = vmatmul.mubr.bf16.gmra.mrb[20].mxu0 %v2052_v59  ;;  %v2435_v59 = vld [vmem:[%s11152_s20 + $0xe4] sm:$0xff] }
 0x16f   : > { %9646 = vmatprep.mubr.bf16.mxu0 %v2053_v60  ;;  %v2436_v60 = vld [vmem:[%s11152_s20 + $0xec] sm:$0xff] }
 0x170   : > { %v2458_v63 = vpack.c.bf16 %v2436_v60, %v2435_v59  ;;  %v3257_v59 = vpack.c.bf16 %v3226_v54, %v3225_v53  ;;  %v10991_v60 = vld [vmem:[%s12456_s3 + $0x218] sm:$0xff]  }
 0x176   : > { %9647 = vmatmul.mubr.bf16.gmra.mrb[24].mxu0 %v2054_v1  ;;  %v2439_v1 = vld [vmem:[%s11152_s20 + $0x104] sm:$0xff] }
 0x177   : > { %9650 = vmatprep.mubr.bf16.mxu0 %v2055_v2  ;;  %v2440_v2 = vld [vmem:[%s11152_s20 + $0x10c] sm:$0xff] }
 0x178   : > { %v2460_v5 = vpack.c.bf16 %v2440_v2, %v2439_v1  ;;  %v3229_v1 = vld [vmem:[%s11152_s20 + $0x85] sm:$0xff]  ;;  %v3230_v2 = vld [vmem:[%s11152_s20 + $0x8d] sm:$0xff] }
 0x17e   : > { %9651 = vmatmul.mubr.bf16.gmra.mrb[28].mxu0 %v2056_v7  ;;  %v2443_v7 = vld [vmem:[%s11152_s20 + $0x124] sm:$0xff] }
 0x17f   : > { %9654 = vmatprep.mubr.bf16.mxu0 %v2057_v8  ;;  %v2444_v8 = vld [vmem:[%s11152_s20 + $0x12c] sm:$0xff] }
 0x180   : > { %v11567_v9 = vpack.c.bf16 %v2444_v8, %v2443_v7  ;;  %v3259_v7 = vpack.c.bf16 %v3230_v2, %v3229_v1  ;;  %v10993_v8 = vld [vmem:[%s12456_s3 + $0x228] sm:$0xff]  }
 0x186   : > { %9655 = vmatmul.mubr.bf16.gmra.mrb[32].mxu0 %v2058_v13  ;;  %v10984_v13 = vld [vmem:[%s12456_s3 + $0x1e0] sm:$0xff]  }
 0x187   : > { %9674 = vmatprep.mubr.bf16.mxu0 %v2445_v14  ;;  %v10985_v14 = vld [vmem:[%s12456_s3 + $0x1e8] sm:$0xff]  }
 0x18e   : > { %9675 = vmatmul.mubr.bf16.vlgmr.msra.gmra.mrb[0].mxu0 %v11480_v19 }
 0x18f   : > { %9711 = vmatpush3.bf16.msra.mxu0 %v10972_v52  ;;  %9678 = vmatprep.mubr.bf16.mxu0 %v11482_v20  ;;  %v11544_v52 = vpack.c.bf16 %v2430_v49, %v2429_v48  ;;  %v10989_v48 = vld [vmem:[%s12456_s3 + $0x208] sm:$0xff]  }
 0x190   : > { %9712 = vmatprep.subr.bf16.mxu0 %v10973_v21  ;;  %v4241_v49 = vld [vmem:[%s12455_s2 + $0x88] sm:$0xff] }
 0x193   : > { %9713 = vmatpush3.bf16.msra.mxu0 %v10973_v21  ;;  %v4225_v21 = vld [vmem:[%s12455_s2 + $0x8] sm:$0xff] }
 0x194   : > { %9714 = vmatprep.subr.bf16.mxu0 %v10974_v26 }
 0x196   : > { %9679 = vmatmul.mubr.bf16.gmra.mrb[4].mxu0 %v11496_v27 }
 0x197   : > { %9682 = vmatprep.mubr.bf16.mxu0 %v11498_v28  ;;  %9715 = vmatpush3.bf16.msra.mxu0 %v10974_v26  ;;  %v4231_v26 = vld [vmem:[%s12455_s2 + $0x38] sm:$0xff] }
 0x198   : > { %9716 = vmatprep.subr.bf16.mxu0 %v10975_v29 }
 0x19b   : > { %9717 = vmatpush3.bf16.msra.mxu0 %v10975_v29  ;;  %v4234_v29 = vld [vmem:[%s12455_s2 + $0x50] sm:$0xff] }
 0x19c   : > { %9718 = vmatprep.subr.bf16.mxu0 %v10976_v34 }
 0x19e   : > { %9683 = vmatmul.mubr.bf16.gmra.mrb[8].mxu0 %v11512_v35 }
 0x19f   : > { %9686 = vmatprep.mubr.bf16.mxu0 %v11514_v36  ;;  %9719 = vmatpush3.bf16.msra.mxu0 %v10976_v34  ;;  %v4235_v34 = vld [vmem:[%s12455_s2 + $0x58] sm:$0xff] }
 0x1a0   : > { %9720 = vmatprep.subr.bf16.mxu0 %v10977_v37 }
 0x1a3   : > { %9721 = vmatpush3.bf16.msra.mxu0 %v10977_v37  ;;  %v3253_v37 = vpack.c.bf16 %v3218_v33, %v3217_v32  ;;  %v4256_v32 = vld [vmem:[%s12455_s2 + $0x100] sm:$0xff] }
 0x1a4   : > { %9722 = vmatprep.subr.bf16.mxu0 %v10978_v42 }
 0x1a6   : > { %9687 = vmatmul.mubr.bf16.gmra.mrb[12].mxu0 %v11528_v43 }
 0x1a7   : > { %9690 = vmatprep.mubr.bf16.mxu0 %v11530_v44  ;;  %9723 = vmatpush3.bf16.msra.mxu0 %v10978_v42  ;;  %v3221_v42 = vld [vmem:[%s11152_s20 + $0x45] sm:$0xff] }
 0x1a8   : > { %9724 = vmatprep.subr.bf16.mxu0 %v10979_v45 }
 0x1ab   : > { %9725 = vmatpush3.bf16.msra.mxu0 %v10979_v45  ;;  %v4240_v45 = vld [vmem:[%s12455_s2 + $0x80] sm:$0xff] }
 0x1ac   : > { %9762 = vmatprep.subr.bf16.mxu0 %v10980_v50 }
 0x1ae   : > { %9691 = vmatmul.mubr.bf16.gmra.mrb[16].mxu0 %v2454_v51 }
 0x1af   : > { %9694 = vmatprep.mubr.bf16.mxu0 %v11544_v52 }
 0x1b6   : > { %9695 = vmatmul.mubr.bf16.gmra.mrb[20].mxu0 %v2456_v57 }
 0x1b7   : > { %9698 = vmatprep.mubr.bf16.mxu0 %v2457_v58 }
 0x1be   : > { %9699 = vmatmul.mubr.bf16.gmra.mrb[24].mxu0 %v2458_v63 }
 0x1bf   : > { %9702 = vmatprep.mubr.bf16.mxu0 %v11555_v0 }
 0x1c6   : > { %9703 = vmatmul.mubr.bf16.gmra.mrb[28].mxu0 %v2460_v5 }
 0x1c7   : > { %9706 = vmatprep.mubr.bf16.mxu0 %v11562_v6 }
 0x1ce   : > { %9707 = vmatmul.mubr.bf16.gmra.mrb[32].mxu0 %v11567_v9 }
 0x1cf   : > { %9726 = vmatprep.mubr.bf16.mxu0 %v11480_v19  ;;  %v11076_v19 = vmov 0  }
 0x1d0   : > { %10922 = vset.pattern.permute.xlu0 %v11076_v19  ;;  %10923 = vset.pattern.permute.xlu1 %v11076_v19 }
 0x1d1   : > { %4262 = vperm.xlu0 %10922, %v4224_v18   ;;  %v4251_v18 = vld [vmem:[%s12455_s2 + $0xd8] sm:$0xff] }
 0x1d5   : > { %4267 = vperm.xlu0 %10922, %v4225_v21  }
 0x1d6   : > { %9727 = vmatmul.mubr.bf16.vlgmr.msra.gmra.mrb[0].mxu0 %v11482_v20  ;;  %v4226_v20 = vld [vmem:[%s12455_s2 + $0x10] sm:$0xff] }
 0x1d7   : > { %9763 = vmatpush3.bf16.msra.mxu0 %v10980_v50  ;;  %9730 = vmatprep.mubr.bf16.mxu0 %v11496_v27  ;;  %v4232_v27 = vld [vmem:[%s12455_s2 + $0x40] sm:$0xff]  ;;  %v4242_v50 = vld [vmem:[%s12455_s2 + $0x90] sm:$0xff] }
 0x1d8   : > { %9764 = vmatprep.subr.bf16.mxu0 %v10981_v10  ;;  %4272 = vperm.xlu1 %10923, %v4226_v20   ;;  %v4252_v20 = vld [vmem:[%s12455_s2 + $0xe0] sm:$0xff] }
 0x1d9   : > { %4282 = vperm.xlu0 %10922, %v4228_v23   ;;  %v10998_v23 = vld [vmem:[%s12459_s6 + $0x10] sm:$0xff]  }
 0x1db   : > { %9765 = vmatpush3.bf16.msra.mxu0 %v10981_v10  ;;  %v4249_v10 = vld [vmem:[%s12455_s2 + $0xc8] sm:$0xff] }
 0x1dc   : > { %9766 = vmatprep.subr.bf16.mxu0 %v10982_v11  ;;  %4277 = vperm.xlu1 %10923, %v4227_v22   ;;  %v10995_v22 = vld [vmem:[%s12456_s3 + $0x238] sm:$0xff]  }
 0x1dd   : > { %4292 = vperm.xlu0 %10922, %v4230_v25   ;;  %v4254_v25 = vld [vmem:[%s12455_s2 + $0xf0] sm:$0xff] }
 0x1de   : > { %9731 = vmatmul.mubr.bf16.gmra.mrb[4].mxu0 %v11498_v28  ;;  %v4233_v28 = vld [vmem:[%s12455_s2 + $0x48] sm:$0xff] }
 0x1df   : > { %9734 = vmatprep.mubr.bf16.mxu0 %v11512_v35  ;;  %9767 = vmatpush3.bf16.msra.mxu0 %v10982_v11  ;;  %v4236_v35 = vld [vmem:[%s12455_s2 + $0x60] sm:$0xff]  ;;  %v4250_v11 = vld [vmem:[%s12455_s2 + $0xd0] sm:$0xff] }
 0x1e0   : > { %9768 = vmatprep.subr.bf16.mxu0 %v10983_v12  ;;  %4287 = vperm.xlu1 %10923, %v4229_v24   ;;  %v4253_v24 = vld [vmem:[%s12455_s2 + $0xe8] sm:$0xff] }
 0x1e1   : > { %4302 = vperm.xlu0 %10922, %v4232_v27   ;;  %v3236_v27 = vld [vmem:[%s11152_s20 + $0xbd] sm:$0xff] }
 0x1e3   : > { %9769 = vmatpush3.bf16.msra.mxu0 %v10983_v12  ;;  %v3231_v12 = vld [vmem:[%s11152_s20 + $0x95] sm:$0xff] }
 0x1e4   : > { %9770 = vmatprep.subr.bf16.mxu0 %v10984_v13  ;;  %4297 = vperm.xlu1 %10923, %v4231_v26   ;;  %v3235_v26 = vld [vmem:[%s11152_s20 + $0xb5] sm:$0xff] }
 0x1e5   : > { %4312 = vperm.xlu0 %10922, %v4234_v29   ;;  %v3238_v29 = vld [vmem:[%s11152_s20 + $0xcd] sm:$0xff] }
 0x1e6   : > { %9735 = vmatmul.mubr.bf16.gmra.mrb[8].mxu0 %v11514_v36  ;;  %v2866_v36 = vpack.c.bf16 %v2848_v31, %v2847_v30  ;;  %v4255_v30 = vld [vmem:[%s12455_s2 + $0xf8] sm:$0xff]  ;;  %v3262_v31 = vpack.c.bf16 %v3236_v27, %v3235_v26 }
 0x1e7   : > { %9738 = vmatprep.mubr.bf16.mxu0 %v11528_v43  ;;  %9771 = vmatpush3.bf16.msra.mxu0 %v10984_v13  ;;  %v3222_v43 = vld [vmem:[%s11152_s20 + $0x4d] sm:$0xff]  ;;  %v3232_v13 = vld [vmem:[%s11152_s20 + $0x9d] sm:$0xff] }
 0x1e8   : > { %9772 = vmatprep.subr.bf16.mxu0 %v10985_v14  ;;  %4307 = vperm.xlu1 %10923, %v4233_v28   ;;  %v3255_v47 = vpack.c.bf16 %v3222_v43, %v3221_v42  ;;  %v3260_v19 = vpack.c.bf16 %v3232_v13, %v3231_v12  ;;  %v3237_v28 = vld [vmem:[%s11152_s20 + $0xc5] sm:$0xff]  ;;  %v3243_v43 = vld [vmem:[%s11152_s20 + $0xf5] sm:$0xff] }
 0x1e9   : > { %4322 = vperm.xlu0 %10922, %v4236_v35   ;;  %v3263_v33 = vpack.c.bf16 %v3238_v29, %v3237_v28  ;;  %v4258_v35 = vld [vmem:[%s12455_s2 + $0x110] sm:$0xff]  ;;  %v3644_v28 = vld [vmem:[%s11152_s20 + $0xde] sm:$0xff]  ;;  %v3645_v29 = vld [vmem:[%s11152_s20 + $0xe6] sm:$0xff] }
 0x1ea   : > { %v3634_v12 = vld [vmem:[%s11152_s20 + $0x8e] sm:$0xff]  ;;  %v3643_v27 = vld [vmem:[%s11152_s20 + $0xd6] sm:$0xff] }
 0x1eb   : > { %9773 = vmatpush3.bf16.msra.mxu0 %v10985_v14  ;;  %v3233_v14 = vld [vmem:[%s11152_s20 + $0xa5] sm:$0xff] }
 0x1ec   : > { %9774 = vmatprep.subr.bf16.mxu0 %v10986_v15  ;;  %4317 = vperm.xlu1 %10923, %v4235_v34   ;;  %v4257_v34 = vld [vmem:[%s12455_s2 + $0x108] sm:$0xff] }
 0x1ed   : > { %4332 = vperm.xlu0 %10922, %v4238_v39   ;;  %v3242_v39 = vld [vmem:[%s11152_s20 + $0xed] sm:$0xff] }
 0x1ee   : > { %9739 = vmatmul.mubr.bf16.gmra.mrb[12].mxu0 %v11530_v44  ;;  %v4239_v44 = vld [vmem:[%s12455_s2 + $0x78] sm:$0xff] }
 0x1ef   : > { %9742 = vmatprep.mubr.bf16.mxu0 %v2454_v51  ;;  %9775 = vmatpush3.bf16.msra.mxu0 %v10986_v15  ;;  %v3223_v51 = vld [vmem:[%s11152_s20 + $0x55] sm:$0xff]  ;;  %v3234_v15 = vld [vmem:[%s11152_s20 + $0xad] sm:$0xff] }
 0x1f0   : > { %9776 = vmatprep.subr.bf16.mxu0 %v10987_v16  ;;  %4327 = vperm.xlu1 %10923, %v4237_v38   ;;  %v3261_v21 = vpack.c.bf16 %v3234_v15, %v3233_v14  ;;  %v3241_v38 = vld [vmem:[%s11152_s20 + $0xe5] sm:$0xff]  ;;  %v3635_v15 = vld [vmem:[%s11152_s20 + $0x96] sm:$0xff] }
 0x1f1   : > { %4342 = vperm.xlu0 %10922, %v4240_v45   ;;  %v3265_v42 = vpack.c.bf16 %v3242_v39, %v3241_v38  ;;  %v3245_v45 = vld [vmem:[%s11152_s20 + $0x105] sm:$0xff]  ;;  %v3651_v39 = vld [vmem:[%s11152_s20 + $0x116] sm:$0xff] }
 0x1f3   : > { %9777 = vmatpush3.bf16.msra.mxu0 %v10987_v16  ;;  %v10994_v16 = vld [vmem:[%s12456_s3 + $0x230] sm:$0xff]  }
 0x1f4   : > { %9814 = vmatprep.subr.bf16.mxu0 %v11602_v17  ;;  %4337 = vperm.xlu1 %10923, %v4239_v44   ;;  %v3244_v44 = vld [vmem:[%s11152_s20 + $0xfd] sm:$0xff] }
 0x1f5   : > { %4352 = vperm.xlu0 %10922, %v4242_v50   ;;  %v3248_v50 = vld [vmem:[%s11152_s20 + $0x11d] sm:$0xff] }
 0x1f6   : > { %9743 = vmatmul.mubr.bf16.gmra.mrb[16].mxu0 %v11544_v52  ;;  %v3224_v52 = vld [vmem:[%s11152_s20 + $0x5d] sm:$0xff] }
 0x1f7   : > { %9746 = vmatprep.mubr.bf16.mxu0 %v2456_v57  ;;  %v3256_v57 = vpack.c.bf16 %v3224_v52, %v3223_v51  ;;  %v3249_v51 = vld [vmem:[%s11152_s20 + $0x125] sm:$0xff]  ;;  %v3250_v52 = vld [vmem:[%s11152_s20 + $0x12d] sm:$0xff] }
 0x1f8   : > { %4347 = vperm.xlu1 %10923, %v4241_v49   ;;  %v3247_v49 = vld [vmem:[%s11152_s20 + $0x115] sm:$0xff]  ;;  %v3269_v54 = vpack.c.bf16 %v3250_v52, %v3249_v51  ;;  %v11001_v51 = vld [vmem:[%s12459_s6 + $0x28] sm:$0xff]  }
 0x1f9   : > { %v3268_v53 = vpack.c.bf16 %v3248_v50, %v3247_v49  ;;  %v11000_v49 = vld [vmem:[%s12459_s6 + $0x20] sm:$0xff]   ;;  %v11077_v50 = vmov 0.0   ;;  %v11002_v52 = vld [vmem:[%s12459_s6 + $0x30] sm:$0xff]  }
 0x1fa   : > { %4187 = vst [vmem:[#allocation2 + $0x20] sm:$0xff] %v11077_v50  ;;  %4188 = vst [vmem:[#allocation2 + $0x28] sm:$0xff] %v11077_v50 }
 0x1fb   : > { %4183 = vst [vmem:[#allocation2] sm:$0xff] %v11077_v50  ;;  %4184 = vst [vmem:[#allocation2 + $0x8] sm:$0xff] %v11077_v50 }
 0x1fc   : > { %4357 = vperm.xlu1 %10923, %v4243_v56   ;;  %v3252_v56 = vld [vmem:[%s11152_s20 + $0x13d] sm:$0xff]  ;;  %4185 = vst [vmem:[#allocation2 + $0x10] sm:$0xff] %v11077_v50  ;;  %4186 = vst [vmem:[#allocation2 + $0x18] sm:$0xff] %v11077_v50 }
 0x1fd   : > { %4189 = vst [vmem:[#allocation2 + $0x30] sm:$0xff] %v11077_v50  ;;  %4190 = vst [vmem:[#allocation2 + $0x38] sm:$0xff] %v11077_v50 }
 0x1fe   : > { %9747 = vmatmul.mubr.bf16.gmra.mrb[20].mxu0 %v2457_v58  ;;  %v4244_v58 = vld [vmem:[%s12455_s2 + $0xa0] sm:$0xff]  ;;  %4191 = vst [vmem:[#allocation2 + $0x40] sm:$0xff] %v11077_v50  ;;  %4192 = vst [vmem:[#allocation2 + $0x48] sm:$0xff] %v11077_v50 }
 0x1ff   : > { %9750 = vmatprep.mubr.bf16.mxu0 %v2458_v63  ;;  %4362 = vperm.xlu0 %10922, %v4244_v58   ;;  %v3227_v63 = vld [vmem:[%s11152_s20 + $0x75] sm:$0xff]  ;;  %4193 = vst [vmem:[#allocation2 + $0x50] sm:$0xff] %v11077_v50  ;;  %4194 = vst [vmem:[#allocation2 + $0x58] sm:$0xff] %v11077_v50 }
 0x200   : > { %4367 = vperm.xlu1 %10923, %v4245_v61   ;;  %v3622_v58 = vld [vmem:[%s11152_s20 + $0x2e] sm:$0xff]  ;;  %v3623_v61 = vld [vmem:[%s11152_s20 + $0x36] sm:$0xff]  ;;  %4195 = vst [vmem:[#allocation2 + $0x60] sm:$0xff] %v11077_v50  ;;  %4196 = vst [vmem:[#allocation2 + $0x68] sm:$0xff] %v11077_v50 }
 0x201   : > { %4197 = vst [vmem:[#allocation2 + $0x70] sm:$0xff] %v11077_v50  ;;  %4198 = vst [vmem:[#allocation2 + $0x78] sm:$0xff] %v11077_v50 }
 0x202   : > { %4199 = vst [vmem:[#allocation2 + $0x80] sm:$0xff] %v11077_v50  ;;  %4200 = vst [vmem:[#allocation2 + $0x88] sm:$0xff] %v11077_v50 }
 0x203   : > { %4372 = vperm.xlu0 %10922, %v4246_v62   ;;  %v3624_v62 = vld [vmem:[%s11152_s20 + $0x3e] sm:$0xff]  ;;  %4201 = vst [vmem:[#allocation2 + $0x90] sm:$0xff] %v11077_v50  ;;  %4202 = vst [vmem:[#allocation2 + $0x98] sm:$0xff] %v11077_v50 }
 0x204   : > { %4377 = vperm.xlu1 %10923, %v4247_v4   ;;  %v3658_v1 = vpack.c.bf16 %v3624_v62, %v3623_v61  ;;  %v3628_v4 = vld [vmem:[%s11152_s20 + $0x5e] sm:$0xff]  ;;  %4203 = vst [vmem:[#allocation2 + $0xa0] sm:$0xff] %v11077_v50  ;;  %4204 = vst [vmem:[#allocation2 + $0xa8] sm:$0xff] %v11077_v50 }
 0x205   : > { %4205 = vst [vmem:[#allocation2 + $0xb0] sm:$0xff] %v11077_v50  ;;  %4206 = vst [vmem:[#allocation2 + $0xb8] sm:$0xff] %v11077_v50 }
 0x206   : > { %9751 = vmatmul.mubr.bf16.gmra.mrb[24].mxu0 %v11555_v0  ;;  %v3228_v0 = vld [vmem:[%s11152_s20 + $0x7d] sm:$0xff]  ;;  %4207 = vst [vmem:[#allocation2 + $0xc0] sm:$0xff] %v11077_v50  ;;  %4208 = vst [vmem:[#allocation2 + $0xc8] sm:$0xff] %v11077_v50 }
 0x207   : > { %9754 = vmatprep.mubr.bf16.mxu0 %v2460_v5  ;;  %v3258_v5 = vpack.c.bf16 %v3228_v0, %v3227_v63  ;;  %v3625_v63 = vld [vmem:[%s11152_s20 + $0x46] sm:$0xff]  ;;  %v3626_v0 = vld [vmem:[%s11152_s20 + $0x4e] sm:$0xff]  ;;  %4209 = vst [vmem:[#allocation2 + $0xd0] sm:$0xff] %v11077_v50  ;;  %4210 = vst [vmem:[#allocation2 + $0xd8] sm:$0xff] %v11077_v50 }
 0x208   : > { %4387 = vperm.xlu1 %10923, %v4249_v10   ;;  %v3659_v2 = vpack.c.bf16 %v3626_v0, %v3625_v63  ;;  %v3632_v10 = vld [vmem:[%s11152_s20 + $0x7e] sm:$0xff]  ;;  %4211 = vst [vmem:[#allocation2 + $0xe0] sm:$0xff] %v11077_v50  ;;  %4212 = vst [vmem:[#allocation2 + $0xe8] sm:$0xff] %v11077_v50 }
 0x209   : > { %4213 = vst [vmem:[#allocation2 + $0xf0] sm:$0xff] %v11077_v50  ;;  %4214 = vst [vmem:[#allocation2 + $0xf8] sm:$0xff] %v11077_v50 }
 0x20a   : > { %4215 = vst [vmem:[#allocation2 + $0x100] sm:$0xff] %v11077_v50  ;;  %4216 = vst [vmem:[#allocation2 + $0x108] sm:$0xff] %v11077_v50 }
 0x20b   : > { %4217 = vst [vmem:[#allocation2 + $0x110] sm:$0xff] %v11077_v50  ;;  %4218 = vst [vmem:[#allocation2 + $0x118] sm:$0xff] %v11077_v50 }
 0x20c   : > { %4397 = vperm.xlu1 %10923, %v4251_v18   ;;  %v3638_v18 = vld [vmem:[%s11152_s20 + $0xae] sm:$0xff]  ;;  %4219 = vst [vmem:[#allocation2 + $0x120] sm:$0xff] %v11077_v50  ;;  %4220 = vst [vmem:[#allocation2 + $0x128] sm:$0xff] %v11077_v50 }
 0x20d   : > { %4221 = vst [vmem:[#allocation2 + $0x130] sm:$0xff] %v11077_v50  ;;  %4222 = vst [vmem:[#allocation2 + $0x138] sm:$0xff] %v11077_v50 }
 0x20e   : > { %9755 = vmatmul.mubr.bf16.gmra.mrb[28].mxu0 %v11562_v6  ;;  %v4248_v6 = vld [vmem:[%s12455_s2 + $0xc0] sm:$0xff]  ;;  %4223 = vst [vmem:[#allocation2 + $0x140] sm:$0xff] %v11077_v50 }
 0x20f   : > { %9758 = vmatprep.mubr.bf16.mxu0 %v11567_v9  ;;  %v10996_v9 = vld [vmem:[%s12459_s6] sm:$0xff]   ;;  %4382 = vperm.xlu0 %10922, %v4248_v6   ;;  %v3630_v6 = vld [vmem:[%s11152_s20 + $0x6e] sm:$0xff] }
 0x210   : > { %9866 = vmatprep.subr.bf16.mxu1 %v10996_v9  ;;  %4407 = vperm.xlu1 %10923, %v4253_v24   ;;  %v3642_v24 = vld [vmem:[%s11152_s20 + $0xce] sm:$0xff] }
 0x211   : > { %9867 = vmatpush3.bf16.msra.mxu1 %v10996_v9  ;;  %v3631_v9 = vld [vmem:[%s11152_s20 + $0x76] sm:$0xff] }
 0x212   : > { %v3662_v13 = vpack.c.bf16 %v3632_v10, %v3631_v9 }
 0x213   : > { %4392 = vperm.xlu0 %10922, %v4250_v11   ;;  %v3633_v11 = vld [vmem:[%s11152_s20 + $0x86] sm:$0xff] }
 0x214   : > { %4417 = vperm.xlu1 %10923, %v4255_v30   ;;  %v3663_v14 = vpack.c.bf16 %v3634_v12, %v3633_v11  ;;  %v3646_v30 = vld [vmem:[%s11152_s20 + $0xee] sm:$0xff] }
 0x216   : > { %9759 = vmatmul.mubr.bf16.gmra.mrb[32].mxu0 %v2866_v36  ;;  %v3239_v36 = vld [vmem:[%s11152_s20 + $0xd5] sm:$0xff] }
 0x217   : > { %9778 = vmatprep.mubr.bf16.mxu0 %v3253_v37  ;;  %4402 = vperm.xlu0 %10922, %v4252_v20   ;;  %v3240_v37 = vld [vmem:[%s11152_s20 + $0xdd] sm:$0xff] }
 0x218   : > { %4427 = vperm.xlu1 %10923, %v4257_v34   ;;  %v3264_v41 = vpack.c.bf16 %v3240_v37, %v3239_v36  ;;  %v3648_v34 = vld [vmem:[%s11152_s20 + $0xfe] sm:$0xff]  ;;  %v3650_v36 = vld [vmem:[%s11152_s20 + $0x10e] sm:$0xff] }
 0x21b   : > { %4412 = vperm.xlu0 %10922, %v4254_v25  }
 0x21c   : > { %4437 = vperm.xlu1 %10923, %v4259_v40   ;;  %v3652_v40 = vld [vmem:[%s11152_s20 + $0x11e] sm:$0xff] }
 0x21e   : > { %9779 = vmatmul.mubr.bf16.vlgmr.msra.gmra.mrb[0].mxu0 %v3254_v46  ;;  %v3246_v46 = vld [vmem:[%s11152_s20 + $0x10d] sm:$0xff] }
 0x21f   : > { %9815 = vmatpush3.bf16.msra.mxu0 %v11602_v17  ;;  %9782 = vmatprep.mubr.bf16.mxu0 %v3255_v47  ;;  %v10997_v17 = vld [vmem:[%s12459_s6 + $0x8] sm:$0xff]   ;;  %v3266_v47 = vpack.c.bf16 %v3244_v44, %v3243_v43  ;;  %v3672_v43 = vpack.c.bf16 %v3652_v40, %v3651_v39 }
 0x220   : > { %9816 = vmatprep.subr.bf16.mxu0 %v10989_v48  ;;  %9868 = vmatprep.subr.bf16.mxu1 %v10997_v17 }
 0x221   : > { %9869 = vmatpush3.bf16.msra.mxu1 %v10997_v17  ;;  %4422 = vperm.xlu0 %10922, %v4256_v32   ;;  %v3637_v17 = vld [vmem:[%s11152_s20 + $0xa6] sm:$0xff]  ;;  %v3669_v32 = vpack.c.bf16 %v3646_v30, %v3645_v29 }
 0x222   : > { %9870 = vmatprep.subr.bf16.mxu1 %v10998_v23  ;;  %v3665_v20 = vpack.c.bf16 %v3638_v18, %v3637_v17 }
 0x223   : > { %9817 = vmatpush3.bf16.msra.mxu0 %v10989_v48  ;;  %v3267_v48 = vpack.c.bf16 %v3246_v46, %v3245_v45  ;;  %v3655_v45 = vld [vmem:[%s11152_s20 + $0x136] sm:$0xff]  ;;  %v3656_v46 = vld [vmem:[%s11152_s20 + $0x13e] sm:$0xff] }
 0x224   : > { %9818 = vmatprep.subr.bf16.mxu0 %v10990_v55 }
 0x225   : > { %9871 = vmatpush3.bf16.msra.mxu1 %v10998_v23  ;;  %4432 = vperm.xlu0 %10922, %v4258_v35   ;;  %v3641_v23 = vld [vmem:[%s11152_s20 + $0xc6] sm:$0xff] }
 0x226   : > { %9783 = vmatmul.mubr.bf16.gmra.mrb[4].mxu0 %v3256_v57  ;;  %v3621_v57 = vld [vmem:[%s11152_s20 + $0x26] sm:$0xff]  ;;  %v3667_v26 = vpack.c.bf16 %v3642_v24, %v3641_v23 }
 0x227   : > { %9786 = vmatprep.mubr.bf16.mxu0 %v3257_v59  ;;  %9819 = vmatpush3.bf16.msra.mxu0 %v10990_v55  ;;  %v3251_v55 = vld [vmem:[%s11152_s20 + $0x135] sm:$0xff]  ;;  %v3649_v35 = vld [vmem:[%s11152_s20 + $0x106] sm:$0xff] }
 0x228   : > { %9820 = vmatprep.subr.bf16.mxu0 %v10991_v60  ;;  %v3270_v59 = vpack.c.bf16 %v3252_v56, %v3251_v55  ;;  %v3671_v38 = vpack.c.bf16 %v3650_v36, %v3649_v35  ;;  %v11840_v55 = vld [vmem:[%s12459_s6 + $0x40] sm:$0xff]  }
 0x22b   : > { %9821 = vmatpush3.bf16.msra.mxu0 %v10991_v60  ;;  %v3657_v60 = vpack.c.bf16 %v3622_v58, %v3621_v57 }
 0x22c   : > { %9822 = vmatprep.subr.bf16.mxu0 %v10992_v3 }
 0x22e   : > { %9787 = vmatmul.mubr.bf16.gmra.mrb[8].mxu0 %v3258_v5  ;;  %v3629_v5 = vld [vmem:[%s11152_s20 + $0x66] sm:$0xff] }
 0x22f   : > { %9790 = vmatprep.mubr.bf16.mxu0 %v3259_v7  ;;  %9823 = vmatpush3.bf16.msra.mxu0 %v10992_v3  ;;  %v3627_v3 = vld [vmem:[%s11152_s20 + $0x56] sm:$0xff] }
 0x230   : > { %9824 = vmatprep.subr.bf16.mxu0 %v10993_v8  ;;  %v3660_v7 = vpack.c.bf16 %v3628_v4, %v3627_v3  ;;  %v11854_v3 = vld [vmem:[%s12457_s4] ss:$0 sm:$0xff] }
 0x233   : > { %9825 = vmatpush3.bf16.msra.mxu0 %v10993_v8  ;;  %v3661_v8 = vpack.c.bf16 %v3630_v6, %v3629_v5  ;;  %v11861_v6 = vld [vmem:[%s12458_s5] ss:$0 sm:$0xff] }
 0x234   : > { %9826 = vmatprep.subr.bf16.mxu0 %v10994_v16 }
 0x236   : > { %9791 = vmatmul.mubr.bf16.gmra.mrb[12].mxu0 %v3260_v19 }
 0x237   : > { %9794 = vmatprep.mubr.bf16.mxu0 %v3261_v21  ;;  %9827 = vmatpush3.bf16.msra.mxu0 %v10994_v16  ;;  %v3636_v16 = vld [vmem:[%s11152_s20 + $0x9e] sm:$0xff]  ;;  %v3639_v21 = vld [vmem:[%s11152_s20 + $0xb6] sm:$0xff] }
 0x238   : > { %9828 = vmatprep.subr.bf16.mxu0 %v10995_v22  ;;  %v3664_v19 = vpack.c.bf16 %v3636_v16, %v3635_v15 }
 0x23b   : > { %9829 = vmatpush3.bf16.msra.mxu0 %v10995_v22  ;;  %v3640_v22 = vld [vmem:[%s11152_s20 + $0xbe] sm:$0xff] }
 0x23c   : > { %v3666_v25 = vpack.c.bf16 %v3640_v22, %v3639_v21 }
 0x23e   : > { %9795 = vmatmul.mubr.bf16.gmra.mrb[16].mxu0 %v3262_v31  ;;  %v3668_v31 = vpack.c.bf16 %v3644_v28, %v3643_v27 }
 0x23f   : > { %9798 = vmatprep.mubr.bf16.mxu0 %v3263_v33  ;;  %v3647_v33 = vld [vmem:[%s11152_s20 + $0xf6] sm:$0xff] }
 0x240   : > { %v3670_v37 = vpack.c.bf16 %v3648_v34, %v3647_v33 }
 0x246   : > { %9799 = vmatmul.mubr.bf16.gmra.mrb[20].mxu0 %v3264_v41  ;;  %v3653_v41 = vld [vmem:[%s11152_s20 + $0x126] sm:$0xff] }
 0x247   : > { %9802 = vmatprep.mubr.bf16.mxu0 %v3265_v42  ;;  %v3654_v42 = vld [vmem:[%s11152_s20 + $0x12e] sm:$0xff] }
 0x248   : > { %v3673_v44 = vpack.c.bf16 %v3654_v42, %v3653_v41 }
 0x24e   : > { %9803 = vmatmul.mubr.bf16.gmra.mrb[24].mxu0 %v3266_v47  ;;  %v3674_v47 = vpack.c.bf16 %v3656_v46, %v3655_v45 }
 0x24f   : > { %9806 = vmatprep.mubr.bf16.mxu0 %v3267_v48  ;;  %v10999_v48 = vld [vmem:[%s12459_s6 + $0x18] sm:$0xff]  }
 0x250   : > { %9872 = vmatprep.subr.bf16.mxu1 %v10999_v48  ;;  %v4263_v56 = vpop.permute.xlu0 %4262 }
 0x251   : > { %9873 = vmatpush3.bf16.msra.mxu1 %v10999_v48 }
 0x252   : > { %9874 = vmatprep.subr.bf16.mxu1 %v11000_v49 }
 0x254   : > { %v4268_v58 = vpop.permute.xlu0 %4267 }
 0x255   : > { %9875 = vmatpush3.bf16.msra.mxu1 %v11000_v49 }
 0x256   : > { %9807 = vmatmul.mubr.bf16.gmra.mrb[28].mxu0 %v3268_v53  ;;  %9876 = vmatprep.subr.bf16.mxu1 %v11001_v51  ;;  %v11003_v53 = vld [vmem:[%s12459_s6 + $0x38] sm:$0xff]  }
 0x257   : > { %9810 = vmatprep.mubr.bf16.mxu0 %v3269_v54  ;;  %v11078_v54 = vmov 0.0|0.0   ;;  %v4273_v57 = vpop.permute.xlu1 %4272 }
 0x258   : > { %9882 = vmatprep.mubr.bf16.mxu1 %v11078_v54 }
 0x259   : > { %9877 = vmatpush3.bf16.msra.mxu1 %v11001_v51 }
 0x25a   : > { %9878 = vmatprep.subr.bf16.mxu1 %v11002_v52 }
 0x25d   : > { %9879 = vmatpush3.bf16.msra.mxu1 %v11002_v52 }
 0x25e   : > { %9811 = vmatmul.mubr.bf16.gmra.mrb[32].mxu0 %v3270_v59  ;;  %9880 = vmatprep.subr.bf16.mxu1 %v11003_v53  ;;  %v4278_v59 = vpop.permute.xlu1 %4277 }
 0x25f   : > { %9830 = vmatprep.mubr.bf16.mxu0 %v3657_v60  ;;  %v4283_v60 = vpop.permute.xlu0 %4282 }
 0x261   : > { %9881 = vmatpush3.bf16.msra.mxu1 %v11003_v53 }
 0x262   : > { %9918 = vmatprep.subr.bf16.mxu1 %v11840_v55  ;;  %v11843_v61 = vpop.permute.xlu1 %4287 }
 0x263   : > { %v4293_v62 = vpop.permute.xlu0 %4292 }
 0x266   : > { %9831 = vmatmul.mubr.bf16.vlgmr.msra.gmra.mrb[0].mxu0 %v3658_v1  ;;  %v4298_v63 = vpop.permute.xlu1 %4297 }
 0x267   : > { %9834 = vmatprep.mubr.bf16.mxu0 %v3659_v2  ;;  %v11845_v0 = vpop.permute.xlu0 %4302 }
 0x26a   : > { %v11847_v1 = vpop.permute.xlu1 %4307 }
 0x26b   : > { %v11849_v2 = vpop.permute.xlu0 %4312 }
 0x26e   : > { %9835 = vmatmul.mubr.bf16.gmra.mrb[4].mxu0 %v3660_v7  ;;  %v11856_v4 = vpop.permute.xlu1 %4317 }
 0x26f   : > { %9838 = vmatprep.mubr.bf16.mxu0 %v3661_v8 }
 0x276   : > { %9839 = vmatmul.mubr.bf16.gmra.mrb[8].mxu0 %v3662_v13 }
 0x277   : > { %9842 = vmatprep.mubr.bf16.mxu0 %v3663_v14  ;;  %v11867_v14 = vpop.permute.xlu0 %4322 }
 0x27b   : > { %v11876_v30 = vpop.permute.xlu0 %4332 }
 0x27e   : > { %9843 = vmatmul.mubr.bf16.gmra.mrb[12].mxu0 %v3664_v19  ;;  %v11872_v19 = vpop.permute.xlu1 %4327 }
 0x27f   : > { %9846 = vmatprep.mubr.bf16.mxu0 %v3665_v20  ;;  %v11887_v46 = vpop.permute.xlu0 %4342 }
 0x286   : > { %9847 = vmatmul.mubr.bf16.gmra.mrb[16].mxu0 %v3666_v25 }
 0x287   : > { %9850 = vmatprep.mubr.bf16.mxu0 %v3667_v26 }
 0x28e   : > { %9851 = vmatmul.mubr.bf16.gmra.mrb[20].mxu0 %v3668_v31 }
 0x28f   : > { %9854 = vmatprep.mubr.bf16.mxu0 %v3669_v32 }
 0x296   : > { %9855 = vmatmul.mubr.bf16.gmra.mrb[24].mxu0 %v3670_v37  ;;  %v11881_v37 = vpop.permute.xlu1 %4337 }
 0x297   : > { %9858 = vmatprep.mubr.bf16.mxu0 %v3671_v38 }
 0x29a   : > { %v11890_v53 = vpop.permute.xlu1 %4347 }
 0x29e   : > { %9859 = vmatmul.mubr.bf16.gmra.mrb[28].mxu0 %v3672_v43 }
 0x29f   : > { %9862 = vmatprep.mubr.bf16.mxu0 %v3673_v44 }
 0x2a6   : > { %9863 = vmatmul.mubr.bf16.gmra.mrb[32].mxu0 %v3674_v47 }
 0x339   : > { %v9832_v5 = vpop.f32.mrb[0].mxu0 }
 0x33a   : > { %v4070_v7 = vmul.f32 %v9832_v5, %v11854_v3  ;;  %v3810_v8 = vpop.f32.mrb[1].mxu0 }
 0x33b   : > { %v4068_v9 = vmul.f32 %v11854_v3, %v3810_v8  ;;  %v9833_v10 = vpop.f32.mrb[2].mxu0 }
 0x33c   : > { %v4113_v11 = vadd.f32 %v11861_v6, %v4070_v7  ;;  %v4071_v12 = vmul.f32 %v9833_v10, %v11854_v3  ;;  %v3813_v13 = vpop.f32.mrb[3].mxu0 }
 0x33d   : > { %v4111_v15 = vadd.f32 %v11861_v6, %v4068_v9  ;;  %v4069_v16 = vmul.f32 %v11854_v3, %v3813_v13 }
 0x33e   : > { %v4149_v17 = vmax.f32 %v4113_v11, 0.0  ;;  %v4114_v18 = vadd.f32 %v11861_v6, %v4071_v12  ;;  %v11005_v11 = vld [vmem:[%s12459_s6 + $0x48] sm:$0xff]  }
 0x33f   : > { %v4147_v20 = vmax.f32 %v4111_v15, 0.0  ;;  %v4112_v21 = vadd.f32 %v11861_v6, %v4069_v16  ;;  %v11902_v15 = vpop.permute.xlu0 %4352 }
 0x340   : > { %v4442_v22 = vmul.f32 %v4273_v57, %v4149_v17  ;;  %v4150_v23 = vmax.f32 %v4114_v18, 0.0 }
 0x341   : > { %v4440_v24 = vmul.f32 %v4263_v56, %v4147_v20  ;;  %v4148_v25 = vmax.f32 %v4112_v21, 0.0  ;;  %v9836_v26 = vpop.f32.mrb[4].mxu0  ;;  %v11907_v21 = vpop.permute.xlu1 %4357 }
 0x342   : > { %4478 = vst [vmem:[#allocation2 + $0x23] sm:$0xff] %v4442_v22  ;;  %v4443_v27 = vmul.f32 %v4278_v59, %v4150_v23  ;;  %v4074_v28 = vmul.f32 %v9836_v26, %v11854_v3  ;;  %v3826_v29 = vpop.f32.mrb[5].mxu0 }
 0x343   : > { %4476 = vst [vmem:[#allocation2 + $0x13] sm:$0xff] %v4440_v24  ;;  %v4441_v31 = vmul.f32 %v4268_v58, %v4148_v25  ;;  %v4072_v32 = vmul.f32 %v11854_v3, %v3826_v29  ;;  %v9837_v33 = vpop.f32.mrb[6].mxu0  ;;  %v11006_v25 = vld [vmem:[%s12459_s6 + $0x50] sm:$0xff]  }
 0x344   : > { %4479 = vst [vmem:[#allocation2 + $0x2b] sm:$0xff] %v4443_v27  ;;  %v4117_v34 = vadd.f32 %v11861_v6, %v4074_v28  ;;  %v4075_v35 = vmul.f32 %v9837_v33, %v11854_v3  ;;  %v3829_v36 = vpop.f32.mrb[7].mxu0 }
 0x345   : > { %4477 = vst [vmem:[#allocation2 + $0x1b] sm:$0xff] %v4441_v31  ;;  %v4115_v38 = vadd.f32 %v11861_v6, %v4072_v32  ;;  %v4073_v39 = vmul.f32 %v11854_v3, %v3829_v36 }
 0x346   : > { %v4153_v40 = vmax.f32 %v4117_v34, 0.0  ;;  %v4118_v41 = vadd.f32 %v11861_v6, %v4075_v35 }
 0x347   : > { %v4151_v42 = vmax.f32 %v4115_v38, 0.0  ;;  %v4116_v43 = vadd.f32 %v11861_v6, %v4073_v39 }
 0x348   : > { %v4446_v44 = vmul.f32 %v4293_v62, %v4153_v40  ;;  %v4154_v45 = vmax.f32 %v4118_v41, 0.0  ;;  %v11007_v41 = vld [vmem:[%s12459_s6 + $0x58] sm:$0xff]  }
 0x349   : > { %v4444_v47 = vmul.f32 %v4283_v60, %v4151_v42  ;;  %v4152_v48 = vmax.f32 %v4116_v43, 0.0  ;;  %v9840_v49 = vpop.f32.mrb[8].mxu0 }
 0x34a   : > { %4482 = vst [vmem:[#allocation2 + $0x43] sm:$0xff] %v4446_v44  ;;  %v4447_v50 = vmul.f32 %v4298_v63, %v4154_v45  ;;  %v4078_v51 = vmul.f32 %v9840_v49, %v11854_v3  ;;  %v3842_v52 = vpop.f32.mrb[9].mxu0  ;;  %v4550_v5 = vld [vmem:[#allocation2 + $0x10] sm:$0xff]  ;;  %v11927_v44 = vpop.permute.xlu1 %4367 }
 0x34b   : > { %4480 = vst [vmem:[#allocation2 + $0x33] sm:$0xff] %v4444_v47  ;;  %v4445_v54 = vmul.f32 %v11843_v61, %v4152_v48  ;;  %v4076_v56 = vmul.f32 %v11854_v3, %v3842_v52  ;;  %v9841_v57 = vpop.f32.mrb[10].mxu0  ;;  %v4553_v58 = vld [vmem:[#allocation2 + $0x28] sm:$0xff] }
 0x34c   : > { %4483 = vst [vmem:[#allocation2 + $0x4b] sm:$0xff] %v4447_v50  ;;  %v4121_v59 = vadd.f32 %v11861_v6, %v4078_v51  ;;  %v4079_v60 = vmul.f32 %v9841_v57, %v11854_v3  ;;  %v3845_v62 = vpop.f32.mrb[11].mxu0  ;;  %v4551_v63 = vld [vmem:[#allocation2 + $0x18] sm:$0xff]  ;;  %v4552_v7 = vld [vmem:[#allocation2 + $0x20] sm:$0xff] }
 0x34d   : > { %4481 = vst [vmem:[#allocation2 + $0x3b] sm:$0xff] %v4445_v54  ;;  %v4119_v8 = vadd.f32 %v11861_v6, %v4076_v56  ;;  %v4077_v9 = vmul.f32 %v11854_v3, %v3845_v62  ;;  %v4585_v10 = vpack.c.bf16 %v4551_v63, %v4550_v5  ;;  %v4586_v61 = vpack.c.bf16 %v4553_v58, %v4552_v7  ;;  %v11008_v54 = vld [vmem:[%s12459_s6 + $0x60] sm:$0xff]  }
 0x34e   : > { %v4157_v12 = vmax.f32 %v4121_v59, 0.0  ;;  %v4122_v13 = vadd.f32 %v11861_v6, %v4079_v60 }
 0x34f   : > { %v4155_v16 = vmax.f32 %v4119_v8, 0.0  ;;  %v4120_v17 = vadd.f32 %v11861_v6, %v4077_v9  ;;  %9883 = vmatmul.mubr.bf16.vlgmr.msra.gmra.mrb[0].mxu1 %v4585_v10  ;;  %v11943_v10 = vpop.permute.xlu1 %4377 }
 0x350   : > { %v4450_v18 = vmul.f32 %v11849_v2, %v4157_v12  ;;  %v4158_v20 = vmax.f32 %v4122_v13, 0.0  ;;  %9886 = vmatprep.mubr.bf16.mxu1 %v4586_v61  ;;  %9919 = vmatpush3.bf16.msra.mxu1 %v11840_v55  ;;  %v11009_v13 = vld [vmem:[%s12459_s6 + $0x68] sm:$0xff]  }
 0x351   : > { %v4448_v22 = vmul.f32 %v11845_v0, %v4155_v16  ;;  %v4156_v23 = vmax.f32 %v4120_v17, 0.0  ;;  %v9844_v24 = vpop.f32.mrb[12].mxu0  ;;  %9920 = vmatprep.subr.bf16.mxu1 %v11005_v11 }
 0x352   : > { %4486 = vst [vmem:[#allocation2 + $0x63] sm:$0xff] %v4450_v18  ;;  %v4451_v26 = vmul.f32 %v11856_v4, %v4158_v20  ;;  %v4082_v2 = vmul.f32 %v9844_v24, %v11854_v3  ;;  %v3858_v27 = vpop.f32.mrb[13].mxu0  ;;  %v4554_v34 = vld [vmem:[#allocation2 + $0x30] sm:$0xff]  ;;  %v11919_v4 = vpop.permute.xlu0 %4362 }
 0x353   : > { %4484 = vst [vmem:[#allocation2 + $0x53] sm:$0xff] %v4448_v22  ;;  %v4449_v55 = vmul.f32 %v11847_v1, %v4156_v23  ;;  %v4080_v28 = vmul.f32 %v11854_v3, %v3858_v27  ;;  %v9845_v29 = vpop.f32.mrb[14].mxu0  ;;  %v4557_v0 = vld [vmem:[#allocation2 + $0x48] sm:$0xff]  ;;  %v11010_v27 = vld [vmem:[%s12459_s6 + $0x70] sm:$0xff]  }
 0x354   : > { %4487 = vst [vmem:[#allocation2 + $0x6b] sm:$0xff] %v4451_v26  ;;  %v4125_v31 = vadd.f32 %v11861_v6, %v4082_v2  ;;  %v4083_v32 = vmul.f32 %v9845_v29, %v11854_v3  ;;  %v3861_v33 = vpop.f32.mrb[15].mxu0  ;;  %v4555_v35 = vld [vmem:[#allocation2 + $0x38] sm:$0xff]  ;;  %v4556_v36 = vld [vmem:[#allocation2 + $0x40] sm:$0xff]  ;;  %9921 = vmatpush3.bf16.msra.mxu1 %v11005_v11  ;;  %v11961_v29 = vpop.permute.xlu1 %4387 }
 0x355   : > { %4485 = vst [vmem:[#allocation2 + $0x5b] sm:$0xff] %v4449_v55  ;;  %v4123_v38 = vadd.f32 %v11861_v6, %v4080_v28  ;;  %v4081_v1 = vmul.f32 %v11854_v3, %v3861_v33  ;;  %v4587_v39 = vpack.c.bf16 %v4555_v35, %v4554_v34  ;;  %v4588_v40 = vpack.c.bf16 %v4557_v0, %v4556_v36 }
 0x356   : > { %9922 = vmatprep.subr.bf16.mxu1 %v11006_v25  ;;  %v4161_v42 = vmax.f32 %v4125_v31, 0.0  ;;  %v4126_v43 = vadd.f32 %v11861_v6, %v4083_v32  ;;  %v11937_v59 = vpop.permute.xlu0 %4372 }
 0x357   : > { %v4159_v45 = vmax.f32 %v4123_v38, 0.0  ;;  %v4124_v47 = vadd.f32 %v11861_v6, %v4081_v1  ;;  %9887 = vmatmul.mubr.bf16.gmra.mrb[4].mxu1 %v4587_v39 }
 0x358   : > { %v4454_v48 = vmul.f32 %v11876_v30, %v4161_v42  ;;  %v4162_v49 = vmax.f32 %v4126_v43, 0.0  ;;  %9890 = vmatprep.mubr.bf16.mxu1 %v4588_v40  ;;  %9923 = vmatpush3.bf16.msra.mxu1 %v11006_v25 }
 0x359   : > { %v4452_v50 = vmul.f32 %v11867_v14, %v4159_v45  ;;  %v4160_v51 = vmax.f32 %v4124_v47, 0.0  ;;  %v9848_v52 = vpop.f32.mrb[16].mxu0  ;;  %9924 = vmatprep.subr.bf16.mxu1 %v11007_v41 }
 0x35a   : > { %4490 = vst [vmem:[#allocation2 + $0x83] sm:$0xff] %v4454_v48  ;;  %v4455_v56 = vmul.f32 %v11881_v37, %v4162_v49  ;;  %v4086_v57 = vmul.f32 %v9848_v52, %v11854_v3  ;;  %v3874_v58 = vpop.f32.mrb[17].mxu0  ;;  %v4558_v8 = vld [vmem:[#allocation2 + $0x50] sm:$0xff]  ;;  %v11953_v24 = vpop.permute.xlu0 %4382 }
 0x35b   : > { %4488 = vst [vmem:[#allocation2 + $0x73] sm:$0xff] %v4452_v50  ;;  %v4453_v30 = vmul.f32 %v11872_v19, %v4160_v51  ;;  %v4084_v14 = vmul.f32 %v11854_v3, %v3874_v58  ;;  %v9849_v60 = vpop.f32.mrb[18].mxu0  ;;  %v4561_v62 = vld [vmem:[#allocation2 + $0x68] sm:$0xff]  ;;  %v4398_v51 = vpop.permute.xlu1 %4397 }
 0x35c   : > { %4491 = vst [vmem:[#allocation2 + $0x8b] sm:$0xff] %v4455_v56  ;;  %v4129_v5 = vadd.f32 %v11861_v6, %v4086_v57  ;;  %v4087_v63 = vmul.f32 %v9849_v60, %v11854_v3  ;;  %v3877_v7 = vpop.f32.mrb[19].mxu0  ;;  %v4559_v37 = vld [vmem:[#allocation2 + $0x58] sm:$0xff]  ;;  %v4560_v9 = vld [vmem:[#allocation2 + $0x60] sm:$0xff]  ;;  %9925 = vmatpush3.bf16.msra.mxu1 %v11007_v41 }
 0x35d   : > { %4489 = vst [vmem:[#allocation2 + $0x7b] sm:$0xff] %v4453_v30  ;;  %v4127_v61 = vadd.f32 %v11861_v6, %v4084_v14  ;;  %v4085_v19 = vmul.f32 %v11854_v3, %v3877_v7  ;;  %v4589_v11 = vpack.c.bf16 %v4559_v37, %v4558_v8  ;;  %v4590_v12 = vpack.c.bf16 %v4561_v62, %v4560_v9  ;;  %v11011_v41 = vld [vmem:[%s12459_s6 + $0x78] sm:$0xff]   ;;  %v11979_v57 = vld [vmem:[%s12459_s6 + $0x80] sm:$0xff]  }
 0x35e   : > { %9926 = vmatprep.subr.bf16.mxu1 %v11008_v54  ;;  %v4165_v16 = vmax.f32 %v4129_v5, 0.0  ;;  %v4130_v17 = vadd.f32 %v11861_v6, %v4087_v63  ;;  %v4393_v45 = vpop.permute.xlu0 %4392 }
 0x35f   : > { %v4163_v18 = vmax.f32 %v4127_v61, 0.0  ;;  %v4128_v20 = vadd.f32 %v11861_v6, %v4085_v19  ;;  %9891 = vmatmul.mubr.bf16.gmra.mrb[8].mxu1 %v4589_v11 }
 0x360   : > { %v4458_v22 = vmul.f32 %v11902_v15, %v4165_v16  ;;  %v4166_v23 = vmax.f32 %v4130_v17, 0.0  ;;  %9894 = vmatprep.mubr.bf16.mxu1 %v4590_v12  ;;  %9927 = vmatpush3.bf16.msra.mxu1 %v11008_v54  ;;  %v4408_v16 = vpop.permute.xlu1 %4407 }
 0x361   : > { %v4456_v25 = vmul.f32 %v11887_v46, %v4163_v18  ;;  %v4164_v26 = vmax.f32 %v4128_v20, 0.0  ;;  %v9852_v2 = vpop.f32.mrb[20].mxu0  ;;  %9928 = vmatprep.subr.bf16.mxu1 %v11009_v13 }
 0x362   : > { %4494 = vst [vmem:[#allocation2 + $0xa3] sm:$0xff] %v4458_v22  ;;  %v4459_v55 = vmul.f32 %v11907_v21, %v4166_v23  ;;  %v4090_v28 = vmul.f32 %v9852_v2, %v11854_v3  ;;  %v3890_v15 = vpop.f32.mrb[21].mxu0  ;;  %v4562_v36 = vld [vmem:[#allocation2 + $0x70] sm:$0xff] }
 0x363   : > { %4492 = vst [vmem:[#allocation2 + $0x93] sm:$0xff] %v4456_v25  ;;  %v4457_v0 = vmul.f32 %v11890_v53, %v4164_v26  ;;  %v4088_v46 = vmul.f32 %v11854_v3, %v3890_v15  ;;  %v9853_v31 = vpop.f32.mrb[22].mxu0  ;;  %v4565_v32 = vld [vmem:[#allocation2 + $0x88] sm:$0xff] }
 0x364   : > { %4495 = vst [vmem:[#allocation2 + $0xab] sm:$0xff] %v4459_v55  ;;  %v4133_v33 = vadd.f32 %v11861_v6, %v4090_v28  ;;  %v4091_v34 = vmul.f32 %v9853_v31, %v11854_v3  ;;  %v3893_v35 = vpop.f32.mrb[23].mxu0  ;;  %v4563_v21 = vld [vmem:[#allocation2 + $0x78] sm:$0xff]  ;;  %v4564_v38 = vld [vmem:[#allocation2 + $0x80] sm:$0xff]  ;;  %9929 = vmatpush3.bf16.msra.mxu1 %v11009_v13 }
 0x365   : > { %4493 = vst [vmem:[#allocation2 + $0x9b] sm:$0xff] %v4457_v0  ;;  %v4131_v1 = vadd.f32 %v11861_v6, %v4088_v46  ;;  %v4089_v39 = vmul.f32 %v11854_v3, %v3893_v35  ;;  %v4591_v53 = vpack.c.bf16 %v4563_v21, %v4562_v36  ;;  %v4592_v40 = vpack.c.bf16 %v4565_v32, %v4564_v38  ;;  %v4418_v21 = vpop.permute.xlu1 %4417 }
 0x366   : > { %9930 = vmatprep.subr.bf16.mxu1 %v11010_v27  ;;  %v4169_v42 = vmax.f32 %v4133_v33, 0.0  ;;  %v4134_v43 = vadd.f32 %v11861_v6, %v4091_v34 }
 0x367   : > { %v4167_v47 = vmax.f32 %v4131_v1, 0.0  ;;  %v4132_v48 = vadd.f32 %v11861_v6, %v4089_v39  ;;  %9895 = vmatmul.mubr.bf16.gmra.mrb[12].mxu1 %v4591_v53 }
 0x368   : > { %v4462_v49 = vmul.f32 %v11937_v59, %v4169_v42  ;;  %v4170_v50 = vmax.f32 %v4134_v43, 0.0  ;;  %9898 = vmatprep.mubr.bf16.mxu1 %v4592_v40  ;;  %9931 = vmatpush3.bf16.msra.mxu1 %v11010_v27 }
 0x369   : > { %v4460_v52 = vmul.f32 %v11919_v4, %v4167_v47  ;;  %v4168_v54 = vmax.f32 %v4132_v48, 0.0  ;;  %v9856_v56 = vpop.f32.mrb[24].mxu0  ;;  %9932 = vmatprep.subr.bf16.mxu1 %v11011_v41 }
 0x36a   : > { %4498 = vst [vmem:[#allocation2 + $0xc3] sm:$0xff] %v4462_v49  ;;  %v4463_v58 = vmul.f32 %v11943_v10, %v4170_v50  ;;  %v4094_v30 = vmul.f32 %v9856_v56, %v11854_v3  ;;  %v3906_v59 = vpop.f32.mrb[25].mxu0  ;;  %v4566_v8 = vld [vmem:[#allocation2 + $0x90] sm:$0xff]  ;;  %v4403_v10 = vpop.permute.xlu0 %4402 }
 0x36b   : > { %4496 = vst [vmem:[#allocation2 + $0xb3] sm:$0xff] %v4460_v52  ;;  %v4461_v14 = vmul.f32 %v11927_v44, %v4168_v54  ;;  %v4092_v60 = vmul.f32 %v11854_v3, %v3906_v59  ;;  %v9857_v4 = vpop.f32.mrb[26].mxu0  ;;  %v4569_v62 = vld [vmem:[#allocation2 + $0xa8] sm:$0xff]  ;;  %v4428_v56 = vpop.permute.xlu1 %4427 }
 0x36c   : > { %4499 = vst [vmem:[#allocation2 + $0xcb] sm:$0xff] %v4463_v58  ;;  %v4137_v5 = vadd.f32 %v11861_v6, %v4094_v30  ;;  %v4095_v63 = vmul.f32 %v9857_v4, %v11854_v3  ;;  %v3909_v7 = vpop.f32.mrb[27].mxu0  ;;  %v4567_v37 = vld [vmem:[#allocation2 + $0x98] sm:$0xff]  ;;  %v4568_v9 = vld [vmem:[#allocation2 + $0xa0] sm:$0xff]  ;;  %9933 = vmatpush3.bf16.msra.mxu1 %v11011_v41 }
 0x36d   : > { %4497 = vst [vmem:[#allocation2 + $0xbb] sm:$0xff] %v4461_v14  ;;  %v4135_v61 = vadd.f32 %v11861_v6, %v4092_v60  ;;  %v4093_v44 = vmul.f32 %v11854_v3, %v3909_v7  ;;  %v4593_v19 = vpack.c.bf16 %v4567_v37, %v4566_v8  ;;  %v4594_v11 = vpack.c.bf16 %v4569_v62, %v4568_v9 }
 0x36e   : > { %9970 = vmatprep.subr.bf16.mxu1 %v11979_v57  ;;  %v4173_v12 = vmax.f32 %v4137_v5, 0.0  ;;  %v4138_v13 = vadd.f32 %v11861_v6, %v4095_v63  ;;  %v4413_v28 = vpop.permute.xlu0 %4412 }
 0x36f   : > { %v4171_v17 = vmax.f32 %v4135_v61, 0.0  ;;  %v4136_v18 = vadd.f32 %v11861_v6, %v4093_v44  ;;  %9899 = vmatmul.mubr.bf16.gmra.mrb[16].mxu1 %v4593_v19 }
 0x370   : > { %v4466_v20 = vmul.f32 %v4393_v45, %v4173_v12  ;;  %v4174_v22 = vmax.f32 %v4138_v13, 0.0  ;;  %9902 = vmatprep.mubr.bf16.mxu1 %v4594_v11 }
 0x371   : > { %v4464_v23 = vmul.f32 %v11953_v24, %v4171_v17  ;;  %v4172_v25 = vmax.f32 %v4136_v18, 0.0  ;;  %v9860_v26 = vpop.f32.mrb[28].mxu0  ;;  %v4438_v17 = vpop.permute.xlu1 %4437 }
 0x372   : > { %4502 = vst [vmem:[#allocation2 + $0xe3] sm:$0xff] %v4466_v20  ;;  %v4467_v2 = vmul.f32 %v4398_v51, %v4174_v22  ;;  %v4098_v27 = vmul.f32 %v9860_v26, %v11854_v3  ;;  %v3922_v55 = vpop.f32.mrb[29].mxu0  ;;  %v4570_v34 = vld [vmem:[#allocation2 + $0xb0] sm:$0xff]  ;;  %v4423_v47 = vpop.permute.xlu0 %4422 }
 0x373   : > { %4500 = vst [vmem:[#allocation2 + $0xd3] sm:$0xff] %v4464_v23  ;;  %v4465_v15 = vmul.f32 %v11961_v29, %v4172_v25  ;;  %v4096_v0 = vmul.f32 %v11854_v3, %v3922_v55  ;;  %v9861_v46 = vpop.f32.mrb[30].mxu0  ;;  %v4573_v31 = vld [vmem:[#allocation2 + $0xc8] sm:$0xff] }
 0x374   : > { %4503 = vst [vmem:[#allocation2 + $0xeb] sm:$0xff] %v4467_v2  ;;  %v4141_v32 = vadd.f32 %v11861_v6, %v4098_v27  ;;  %v4099_v24 = vmul.f32 %v9861_v46, %v11854_v3  ;;  %v3925_v33 = vpop.f32.mrb[31].mxu0  ;;  %v4571_v35 = vld [vmem:[#allocation2 + $0xb8] sm:$0xff]  ;;  %v4572_v36 = vld [vmem:[#allocation2 + $0xc0] sm:$0xff]  ;;  %v4952_v46 = vld [vmem:[#allocation2 + $0x9] sm:$0xff] }
 0x375   : > { %4501 = vst [vmem:[#allocation2 + $0xdb] sm:$0xff] %v4465_v15  ;;  %v4139_v38 = vadd.f32 %v11861_v6, %v4096_v0  ;;  %v4097_v1 = vmul.f32 %v11854_v3, %v3925_v33  ;;  %v4595_v29 = vpack.c.bf16 %v4571_v35, %v4570_v34  ;;  %v4596_v39 = vpack.c.bf16 %v4573_v31, %v4572_v36  ;;  %v4951_v0 = vld [vmem:[#allocation2 + $0x1] sm:$0xff]  ;;  %v4954_v34 = vld [vmem:[#allocation2 + $0x19] sm:$0xff]  ;;  %v4956_v36 = vld [vmem:[#allocation2 + $0x29] sm:$0xff] }
 0x376   : > { %v4177_v53 = vmax.f32 %v4141_v32, 0.0  ;;  %v4142_v40 = vadd.f32 %v11861_v6, %v4099_v24  ;;  %v4433_v19 = vpop.permute.xlu0 %4432  ;;  %v4987_v24 = vpack.c.bf16 %v4952_v46, %v4951_v0  ;;  %v4955_v35 = vld [vmem:[#allocation2 + $0x21] sm:$0xff] }
 0x377   : > { %v4175_v41 = vmax.f32 %v4139_v38, 0.0  ;;  %v4140_v42 = vadd.f32 %v11861_v6, %v4097_v1  ;;  %9903 = vmatmul.mubr.bf16.gmra.mrb[20].mxu1 %v4595_v29  ;;  %v11013_v1 = vld [vmem:[%s12459_s6 + $0x88] sm:$0xff]   ;;  %v4989_v29 = vpack.c.bf16 %v4956_v36, %v4955_v35 }
 0x378   : > { %v4470_v43 = vmul.f32 %v4413_v28, %v4177_v53  ;;  %v4178_v45 = vmax.f32 %v4142_v40, 0.0  ;;  %9906 = vmatprep.mubr.bf16.mxu1 %v4596_v39  ;;  %v11014_v39 = vld [vmem:[%s12459_s6 + $0x90] sm:$0xff]   ;;  %v4958_v53 = vld [vmem:[#allocation2 + $0x39] sm:$0xff]  ;;  %v4959_v40 = vld [vmem:[#allocation2 + $0x41] sm:$0xff] }
 0x379   : > { %v12002_v48 = vmul.f32 %v4403_v10, %v4175_v41  ;;  %v4176_v49 = vmax.f32 %v4140_v42, 0.0  ;;  %v9864_v50 = vpop.f32.mrb[32].mxu0  ;;  %v4960_v41 = vld [vmem:[#allocation2 + $0x49] sm:$0xff]  ;;  %v4957_v42 = vld [vmem:[#allocation2 + $0x31] sm:$0xff] }
 0x37a   : > { %4506 = vst [vmem:[#allocation2 + $0x103] sm:$0xff] %v4470_v43  ;;  %v12004_v51 = vmul.f32 %v4418_v21, %v4178_v45  ;;  %v4102_v52 = vmul.f32 %v9864_v50, %v11854_v3  ;;  %v3938_v54 = vpop.f32.mrb[33].mxu0  ;;  %v4574_v5 = vld [vmem:[#allocation2 + $0xd0] sm:$0xff]  ;;  %v4990_v43 = vpack.c.bf16 %v4958_v53, %v4957_v42  ;;  %v11015_v45 = vld [vmem:[%s12459_s6 + $0x98] sm:$0xff]   ;;  %v4963_v50 = vld [vmem:[#allocation2 + $0x61] sm:$0xff] }
 0x37b   : > { %4504 = vst [vmem:[#allocation2 + $0xf3] sm:$0xff] %v12002_v48  ;;  %v12008_v58 = vmul.f32 %v4408_v16, %v4176_v49  ;;  %v4100_v30 = vmul.f32 %v11854_v3, %v3938_v54  ;;  %v9865_v59 = vpop.f32.mrb[34].mxu0  ;;  %v4577_v14 = vld [vmem:[#allocation2 + $0xe8] sm:$0xff]  ;;  %v4953_v21 = vld [vmem:[#allocation2 + $0x11] sm:$0xff]  ;;  %v4962_v49 = vld [vmem:[#allocation2 + $0x59] sm:$0xff] }
 0x37c   : > { %4507 = vst [vmem:[#allocation2 + $0x10b] sm:$0xff] %v12004_v51  ;;  %v4145_v60 = vadd.f32 %v11861_v6, %v4102_v52  ;;  %v4103_v4 = vmul.f32 %v9865_v59, %v11854_v3  ;;  %v3941_v62 = vpop.f32.mrb[35].mxu0  ;;  %v4575_v63 = vld [vmem:[#allocation2 + $0xd8] sm:$0xff]  ;;  %v4576_v7 = vld [vmem:[#allocation2 + $0xe0] sm:$0xff]  ;;  %v4988_v38 = vpack.c.bf16 %v4954_v34, %v4953_v21  ;;  %v4964_v52 = vld [vmem:[#allocation2 + $0x69] sm:$0xff] }
 0x37d   : > { %4505 = vst [vmem:[#allocation2 + $0xfb] sm:$0xff] %v12008_v58  ;;  %v4143_v8 = vadd.f32 %v11861_v6, %v4100_v30  ;;  %v4101_v37 = vmul.f32 %v11854_v3, %v3941_v62  ;;  %v4597_v9 = vpack.c.bf16 %v4575_v63, %v4574_v5  ;;  %v4598_v10 = vpack.c.bf16 %v4577_v14, %v4576_v7  ;;  %v4961_v54 = vld [vmem:[#allocation2 + $0x51] sm:$0xff]  ;;  %v11017_v30 = vld [vmem:[%s12459_s6 + $0xa8] sm:$0xff]   ;;  %v5358_v53 = vld [vmem:[#allocation2 + $0x1a] sm:$0xff] }
 0x37e   : > { %v4181_v61 = vmax.f32 %v4145_v60, 0.0  ;;  %v4146_v44 = vadd.f32 %v11861_v6, %v4103_v4  ;;  %v6213_v3 = vpack.c.bf16 %v12008_v58, %v12002_v48  ;;  %v4993_v59 = vpack.c.bf16 %v4964_v52, %v4963_v50  ;;  %v11018_v14 = vld [vmem:[%s12459_s6 + $0xb0] sm:$0xff]   ;;  %v4966_v60 = vld [vmem:[#allocation2 + $0x79] sm:$0xff]  ;;  %v4967_v4 = vld [vmem:[#allocation2 + $0x81] sm:$0xff] }
 0x37f   : > { %v4179_v11 = vmax.f32 %v4143_v8, 0.0  ;;  %v4144_v12 = vadd.f32 %v11861_v6, %v4101_v37  ;;  %9907 = vmatmul.mubr.bf16.gmra.mrb[24].mxu1 %v4597_v9  ;;  %v4968_v62 = vld [vmem:[#allocation2 + $0x89] sm:$0xff]  ;;  %v4965_v5 = vld [vmem:[#allocation2 + $0x71] sm:$0xff]  ;;  %v11020_v37 = vld [vmem:[%s12459_s6 + $0xc0] sm:$0xff]  }
 0x380   : > { %v12019_v13 = vmul.f32 %v4433_v19, %v4181_v61  ;;  %v4182_v16 = vmax.f32 %v4146_v44, 0.0  ;;  %9910 = vmatprep.mubr.bf16.mxu1 %v4598_v10  ;;  %v4994_v63 = vpack.c.bf16 %v4966_v60, %v4965_v5  ;;  %v11019_v7 = vld [vmem:[%s12459_s6 + $0xb8] sm:$0xff]   ;;  %v4995_v8 = vpack.c.bf16 %v4968_v62, %v4967_v4  ;;  %v4971_v10 = vld [vmem:[#allocation2 + $0xa1] sm:$0xff]  ;;  %v4972_v61 = vld [vmem:[#allocation2 + $0xa9] sm:$0xff] }
 0x381   : > { %v12021_v18 = vmul.f32 %v4423_v47, %v4179_v11  ;;  %v4180_v20 = vmax.f32 %v4144_v12, 0.0  ;;  %v4991_v47 = vpack.c.bf16 %v4960_v41, %v4959_v40  ;;  %v4970_v9 = vld [vmem:[#allocation2 + $0x99] sm:$0xff]  ;;  %v4969_v44 = vld [vmem:[#allocation2 + $0x91] sm:$0xff]  ;;  %v4997_v11 = vpack.c.bf16 %v4972_v61, %v4971_v10  ;;  %v5355_v36 = vld [vmem:[#allocation2 + $0x2] sm:$0xff] }
 0x382   : > { %4510 = vst [vmem:[#allocation2 + $0x123] sm:$0xff] %v12019_v13  ;;  %v12026_v22 = vmul.f32 %v4438_v17, %v4182_v16  ;;  %v4578_v25 = vld [vmem:[#allocation2 + $0xf0] sm:$0xff]  ;;  %v4996_v19 = vpack.c.bf16 %v4970_v9, %v4969_v44  ;;  %v4974_v12 = vld [vmem:[#allocation2 + $0xb9] sm:$0xff]  ;;  %v4975_v16 = vld [vmem:[#allocation2 + $0xc1] sm:$0xff] }
 0x383   : > { %4508 = vst [vmem:[#allocation2 + $0x113] sm:$0xff] %v12021_v18  ;;  %v12029_v23 = vmul.f32 %v4428_v56, %v4180_v20  ;;  %v4581_v6 = vld [vmem:[#allocation2 + $0x108] sm:$0xff]  ;;  %v4992_v56 = vpack.c.bf16 %v4962_v49, %v4961_v54  ;;  %v4973_v20 = vld [vmem:[#allocation2 + $0xb1] sm:$0xff]  ;;  %v5362_v49 = vld [vmem:[#allocation2 + $0x3a] sm:$0xff] }
 0x384   : > { %4511 = vst [vmem:[#allocation2 + $0x12b] sm:$0xff] %v12026_v22  ;;  %v4579_v26 = vld [vmem:[#allocation2 + $0xf8] sm:$0xff]  ;;  %v4580_v2 = vld [vmem:[#allocation2 + $0x100] sm:$0xff]  ;;  %v6216_v27 = vpack.c.bf16 %v12026_v22, %v12019_v13  ;;  %v4976_v17 = vld [vmem:[#allocation2 + $0xc9] sm:$0xff] }
 0x385   : > { %4509 = vst [vmem:[#allocation2 + $0x11b] sm:$0xff] %v12029_v23  ;;  %v4599_v55 = vpack.c.bf16 %v4579_v26, %v4578_v25  ;;  %v4600_v28 = vpack.c.bf16 %v4581_v6, %v4580_v2  ;;  %v6215_v15 = vpack.c.bf16 %v12029_v23, %v12021_v18  ;;  %v4998_v6 = vpack.c.bf16 %v4974_v12, %v4973_v20  ;;  %v4978_v26 = vld [vmem:[#allocation2 + $0xd9] sm:$0xff]  ;;  %v4979_v2 = vld [vmem:[#allocation2 + $0xe1] sm:$0xff]  ;;  %v5356_v21 = vld [vmem:[#allocation2 + $0xa] sm:$0xff] }
 0x386   : > { %v4999_v25 = vpack.c.bf16 %v4976_v17, %v4975_v16  ;;  %v5359_v40 = vld [vmem:[#allocation2 + $0x22] sm:$0xff]  ;;  %v5360_v41 = vld [vmem:[#allocation2 + $0x2a] sm:$0xff]  ;;  %v5357_v42 = vld [vmem:[#allocation2 + $0x12] sm:$0xff] }
 0x387   : > { %9911 = vmatmul.mubr.bf16.gmra.mrb[28].mxu1 %v4599_v55  ;;  %v4980_v55 = vld [vmem:[#allocation2 + $0xe9] sm:$0xff]  ;;  %v5361_v54 = vld [vmem:[#allocation2 + $0x32] sm:$0xff]  ;;  %v5366_v60 = vld [vmem:[#allocation2 + $0x5a] sm:$0xff] }
 0x388   : > { %9914 = vmatprep.mubr.bf16.mxu1 %v4600_v28  ;;  %v4977_v28 = vld [vmem:[#allocation2 + $0xd1] sm:$0xff]  ;;  %v5001_v46 = vpack.c.bf16 %v4980_v55, %v4979_v2  ;;  %v5363_v50 = vld [vmem:[#allocation2 + $0x42] sm:$0xff]  ;;  %v5370_v9 = vld [vmem:[#allocation2 + $0x7a] sm:$0xff] }
 0x389   : > { %v5000_v0 = vpack.c.bf16 %v4978_v26, %v4977_v28  ;;  %v5364_v52 = vld [vmem:[#allocation2 + $0x4a] sm:$0xff]  ;;  %v5367_v4 = vld [vmem:[#allocation2 + $0x62] sm:$0xff]  ;;  %v5365_v5 = vld [vmem:[#allocation2 + $0x52] sm:$0xff] }
 0x38a   : > { %v4582_v31 = vld [vmem:[#allocation2 + $0x110] sm:$0xff]  ;;  %v5371_v10 = vld [vmem:[#allocation2 + $0x82] sm:$0xff]  ;;  %v5374_v17 = vld [vmem:[#allocation2 + $0x9a] sm:$0xff] }
 0x38b   : > { %v5368_v62 = vld [vmem:[#allocation2 + $0x6a] sm:$0xff]  ;;  %v5369_v44 = vld [vmem:[#allocation2 + $0x72] sm:$0xff]  ;;  %v11028_v16 = vld [vmem:[%s12459_s6 + $0x100] sm:$0xff]  }
 0x38c   : > { %v4583_v32 = vld [vmem:[#allocation2 + $0x118] sm:$0xff]  ;;  %v5372_v61 = vld [vmem:[#allocation2 + $0x8a] sm:$0xff]  ;;  %v5375_v20 = vld [vmem:[#allocation2 + $0xa2] sm:$0xff] }
 0x38d   : > { %v4601_v33 = vpack.c.bf16 %v4583_v32, %v4582_v31  ;;  %v4982_v31 = vld [vmem:[#allocation2 + $0xf9] sm:$0xff]  ;;  %v4983_v32 = vld [vmem:[#allocation2 + $0x101] sm:$0xff]  ;;  %v12103_v12 = vpack.c.bf16 %v5372_v61, %v5371_v10  ;;  %v11038_v61 = vld [vmem:[%s12459_s6 + $0x150] sm:$0xff]  }
 0x38e   : > { %v5378_v55 = vld [vmem:[#allocation2 + $0xba] sm:$0xff]  ;;  %v5379_v28 = vld [vmem:[#allocation2 + $0xc2] sm:$0xff]  ;;  %v11046_v13 = vld [vmem:[%s12459_s6 + $0x190] sm:$0xff]  }
 0x38f   : > { %9915 = vmatmul.mubr.bf16.gmra.mrb[32].mxu1 %v4601_v33  ;;  %v4981_v33 = vld [vmem:[#allocation2 + $0xf1] sm:$0xff]  ;;  %v6572_v48 = vld [vmem:[#allocation2 + $0x3c] sm:$0xff]  ;;  %v6569_v58 = vld [vmem:[#allocation2 + $0x24] sm:$0xff] }
 0x390   : > { %9934 = vmatprep.mubr.bf16.mxu1 %v4987_v24  ;;  %v4984_v24 = vld [vmem:[#allocation2 + $0x109] sm:$0xff]  ;;  %v5002_v34 = vpack.c.bf16 %v4982_v31, %v4981_v33  ;;  %v6575_v23 = vld [vmem:[#allocation2 + $0x54] sm:$0xff] }
 0x391   : > { %v5003_v35 = vpack.c.bf16 %v4984_v24, %v4983_v32  ;;  %v5382_v24 = vld [vmem:[#allocation2 + $0xda] sm:$0xff]  ;;  %v5383_v33 = vld [vmem:[#allocation2 + $0xe2] sm:$0xff]  ;;  %v6574_v22 = vld [vmem:[#allocation2 + $0x4c] sm:$0xff] }
 0x397   : > { %9935 = vmatmul.mubr.bf16.vlgmr.msra.gmra.mrb[0].mxu1 %v4988_v38  ;;  %v4986_v38 = vld [vmem:[#allocation2 + $0x119] sm:$0xff] }
 0x398   : > { %9938 = vmatprep.mubr.bf16.mxu1 %v4989_v29  ;;  %9971 = vmatpush3.bf16.msra.mxu1 %v11979_v57  ;;  %v11016_v57 = vld [vmem:[%s12459_s6 + $0xa0] sm:$0xff]   ;;  %v5391_v29 = vpack.c.bf16 %v5356_v21, %v5355_v36 }
 0x399   : > { %9972 = vmatprep.subr.bf16.mxu1 %v11013_v1 }
 0x39c   : > { %9973 = vmatpush3.bf16.msra.mxu1 %v11013_v1  ;;  %v4985_v1 = vld [vmem:[#allocation2 + $0x111] sm:$0xff] }
 0x39d   : > { %9974 = vmatprep.subr.bf16.mxu1 %v11014_v39 }
 0x39f   : > { %9939 = vmatmul.mubr.bf16.gmra.mrb[4].mxu1 %v4990_v43  ;;  %v12062_v43 = vpack.c.bf16 %v5358_v53, %v5357_v42  ;;  %v5389_v42 = vld [vmem:[#allocation2 + $0x112] sm:$0xff] }
 0x3a0   : > { %9942 = vmatprep.mubr.bf16.mxu1 %v4991_v47  ;;  %9975 = vmatpush3.bf16.msra.mxu1 %v11014_v39  ;;  %v5004_v39 = vpack.c.bf16 %v4986_v38, %v4985_v1  ;;  %v12067_v47 = vpack.c.bf16 %v5360_v41, %v5359_v40  ;;  %v5386_v38 = vld [vmem:[#allocation2 + $0xfa] sm:$0xff]  ;;  %v5387_v1 = vld [vmem:[#allocation2 + $0x102] sm:$0xff] }
 0x3a1   : > { %9976 = vmatprep.subr.bf16.mxu1 %v11015_v45  ;;  %v5390_v41 = vld [vmem:[#allocation2 + $0x11a] sm:$0xff] }
 0x3a4   : > { %9977 = vmatpush3.bf16.msra.mxu1 %v11015_v45  ;;  %v11021_v45 = vld [vmem:[%s12459_s6 + $0xc8] sm:$0xff]  }
 0x3a5   : > { %9978 = vmatprep.subr.bf16.mxu1 %v11016_v57 }
 0x3a7   : > { %9943 = vmatmul.mubr.bf16.gmra.mrb[8].mxu1 %v4992_v56  ;;  %v12074_v56 = vpack.c.bf16 %v5362_v49, %v5361_v54  ;;  %v11030_v49 = vld [vmem:[%s12459_s6 + $0x110] sm:$0xff]   ;;  %v11035_v54 = vld [vmem:[%s12459_s6 + $0x138] sm:$0xff]  }
 0x3a8   : > { %9946 = vmatprep.mubr.bf16.mxu1 %v4993_v59  ;;  %9979 = vmatpush3.bf16.msra.mxu1 %v11016_v57  ;;  %v11022_v57 = vld [vmem:[%s12459_s6 + $0xd0] sm:$0xff]   ;;  %v12079_v59 = vpack.c.bf16 %v5364_v52, %v5363_v50  ;;  %v11033_v50 = vld [vmem:[%s12459_s6 + $0x128] sm:$0xff]  }
 0x3a9   : > { %9980 = vmatprep.subr.bf16.mxu1 %v11017_v30  ;;  %v11034_v52 = vld [vmem:[%s12459_s6 + $0x130] sm:$0xff]  }
 0x3ac   : > { %9981 = vmatpush3.bf16.msra.mxu1 %v11017_v30  ;;  %v11023_v30 = vld [vmem:[%s12459_s6 + $0xd8] sm:$0xff]  }
 0x3ad   : > { %9982 = vmatprep.subr.bf16.mxu1 %v11018_v14 }
 0x3af   : > { %9947 = vmatmul.mubr.bf16.gmra.mrb[12].mxu1 %v4994_v63  ;;  %v12086_v63 = vpack.c.bf16 %v5366_v60, %v5365_v5  ;;  %v6166_v5 = vld [vmem:[#allocation2 + $0x2b] sm:$0xff] }
 0x3b0   : > { %9950 = vmatprep.mubr.bf16.mxu1 %v4995_v8  ;;  %9983 = vmatpush3.bf16.msra.mxu1 %v11018_v14  ;;  %v11024_v14 = vld [vmem:[%s12459_s6 + $0xe0] sm:$0xff]   ;;  %v12091_v8 = vpack.c.bf16 %v5368_v62, %v5367_v4  ;;  %v6163_v4 = vld [vmem:[#allocation2 + $0x13] sm:$0xff] }
 0x3b1   : > { %9984 = vmatprep.subr.bf16.mxu1 %v11019_v7 }
 0x3b4   : > { %9985 = vmatpush3.bf16.msra.mxu1 %v11019_v7  ;;  %v11025_v7 = vld [vmem:[%s12459_s6 + $0xe8] sm:$0xff]  }
 0x3b5   : > { %10022 = vmatprep.subr.bf16.mxu1 %v11020_v37 }
 0x3b7   : > { %9951 = vmatmul.mubr.bf16.gmra.mrb[16].mxu1 %v4996_v19  ;;  %v12098_v19 = vpack.c.bf16 %v5370_v9, %v5369_v44  ;;  %v11037_v9 = vld [vmem:[%s12459_s6 + $0x148] sm:$0xff]  }
 0x3b8   : > { %9954 = vmatprep.mubr.bf16.mxu1 %v4997_v11  ;;  %v11027_v11 = vld [vmem:[%s12459_s6 + $0xf8] sm:$0xff]   ;;  %v6170_v44 = vld [vmem:[#allocation2 + $0x4b] sm:$0xff] }
 0x3bf   : > { %9955 = vmatmul.mubr.bf16.gmra.mrb[20].mxu1 %v4998_v6  ;;  %v5376_v6 = vld [vmem:[#allocation2 + $0xaa] sm:$0xff] }
 0x3c0   : > { %9958 = vmatprep.mubr.bf16.mxu1 %v4999_v25  ;;  %v5373_v25 = vld [vmem:[#allocation2 + $0x92] sm:$0xff]  ;;  %v12110_v2 = vpack.c.bf16 %v5376_v6, %v5375_v20  ;;  %v11040_v6 = vld [vmem:[%s12459_s6 + $0x160] sm:$0xff]  }
 0x3c1   : > { %v5400_v26 = vpack.c.bf16 %v5374_v17, %v5373_v25  ;;  %v11039_v17 = vld [vmem:[%s12459_s6 + $0x158] sm:$0xff]   ;;  %v6174_v25 = vld [vmem:[#allocation2 + $0x6b] sm:$0xff] }
 0x3c7   : > { %9959 = vmatmul.mubr.bf16.gmra.mrb[24].mxu1 %v5000_v0  ;;  %v5380_v0 = vld [vmem:[#allocation2 + $0xca] sm:$0xff] }
 0x3c8   : > { %9962 = vmatprep.mubr.bf16.mxu1 %v5001_v46  ;;  %v5377_v46 = vld [vmem:[#allocation2 + $0xb2] sm:$0xff]  ;;  %v5403_v32 = vpack.c.bf16 %v5380_v0, %v5379_v28  ;;  %v11041_v0 = vld [vmem:[%s12459_s6 + $0x168] sm:$0xff]  }
 0x3c9   : > { %v5402_v31 = vpack.c.bf16 %v5378_v55, %v5377_v46  ;;  %v6175_v28 = vld [vmem:[#allocation2 + $0x73] sm:$0xff] }
 0x3cf   : > { %9963 = vmatmul.mubr.bf16.gmra.mrb[28].mxu1 %v5002_v34  ;;  %v5384_v34 = vld [vmem:[#allocation2 + $0xea] sm:$0xff] }
 0x3d0   : > { %9966 = vmatprep.mubr.bf16.mxu1 %v5003_v35  ;;  %v5381_v35 = vld [vmem:[#allocation2 + $0xd2] sm:$0xff]  ;;  %v5405_v21 = vpack.c.bf16 %v5384_v34, %v5383_v33  ;;  %v6177_v33 = vld [vmem:[#allocation2 + $0x83] sm:$0xff] }
 0x3d1   : > { %v5404_v36 = vpack.c.bf16 %v5382_v24, %v5381_v35  ;;  %v6180_v24 = vld [vmem:[#allocation2 + $0x9b] sm:$0xff]  ;;  %v6179_v35 = vld [vmem:[#allocation2 + $0x93] sm:$0xff] }
 0x3d7   : > { %9967 = vmatmul.mubr.bf16.gmra.mrb[32].mxu1 %v5004_v39  ;;  %v5385_v39 = vld [vmem:[#allocation2 + $0xf2] sm:$0xff] }
 0x3d8   : > { %9986 = vmatprep.mubr.bf16.mxu1 %v5391_v29  ;;  %v5388_v29 = vld [vmem:[#allocation2 + $0x10a] sm:$0xff]  ;;  %v5406_v53 = vpack.c.bf16 %v5386_v38, %v5385_v39  ;;  %v11044_v38 = vld [vmem:[%s12459_s6 + $0x180] sm:$0xff]  }
 0x3d9   : > { %v5407_v40 = vpack.c.bf16 %v5388_v29, %v5387_v1  ;;  %v6182_v1 = vld [vmem:[#allocation2 + $0xab] sm:$0xff]  ;;  %v6184_v29 = vld [vmem:[#allocation2 + $0xbb] sm:$0xff]  ;;  %v6181_v39 = vld [vmem:[#allocation2 + $0xa3] sm:$0xff] }
 0x3df   : > { %9987 = vmatmul.mubr.bf16.vlgmr.msra.gmra.mrb[0].mxu1 %v12062_v43 }
 0x3e0   : > { %9990 = vmatprep.mubr.bf16.mxu1 %v12067_v47  ;;  %10023 = vmatpush3.bf16.msra.mxu1 %v11020_v37  ;;  %v11026_v37 = vld [vmem:[%s12459_s6 + $0xf0] sm:$0xff]  }
 0x3e1   : > { %10024 = vmatprep.subr.bf16.mxu1 %v11021_v45 }
 0x3e4   : > { %10025 = vmatpush3.bf16.msra.mxu1 %v11021_v45  ;;  %v5408_v45 = vpack.c.bf16 %v5390_v41, %v5389_v42  ;;  %v6186_v42 = vld [vmem:[#allocation2 + $0xcb] sm:$0xff] }
 0x3e5   : > { %10026 = vmatprep.subr.bf16.mxu1 %v11022_v57 }
 0x3e7   : > { %9991 = vmatmul.mubr.bf16.gmra.mrb[4].mxu1 %v12074_v56 }
 0x3e8   : > { %9994 = vmatprep.mubr.bf16.mxu1 %v12079_v59  ;;  %10027 = vmatpush3.bf16.msra.mxu1 %v11022_v57  ;;  %v11029_v57 = vld [vmem:[%s12459_s6 + $0x108] sm:$0xff]  }
 0x3e9   : > { %10028 = vmatprep.subr.bf16.mxu1 %v11023_v30 }
 0x3ec   : > { %10029 = vmatpush3.bf16.msra.mxu1 %v11023_v30  ;;  %v5793_v30 = vld [vmem:[#allocation2 + $0x122] sm:$0xff] }
 0x3ed   : > { %10030 = vmatprep.subr.bf16.mxu1 %v11024_v14 }
 0x3ef   : > { %9995 = vmatmul.mubr.bf16.gmra.mrb[8].mxu1 %v12086_v63 }
 0x3f0   : > { %9998 = vmatprep.mubr.bf16.mxu1 %v12091_v8  ;;  %10031 = vmatpush3.bf16.msra.mxu1 %v11024_v14  ;;  %v6164_v14 = vld [vmem:[#allocation2 + $0x1b] sm:$0xff] }
 0x3f1   : > { %10032 = vmatprep.subr.bf16.mxu1 %v11025_v7  ;;  %v6199_v62 = vpack.c.bf16 %v6164_v14, %v6163_v4  ;;  %v6568_v14 = vld [vmem:[#allocation2 + $0x1c] sm:$0xff]  ;;  %v6570_v4 = vld [vmem:[#allocation2 + $0x2c] sm:$0xff] }
 0x3f4   : > { %10033 = vmatpush3.bf16.msra.mxu1 %v11025_v7  ;;  %v6165_v7 = vld [vmem:[#allocation2 + $0x23] sm:$0xff] }
 0x3f5   : > { %10034 = vmatprep.subr.bf16.mxu1 %v11026_v37 }
 0x3f7   : > { %9999 = vmatmul.mubr.bf16.gmra.mrb[12].mxu1 %v12098_v19 }
 0x3f8   : > { %10002 = vmatprep.mubr.bf16.mxu1 %v12103_v12  ;;  %10035 = vmatpush3.bf16.msra.mxu1 %v11026_v37  ;;  %v6167_v37 = vld [vmem:[#allocation2 + $0x33] sm:$0xff] }
 0x3f9   : > { %10036 = vmatprep.subr.bf16.mxu1 %v11027_v11 }
 0x3fc   : > { %10037 = vmatpush3.bf16.msra.mxu1 %v11027_v11  ;;  %v6169_v11 = vld [vmem:[#allocation2 + $0x43] sm:$0xff] }
 0x3fd   : > { %10074 = vmatprep.subr.bf16.mxu1 %v11028_v16 }
 0x3ff   : > { %10003 = vmatmul.mubr.bf16.gmra.mrb[16].mxu1 %v5400_v26 }
 0x400   : > { %10006 = vmatprep.mubr.bf16.mxu1 %v12110_v2 }
 0x407   : > { %10007 = vmatmul.mubr.bf16.gmra.mrb[20].mxu1 %v5402_v31 }
 0x408   : > { %10010 = vmatprep.mubr.bf16.mxu1 %v5403_v32 }
 0x40f   : > { %10011 = vmatmul.mubr.bf16.gmra.mrb[24].mxu1 %v5404_v36 }
 0x410   : > { %10014 = vmatprep.mubr.bf16.mxu1 %v5405_v21 }
 0x417   : > { %10015 = vmatmul.mubr.bf16.gmra.mrb[28].mxu1 %v5406_v53 }
 0x418   : > { %10018 = vmatprep.mubr.bf16.mxu1 %v5407_v40 }
 0x41f   : > { %10019 = vmatmul.mubr.bf16.gmra.mrb[32].mxu1 %v5408_v45 }
 0x420   : > { %10038 = vmatprep.mubr.bf16.mxu1 %v12062_v43  ;;  %v11031_v43 = vld [vmem:[%s12459_s6 + $0x118] sm:$0xff]  }
 0x427   : > { %10039 = vmatmul.mubr.bf16.vlgmr.msra.gmra.mrb[0].mxu1 %v12067_v47  ;;  %v11032_v47 = vld [vmem:[%s12459_s6 + $0x120] sm:$0xff]  }
 0x428   : > { %10042 = vmatprep.mubr.bf16.mxu1 %v12074_v56  ;;  %10075 = vmatpush3.bf16.msra.mxu1 %v11028_v16  ;;  %v11036_v56 = vld [vmem:[%s12459_s6 + $0x140] sm:$0xff]   ;;  %v6171_v16 = vld [vmem:[#allocation2 + $0x53] sm:$0xff] }
 0x429   : > { %10076 = vmatprep.subr.bf16.mxu1 %v11029_v57 }
 0x42c   : > { %10077 = vmatpush3.bf16.msra.mxu1 %v11029_v57  ;;  %v6185_v57 = vld [vmem:[#allocation2 + $0xc3] sm:$0xff] }
 0x42d   : > { %10078 = vmatprep.subr.bf16.mxu1 %v11030_v49 }
 0x42f   : > { %10043 = vmatmul.mubr.bf16.gmra.mrb[4].mxu1 %v12079_v59  ;;  %v5794_v59 = vld [vmem:[#allocation2 + $0x12a] sm:$0xff] }
 0x430   : > { %10046 = vmatprep.mubr.bf16.mxu1 %v12086_v63  ;;  %10079 = vmatpush3.bf16.msra.mxu1 %v11030_v49  ;;  %v5812_v60 = vpack.c.bf16 %v5794_v59, %v5793_v30  ;;  %v6168_v63 = vld [vmem:[#allocation2 + $0x3b] sm:$0xff]  ;;  %v6210_v49 = vpack.c.bf16 %v6186_v42, %v6185_v57  ;;  %v6598_v42 = vld [vmem:[#allocation2 + $0x10c] sm:$0xff] }
 0x431   : > { %10080 = vmatprep.subr.bf16.mxu1 %v11031_v43  ;;  %v6201_v10 = vpack.c.bf16 %v6168_v63, %v6167_v37  ;;  %v6567_v59 = vld [vmem:[#allocation2 + $0x14] sm:$0xff]  ;;  %v6578_v37 = vld [vmem:[#allocation2 + $0x6c] sm:$0xff]  ;;  %v6600_v57 = vld [vmem:[#allocation2 + $0x11c] sm:$0xff] }
 0x432   : > { %v11047_v63 = vld [vmem:[%s12459_s6 + $0x198] sm:$0xff]  }
 0x434   : > { %10081 = vmatpush3.bf16.msra.mxu1 %v11031_v43  ;;  %v6187_v43 = vld [vmem:[#allocation2 + $0xd3] sm:$0xff] }
 0x435   : > { %10082 = vmatprep.subr.bf16.mxu1 %v11032_v47 }
 0x437   : > { %10047 = vmatmul.mubr.bf16.gmra.mrb[8].mxu1 %v12091_v8  ;;  %v6200_v8 = vpack.c.bf16 %v6166_v5, %v6165_v7 }
 0x438   : > { %10050 = vmatprep.mubr.bf16.mxu1 %v12098_v19  ;;  %10083 = vmatpush3.bf16.msra.mxu1 %v11032_v47  ;;  %v6172_v19 = vld [vmem:[#allocation2 + $0x5b] sm:$0xff] }
 0x439   : > { %10084 = vmatprep.subr.bf16.mxu1 %v11033_v50  ;;  %v6203_v20 = vpack.c.bf16 %v6172_v19, %v6171_v16  ;;  %v11049_v19 = vld [vmem:[%s12459_s6 + $0x1a8] sm:$0xff]  }
 0x43a   : > { %v6582_v16 = vld [vmem:[#allocation2 + $0x8c] sm:$0xff] }
 0x43c   : > { %10085 = vmatpush3.bf16.msra.mxu1 %v11033_v50  ;;  %v6190_v50 = vld [vmem:[#allocation2 + $0xeb] sm:$0xff] }
 0x43d   : > { %10086 = vmatprep.subr.bf16.mxu1 %v11034_v52 }
 0x43f   : > { %10051 = vmatmul.mubr.bf16.gmra.mrb[12].mxu1 %v12103_v12  ;;  %v6202_v12 = vpack.c.bf16 %v6170_v44, %v6169_v11 }
 0x440   : > { %10054 = vmatprep.mubr.bf16.mxu1 %v5400_v26  ;;  %10087 = vmatpush3.bf16.msra.mxu1 %v11034_v52  ;;  %v6176_v26 = vld [vmem:[#allocation2 + $0x7b] sm:$0xff]  ;;  %v6189_v52 = vld [vmem:[#allocation2 + $0xe3] sm:$0xff] }
 0x441   : > { %10088 = vmatprep.subr.bf16.mxu1 %v11035_v54  ;;  %v6205_v46 = vpack.c.bf16 %v6176_v26, %v6175_v28  ;;  %v11051_v26 = vld [vmem:[%s12459_s6 + $0x1b8] sm:$0xff]   ;;  %v6586_v28 = vld [vmem:[#allocation2 + $0xac] sm:$0xff] }
 0x444   : > { %10089 = vmatpush3.bf16.msra.mxu1 %v11035_v54  ;;  %v6212_v54 = vpack.c.bf16 %v6190_v50, %v6189_v52  ;;  %v6601_v50 = vld [vmem:[#allocation2 + $0x124] sm:$0xff]  ;;  %v6602_v52 = vld [vmem:[#allocation2 + $0x12c] sm:$0xff] }
 0x445   : > { %10126 = vmatprep.subr.bf16.mxu1 %v11036_v56 }
 0x447   : > { %10055 = vmatmul.mubr.bf16.gmra.mrb[16].mxu1 %v12110_v2  ;;  %v6173_v2 = vld [vmem:[#allocation2 + $0x63] sm:$0xff] }
 0x448   : > { %10058 = vmatprep.mubr.bf16.mxu1 %v5402_v31  ;;  %v6204_v55 = vpack.c.bf16 %v6174_v25, %v6173_v2  ;;  %v11042_v31 = vld [vmem:[%s12459_s6 + $0x170] sm:$0xff]  }
 0x44f   : > { %10059 = vmatmul.mubr.bf16.gmra.mrb[20].mxu1 %v5403_v32  ;;  %v6178_v32 = vld [vmem:[#allocation2 + $0x8b] sm:$0xff] }
 0x450   : > { %10062 = vmatprep.mubr.bf16.mxu1 %v5404_v36  ;;  %v6206_v34 = vpack.c.bf16 %v6178_v32, %v6177_v33  ;;  %v11043_v36 = vld [vmem:[%s12459_s6 + $0x178] sm:$0xff]   ;;  %v6590_v33 = vld [vmem:[#allocation2 + $0xcc] sm:$0xff] }
 0x457   : > { %10063 = vmatmul.mubr.bf16.gmra.mrb[24].mxu1 %v5405_v21  ;;  %v6207_v21 = vpack.c.bf16 %v6180_v24, %v6179_v35  ;;  %v6592_v35 = vld [vmem:[#allocation2 + $0xdc] sm:$0xff] }
 0x458   : > { %10066 = vmatprep.mubr.bf16.mxu1 %v5406_v53  ;;  %v6208_v53 = vpack.c.bf16 %v6182_v1, %v6181_v39  ;;  %v6594_v1 = vld [vmem:[#allocation2 + $0xec] sm:$0xff]  ;;  %v6596_v39 = vld [vmem:[#allocation2 + $0xfc] sm:$0xff] }
 0x45f   : > { %10067 = vmatmul.mubr.bf16.gmra.mrb[28].mxu1 %v5407_v40  ;;  %v6183_v40 = vld [vmem:[#allocation2 + $0xb3] sm:$0xff] }
 0x460   : > { %10070 = vmatprep.mubr.bf16.mxu1 %v5408_v45  ;;  %v6209_v41 = vpack.c.bf16 %v6184_v29, %v6183_v40  ;;  %v6188_v45 = vld [vmem:[#allocation2 + $0xdb] sm:$0xff] }
 0x461   : > { %v6211_v47 = vpack.c.bf16 %v6188_v45, %v6187_v43  ;;  %v6595_v29 = vld [vmem:[#allocation2 + $0xf4] sm:$0xff] }
 0x462   : > { %v6599_v45 = vld [vmem:[#allocation2 + $0x114] sm:$0xff] }
 0x467   : > { %10071 = vmatmul.mubr.bf16.gmra.mrb[32].mxu1 %v5812_v60  ;;  %v6603_v60 = vpack.c.bf16 %v6568_v14, %v6567_v59  ;;  %v11055_v59 = vld [vmem:[%s12459_s6 + $0x1d8] sm:$0xff]   ;;  %v11056_v14 = vld [vmem:[%s12459_s6 + $0x1e0] sm:$0xff]  }
 0x468   : > { %10090 = vmatprep.mubr.bf16.mxu1 %v6199_v62  ;;  %v6571_v62 = vld [vmem:[#allocation2 + $0x34] sm:$0xff] }
 0x469   : > { %v12185_v18 = vpack.c.bf16 %v6572_v48, %v6571_v62  ;;  %v11059_v62 = vld [vmem:[%s12459_s6 + $0x1f8] sm:$0xff]   ;;  %v11060_v48 = vld [vmem:[%s12459_s6 + $0x200] sm:$0xff]  }
 0x46f   : > { %10091 = vmatmul.mubr.bf16.vlgmr.msra.gmra.mrb[0].mxu1 %v6200_v8  ;;  %v11048_v8 = vld [vmem:[%s12459_s6 + $0x1a0] sm:$0xff]  }
 0x470   : > { %10094 = vmatprep.mubr.bf16.mxu1 %v6201_v10  ;;  %10127 = vmatpush3.bf16.msra.mxu1 %v11036_v56  ;;  %v6193_v56 = vld [vmem:[#allocation2 + $0x103] sm:$0xff] }
 0x471   : > { %10128 = vmatprep.subr.bf16.mxu1 %v11037_v9  ;;  %v6214_v30 = vpack.c.bf16 %v12004_v51, %v6193_v56  ;;  %v11045_v51 = vld [vmem:[%s12459_s6 + $0x188] sm:$0xff]   ;;  %v6580_v10 = vld [vmem:[#allocation2 + $0x7c] sm:$0xff] }
 0x472   : > { %v11053_v56 = vld [vmem:[%s12459_s6 + $0x1c8] sm:$0xff]  }
 0x474   : > { %10129 = vmatpush3.bf16.msra.mxu1 %v11037_v9  ;;  %v6579_v9 = vld [vmem:[#allocation2 + $0x74] sm:$0xff] }
 0x475   : > { %10130 = vmatprep.subr.bf16.mxu1 %v11038_v61  ;;  %v12209_v11 = vpack.c.bf16 %v6580_v10, %v6579_v9  ;;  %v7381_v9 = vld [vmem:[#allocation2 + $0x55] sm:$0xff]  ;;  %v7382_v10 = vld [vmem:[#allocation2 + $0x5d] sm:$0xff] }
 0x477   : > { %10095 = vmatmul.mubr.bf16.gmra.mrb[4].mxu1 %v6202_v12  ;;  %v11050_v12 = vld [vmem:[%s12459_s6 + $0x1b0] sm:$0xff]  }
 0x478   : > { %10098 = vmatprep.mubr.bf16.mxu1 %v6203_v20  ;;  %10131 = vmatpush3.bf16.msra.mxu1 %v11038_v61  ;;  %v6577_v61 = vld [vmem:[#allocation2 + $0x64] sm:$0xff]  ;;  %v6584_v20 = vld [vmem:[#allocation2 + $0x9c] sm:$0xff] }
 0x479   : > { %10132 = vmatprep.subr.bf16.mxu1 %v11039_v17  ;;  %v12204_v44 = vpack.c.bf16 %v6578_v37, %v6577_v61  ;;  %v11062_v37 = vld [vmem:[%s12459_s6 + $0x210] sm:$0xff]  }
 0x47a   : > { %v7384_v61 = vld [vmem:[#allocation2 + $0x6d] sm:$0xff] }
 0x47c   : > { %10133 = vmatpush3.bf16.msra.mxu1 %v11039_v17  ;;  %v6583_v17 = vld [vmem:[#allocation2 + $0x94] sm:$0xff] }
 0x47d   : > { %10134 = vmatprep.subr.bf16.mxu1 %v11040_v6  ;;  %v12221_v2 = vpack.c.bf16 %v6584_v20, %v6583_v17  ;;  %v7385_v17 = vld [vmem:[#allocation2 + $0x75] sm:$0xff]  ;;  %v7386_v20 = vld [vmem:[#allocation2 + $0x7d] sm:$0xff] }
 0x47f   : > { %10099 = vmatmul.mubr.bf16.gmra.mrb[8].mxu1 %v6204_v55  ;;  %v11052_v55 = vld [vmem:[%s12459_s6 + $0x1c0] sm:$0xff]  }
 0x480   : > { %10102 = vmatprep.mubr.bf16.mxu1 %v6205_v46  ;;  %10135 = vmatpush3.bf16.msra.mxu1 %v11040_v6  ;;  %v6581_v6 = vld [vmem:[#allocation2 + $0x84] sm:$0xff]  ;;  %v6588_v46 = vld [vmem:[#allocation2 + $0xbc] sm:$0xff] }
 0x481   : > { %10136 = vmatprep.subr.bf16.mxu1 %v11041_v0  ;;  %v12216_v25 = vpack.c.bf16 %v6582_v16, %v6581_v6  ;;  %v11064_v16 = vld [vmem:[%s12459_s6 + $0x220] sm:$0xff]   ;;  %v7388_v6 = vld [vmem:[#allocation2 + $0x8d] sm:$0xff] }
 0x484   : > { %10137 = vmatpush3.bf16.msra.mxu1 %v11041_v0  ;;  %v6587_v0 = vld [vmem:[#allocation2 + $0xb4] sm:$0xff] }
 0x485   : > { %10138 = vmatprep.subr.bf16.mxu1 %v11042_v31  ;;  %v12228_v24 = vpack.c.bf16 %v6588_v46, %v6587_v0  ;;  %v7389_v0 = vld [vmem:[#allocation2 + $0x95] sm:$0xff]  ;;  %v7390_v46 = vld [vmem:[#allocation2 + $0x9d] sm:$0xff] }
 0x487   : > { %10103 = vmatmul.mubr.bf16.gmra.mrb[12].mxu1 %v6206_v34  ;;  %v6591_v34 = vld [vmem:[#allocation2 + $0xd4] sm:$0xff] }
 0x488   : > { %10106 = vmatprep.mubr.bf16.mxu1 %v6207_v21  ;;  %10139 = vmatpush3.bf16.msra.mxu1 %v11042_v31  ;;  %v6585_v31 = vld [vmem:[#allocation2 + $0xa4] sm:$0xff] }
 0x489   : > { %10140 = vmatprep.subr.bf16.mxu1 %v11043_v36  ;;  %v6612_v32 = vpack.c.bf16 %v6586_v28, %v6585_v31  ;;  %v11066_v28 = vld [vmem:[%s12459_s6 + $0x230] sm:$0xff]  }
 0x48a   : > { %v7392_v31 = vld [vmem:[#allocation2 + $0xad] sm:$0xff] }
 0x48c   : > { %10141 = vmatpush3.bf16.msra.mxu1 %v11043_v36  ;;  %v6589_v36 = vld [vmem:[#allocation2 + $0xc4] sm:$0xff] }
 0x48d   : > { %10178 = vmatprep.subr.bf16.mxu1 %v11044_v38  ;;  %v6614_v21 = vpack.c.bf16 %v6590_v33, %v6589_v36  ;;  %v11067_v33 = vld [vmem:[%s12459_s6 + $0x238] sm:$0xff]  }
 0x48e   : > { %v7394_v36 = vld [vmem:[#allocation2 + $0xbd] sm:$0xff] }
 0x48f   : > { %10107 = vmatmul.mubr.bf16.gmra.mrb[16].mxu1 %v6208_v53  ;;  %v6593_v53 = vld [vmem:[#allocation2 + $0xe4] sm:$0xff] }
 0x490   : > { %10110 = vmatprep.mubr.bf16.mxu1 %v6209_v41  ;;  %v6616_v40 = vpack.c.bf16 %v6594_v1, %v6593_v53  ;;  %v6617_v41 = vpack.c.bf16 %v6596_v39, %v6595_v29  ;;  %v7395_v1 = vld [vmem:[#allocation2 + $0xc5] sm:$0xff]  ;;  %v7397_v39 = vld [vmem:[#allocation2 + $0xd5] sm:$0xff]  ;;  %v7398_v53 = vld [vmem:[#allocation2 + $0xdd] sm:$0xff] }
 0x497   : > { %10111 = vmatmul.mubr.bf16.gmra.mrb[20].mxu1 %v6210_v49  ;;  %v6597_v49 = vld [vmem:[#allocation2 + $0x104] sm:$0xff] }
 0x498   : > { %10114 = vmatprep.mubr.bf16.mxu1 %v6211_v47  ;;  %v6618_v43 = vpack.c.bf16 %v6598_v42, %v6597_v49  ;;  %v6619_v47 = vpack.c.bf16 %v6600_v57, %v6599_v45  ;;  %v7399_v42 = vld [vmem:[#allocation2 + $0xe5] sm:$0xff]  ;;  %v7401_v57 = vld [vmem:[#allocation2 + $0xf5] sm:$0xff]  ;;  %v7402_v49 = vld [vmem:[#allocation2 + $0xfd] sm:$0xff] }
 0x49f   : > { %10115 = vmatmul.mubr.bf16.gmra.mrb[24].mxu1 %v6212_v54  ;;  %v6620_v54 = vpack.c.bf16 %v6602_v52, %v6601_v50  ;;  %v7403_v50 = vld [vmem:[#allocation2 + $0x105] sm:$0xff] }
 0x4a0   : > { %10118 = vmatprep.mubr.bf16.mxu1 %v6213_v3  ;;  %v12180_v3 = vpack.c.bf16 %v6570_v4, %v6569_v58  ;;  %v11058_v4 = vld [vmem:[%s12459_s6 + $0x1f0] sm:$0xff]  }
 0x4a1   : > { %v7005_v58 = vld [vmem:[#allocation2 + $0x134] sm:$0xff] }
 0x4a7   : > { %10119 = vmatmul.mubr.bf16.gmra.mrb[28].mxu1 %v6214_v30  ;;  %v11054_v30 = vld [vmem:[%s12459_s6 + $0x1d0] sm:$0xff]  }
 0x4a8   : > { %10122 = vmatprep.mubr.bf16.mxu1 %v6215_v15  ;;  %v6573_v15 = vld [vmem:[#allocation2 + $0x44] sm:$0xff] }
 0x4a9   : > { %v12192_v5 = vpack.c.bf16 %v6574_v22, %v6573_v15  ;;  %v7380_v15 = vld [vmem:[#allocation2 + $0x4d] sm:$0xff] }
 0x4af   : > { %10123 = vmatmul.mubr.bf16.gmra.mrb[32].mxu1 %v6216_v27  ;;  %v6576_v27 = vld [vmem:[#allocation2 + $0x5c] sm:$0xff] }
 0x4b0   : > { %10142 = vmatprep.mubr.bf16.mxu1 %v6603_v60  ;;  %v12197_v7 = vpack.c.bf16 %v6576_v27, %v6575_v23  ;;  %v11057_v60 = vld [vmem:[%s12459_s6 + $0x1e8] sm:$0xff]   ;;  %v7377_v23 = vld [vmem:[#allocation2 + $0x35] sm:$0xff]  ;;  %v7378_v27 = vld [vmem:[#allocation2 + $0x3d] sm:$0xff] }
 0x4b7   : > { %10143 = vmatmul.mubr.bf16.vlgmr.msra.gmra.mrb[0].mxu1 %v12180_v3 }
 0x4b8   : > { %10146 = vmatprep.mubr.bf16.mxu1 %v12185_v18  ;;  %10179 = vmatpush3.bf16.msra.mxu1 %v11044_v38  ;;  %v6615_v38 = vpack.c.bf16 %v6592_v35, %v6591_v34  ;;  %v7393_v35 = vld [vmem:[#allocation2 + $0xb5] sm:$0xff] }
 0x4b9   : > { %10180 = vmatprep.subr.bf16.mxu1 %v11045_v51 }
 0x4bc   : > { %10181 = vmatpush3.bf16.msra.mxu1 %v11045_v51 }
 0x4bd   : > { %10182 = vmatprep.subr.bf16.mxu1 %v11046_v13 }
 0x4bf   : > { %10147 = vmatmul.mubr.bf16.gmra.mrb[4].mxu1 %v12192_v5 }
 0x4c0   : > { %10150 = vmatprep.mubr.bf16.mxu1 %v12197_v7  ;;  %10183 = vmatpush3.bf16.msra.mxu1 %v11046_v13  ;;  %v7375_v13 = vld [vmem:[#allocation2 + $0x25] sm:$0xff] }
 0x4c1   : > { %10184 = vmatprep.subr.bf16.mxu1 %v11047_v63 }
 0x4c4   : > { %10185 = vmatpush3.bf16.msra.mxu1 %v11047_v63  ;;  %v7379_v63 = vld [vmem:[#allocation2 + $0x45] sm:$0xff] }
 0x4c5   : > { %10186 = vmatprep.subr.bf16.mxu1 %v11048_v8 }
 0x4c7   : > { %10151 = vmatmul.mubr.bf16.gmra.mrb[8].mxu1 %v12204_v44 }
 0x4c8   : > { %10154 = vmatprep.mubr.bf16.mxu1 %v12209_v11  ;;  %10187 = vmatpush3.bf16.msra.mxu1 %v11048_v8  ;;  %v7413_v8 = vpack.c.bf16 %v7380_v15, %v7379_v63  ;;  %v7786_v63 = vld [vmem:[#allocation2 + $0x5e] sm:$0xff] }
 0x4c9   : > { %10188 = vmatprep.subr.bf16.mxu1 %v11049_v19 }
 0x4cc   : > { %10189 = vmatpush3.bf16.msra.mxu1 %v11049_v19  ;;  %v7383_v19 = vld [vmem:[#allocation2 + $0x65] sm:$0xff] }
 0x4cd   : > { %10190 = vmatprep.subr.bf16.mxu1 %v11050_v12 }
 0x4cf   : > { %10155 = vmatmul.mubr.bf16.gmra.mrb[12].mxu1 %v12216_v25 }
 0x4d0   : > { %10158 = vmatprep.mubr.bf16.mxu1 %v12221_v2  ;;  %10191 = vmatpush3.bf16.msra.mxu1 %v11050_v12  ;;  %v7415_v12 = vpack.c.bf16 %v7384_v61, %v7383_v19  ;;  %v7790_v61 = vld [vmem:[#allocation2 + $0x7e] sm:$0xff] }
 0x4d1   : > { %10192 = vmatprep.subr.bf16.mxu1 %v11051_v26 }
 0x4d4   : > { %10193 = vmatpush3.bf16.msra.mxu1 %v11051_v26  ;;  %v7387_v26 = vld [vmem:[#allocation2 + $0x85] sm:$0xff] }
 0x4d5   : > { %10230 = vmatprep.subr.bf16.mxu1 %v11052_v55 }
 0x4d7   : > { %10159 = vmatmul.mubr.bf16.gmra.mrb[16].mxu1 %v6612_v32 }
 0x4d8   : > { %10162 = vmatprep.mubr.bf16.mxu1 %v12228_v24 }
 0x4df   : > { %10163 = vmatmul.mubr.bf16.gmra.mrb[20].mxu1 %v6614_v21 }
 0x4e0   : > { %10166 = vmatprep.mubr.bf16.mxu1 %v6615_v38 }
 0x4e7   : > { %10167 = vmatmul.mubr.bf16.gmra.mrb[24].mxu1 %v6616_v40 }
 0x4e8   : > { %10170 = vmatprep.mubr.bf16.mxu1 %v6617_v41 }
 0x4ef   : > { %10171 = vmatmul.mubr.bf16.gmra.mrb[28].mxu1 %v6618_v43 }
 0x4f0   : > { %10174 = vmatprep.mubr.bf16.mxu1 %v6619_v47 }
 0x4f7   : > { %10175 = vmatmul.mubr.bf16.gmra.mrb[32].mxu1 %v6620_v54 }
 0x4f8   : > { %10194 = vmatprep.mubr.bf16.mxu1 %v12180_v3  ;;  %v7006_v3 = vld [vmem:[#allocation2 + $0x13c] sm:$0xff] }
 0x4f9   : > { %v7024_v51 = vpack.c.bf16 %v7006_v3, %v7005_v58  ;;  %v7780_v58 = vld [vmem:[#allocation2 + $0x2e] sm:$0xff]  ;;  %v7779_v3 = vld [vmem:[#allocation2 + $0x26] sm:$0xff] }
 0x4ff   : > { %10195 = vmatmul.mubr.bf16.vlgmr.msra.gmra.mrb[0].mxu1 %v12185_v18  ;;  %v7376_v18 = vld [vmem:[#allocation2 + $0x2d] sm:$0xff] }
 0x500   : > { %10198 = vmatprep.mubr.bf16.mxu1 %v12192_v5  ;;  %10231 = vmatpush3.bf16.msra.mxu1 %v11052_v55  ;;  %v7411_v22 = vpack.c.bf16 %v7376_v18, %v7375_v13  ;;  %v7412_v5 = vpack.c.bf16 %v7378_v27, %v7377_v23  ;;  %v7417_v55 = vpack.c.bf16 %v7388_v6, %v7387_v26  ;;  %v7781_v18 = vld [vmem:[#allocation2 + $0x36] sm:$0xff]  ;;  %v7782_v13 = vld [vmem:[#allocation2 + $0x3e] sm:$0xff]  ;;  %v7783_v27 = vld [vmem:[#allocation2 + $0x46] sm:$0xff] }
 0x501   : > { %10232 = vmatprep.subr.bf16.mxu1 %v11053_v56  ;;  %v7816_v23 = vpack.c.bf16 %v7782_v13, %v7781_v18  ;;  %v8308_v18 = vld [vmem:[%s12294_s15 + $0x18] sm:$0xff] }
 0x504   : > { %10233 = vmatpush3.bf16.msra.mxu1 %v11053_v56  ;;  %v7406_v56 = vld [vmem:[#allocation2 + $0x11d] sm:$0xff] }
 0x505   : > { %10234 = vmatprep.subr.bf16.mxu1 %v11054_v30 }
 0x507   : > { %10199 = vmatmul.mubr.bf16.gmra.mrb[4].mxu1 %v12197_v7  ;;  %v11061_v7 = vld [vmem:[%s12459_s6 + $0x208] sm:$0xff]  }
 0x508   : > { %10202 = vmatprep.mubr.bf16.mxu1 %v12204_v44  ;;  %10235 = vmatpush3.bf16.msra.mxu1 %v11054_v30  ;;  %v7414_v44 = vpack.c.bf16 %v7382_v10, %v7381_v9  ;;  %v7407_v30 = vld [vmem:[#allocation2 + $0x125] sm:$0xff]  ;;  %v7789_v10 = vld [vmem:[#allocation2 + $0x76] sm:$0xff] }
 0x509   : > { %10236 = vmatprep.subr.bf16.mxu1 %v11055_v59  ;;  %v7820_v19 = vpack.c.bf16 %v7790_v61, %v7789_v10 }
 0x50c   : > { %10237 = vmatpush3.bf16.msra.mxu1 %v11055_v59  ;;  %v7408_v59 = vld [vmem:[#allocation2 + $0x12d] sm:$0xff] }
 0x50d   : > { %10238 = vmatprep.subr.bf16.mxu1 %v11056_v14 }
 0x50f   : > { %10203 = vmatmul.mubr.bf16.gmra.mrb[8].mxu1 %v12209_v11  ;;  %v11063_v11 = vld [vmem:[%s12459_s6 + $0x218] sm:$0xff]  }
 0x510   : > { %10206 = vmatprep.mubr.bf16.mxu1 %v12216_v25  ;;  %10239 = vmatpush3.bf16.msra.mxu1 %v11056_v14  ;;  %v7416_v25 = vpack.c.bf16 %v7386_v20, %v7385_v17  ;;  %v7794_v17 = vld [vmem:[#allocation2 + $0x9e] sm:$0xff]  ;;  %v7796_v20 = vld [vmem:[#allocation2 + $0xae] sm:$0xff] }
 0x511   : > { %10240 = vmatprep.subr.bf16.mxu1 %v11057_v60 }
 0x514   : > { %10241 = vmatpush3.bf16.msra.mxu1 %v11057_v60  ;;  %v7427_v60 = vpack.c.bf16 %v7408_v59, %v7407_v30 }
 0x515   : > { %10242 = vmatprep.subr.bf16.mxu1 %v11058_v4 }
 0x517   : > { %10207 = vmatmul.mubr.bf16.gmra.mrb[12].mxu1 %v12221_v2  ;;  %v11065_v2 = vld [vmem:[%s12459_s6 + $0x228] sm:$0xff]  }
 0x518   : > { %10210 = vmatprep.mubr.bf16.mxu1 %v6612_v32  ;;  %10243 = vmatpush3.bf16.msra.mxu1 %v11058_v4  ;;  %v7418_v32 = vpack.c.bf16 %v7390_v46, %v7389_v0  ;;  %v7409_v4 = vld [vmem:[#allocation2 + $0x135] sm:$0xff]  ;;  %v7799_v46 = vld [vmem:[#allocation2 + $0xc6] sm:$0xff] }
 0x519   : > { %10244 = vmatprep.subr.bf16.mxu1 %v11059_v62 }
 0x51c   : > { %10245 = vmatpush3.bf16.msra.mxu1 %v11059_v62  ;;  %v7410_v62 = vld [vmem:[#allocation2 + $0x13d] sm:$0xff] }
 0x51d   : > { %10282 = vmatprep.subr.bf16.mxu1 %v11060_v48 }
 0x51f   : > { %10211 = vmatmul.mubr.bf16.gmra.mrb[16].mxu1 %v12228_v24  ;;  %v7391_v24 = vld [vmem:[#allocation2 + $0xa5] sm:$0xff] }
 0x520   : > { %10214 = vmatprep.mubr.bf16.mxu1 %v6614_v21  ;;  %v7419_v34 = vpack.c.bf16 %v7392_v31, %v7391_v24  ;;  %v7396_v21 = vld [vmem:[#allocation2 + $0xcd] sm:$0xff]  ;;  %v7802_v24 = vld [vmem:[#allocation2 + $0xde] sm:$0xff] }
 0x521   : > { %v7421_v29 = vpack.c.bf16 %v7396_v21, %v7395_v1  ;;  %v7805_v21 = vld [vmem:[#allocation2 + $0xf6] sm:$0xff]  ;;  %v7808_v1 = vld [vmem:[#allocation2 + $0x10e] sm:$0xff] }
 0x527   : > { %10215 = vmatmul.mubr.bf16.gmra.mrb[20].mxu1 %v6615_v38  ;;  %v7420_v38 = vpack.c.bf16 %v7394_v36, %v7393_v35  ;;  %v7803_v35 = vld [vmem:[#allocation2 + $0xe6] sm:$0xff] }
 0x528   : > { %10218 = vmatprep.mubr.bf16.mxu1 %v6616_v40  ;;  %v7400_v40 = vld [vmem:[#allocation2 + $0xed] sm:$0xff] }
 0x529   : > { %v7423_v45 = vpack.c.bf16 %v7400_v40, %v7399_v42  ;;  %v7809_v40 = vld [vmem:[#allocation2 + $0x116] sm:$0xff]  ;;  %v7811_v42 = vld [vmem:[#allocation2 + $0x126] sm:$0xff] }
 0x52f   : > { %10219 = vmatmul.mubr.bf16.gmra.mrb[24].mxu1 %v6617_v41  ;;  %v7422_v41 = vpack.c.bf16 %v7398_v53, %v7397_v39  ;;  %v7807_v39 = vld [vmem:[#allocation2 + $0x106] sm:$0xff] }
 0x530   : > { %10222 = vmatprep.mubr.bf16.mxu1 %v6618_v43  ;;  %v7404_v43 = vld [vmem:[#allocation2 + $0x10d] sm:$0xff]  ;;  %v7829_v53 = vpack.c.bf16 %v7808_v1, %v7807_v39 }
 0x531   : > { %v7425_v52 = vpack.c.bf16 %v7404_v43, %v7403_v50  ;;  %v7813_v43 = vld [vmem:[#allocation2 + $0x136] sm:$0xff] }
 0x532   : > { %v8315_v39 = vld [vmem:[%s12294_s15 + $0x50] sm:$0xff] }
 0x537   : > { %10223 = vmatmul.mubr.bf16.gmra.mrb[28].mxu1 %v6619_v47  ;;  %v7424_v47 = vpack.c.bf16 %v7402_v49, %v7401_v57 }
 0x538   : > { %10226 = vmatprep.mubr.bf16.mxu1 %v6620_v54  ;;  %v7405_v54 = vld [vmem:[#allocation2 + $0x115] sm:$0xff] }
 0x539   : > { %v7426_v14 = vpack.c.bf16 %v7406_v56, %v7405_v54  ;;  %v12299_v56 = vld [vmem:[%s12461_s8] ss:$0 sm:$0xff] }
 0x53f   : > { %10227 = vmatmul.mubr.bf16.gmra.mrb[32].mxu1 %v7024_v51  ;;  %v7815_v51 = vpack.c.bf16 %v7780_v58, %v7779_v3 }
 0x540   : > { %10246 = vmatprep.mubr.bf16.mxu1 %v7411_v22  ;;  %v7784_v22 = vld [vmem:[#allocation2 + $0x4e] sm:$0xff] }
 0x541   : > { %v7817_v15 = vpack.c.bf16 %v7784_v22, %v7783_v27  ;;  %v8306_v27 = vld [vmem:[%s12294_s15 + $0x8] sm:$0xff] }
 0x547   : > { %10247 = vmatmul.mubr.bf16.vlgmr.msra.gmra.mrb[0].mxu1 %v7412_v5  ;;  %v7785_v5 = vld [vmem:[#allocation2 + $0x56] sm:$0xff] }
 0x548   : > { %10250 = vmatprep.mubr.bf16.mxu1 %v7413_v8  ;;  %10283 = vmatpush3.bf16.msra.mxu1 %v11060_v48  ;;  %v7428_v48 = vpack.c.bf16 %v7410_v62, %v7409_v4  ;;  %v7818_v8 = vpack.c.bf16 %v7786_v63, %v7785_v5 }
 0x549   : > { %10284 = vmatprep.subr.bf16.mxu1 %v11061_v7 }
 0x54c   : > { %10285 = vmatpush3.bf16.msra.mxu1 %v11061_v7  ;;  %v7788_v7 = vld [vmem:[#allocation2 + $0x6e] sm:$0xff] }
 0x54d   : > { %10286 = vmatprep.subr.bf16.mxu1 %v11062_v37 }
 0x54f   : > { %10251 = vmatmul.mubr.bf16.gmra.mrb[4].mxu1 %v7414_v44  ;;  %v7792_v44 = vld [vmem:[#allocation2 + $0x8e] sm:$0xff] }
 0x550   : > { %10254 = vmatprep.mubr.bf16.mxu1 %v7415_v12  ;;  %10287 = vmatpush3.bf16.msra.mxu1 %v11062_v37  ;;  %v7787_v37 = vld [vmem:[#allocation2 + $0x66] sm:$0xff] }
 0x551   : > { %10288 = vmatprep.subr.bf16.mxu1 %v11063_v11  ;;  %v7819_v9 = vpack.c.bf16 %v7788_v7, %v7787_v37 }
 0x554   : > { %10289 = vmatpush3.bf16.msra.mxu1 %v11063_v11  ;;  %v7791_v11 = vld [vmem:[#allocation2 + $0x86] sm:$0xff] }
 0x555   : > { %10290 = vmatprep.subr.bf16.mxu1 %v11064_v16  ;;  %v7821_v12 = vpack.c.bf16 %v7792_v44, %v7791_v11  ;;  %v8311_v11 = vld [vmem:[%s12294_s15 + $0x30] sm:$0xff] }
 0x557   : > { %10255 = vmatmul.mubr.bf16.gmra.mrb[8].mxu1 %v7416_v25  ;;  %v7795_v25 = vld [vmem:[#allocation2 + $0xa6] sm:$0xff] }
 0x558   : > { %10258 = vmatprep.mubr.bf16.mxu1 %v7417_v55  ;;  %10291 = vmatpush3.bf16.msra.mxu1 %v11064_v16  ;;  %v7793_v16 = vld [vmem:[#allocation2 + $0x96] sm:$0xff]  ;;  %v7823_v26 = vpack.c.bf16 %v7796_v20, %v7795_v25  ;;  %v7798_v55 = vld [vmem:[#allocation2 + $0xbe] sm:$0xff] }
 0x559   : > { %10292 = vmatprep.subr.bf16.mxu1 %v11065_v2  ;;  %v7822_v6 = vpack.c.bf16 %v7794_v17, %v7793_v16  ;;  %v8309_v20 = vld [vmem:[%s12294_s15 + $0x20] sm:$0xff] }
 0x55c   : > { %10293 = vmatpush3.bf16.msra.mxu1 %v11065_v2  ;;  %v7797_v2 = vld [vmem:[#allocation2 + $0xb6] sm:$0xff] }
 0x55d   : > { %10294 = vmatprep.subr.bf16.mxu1 %v11066_v28  ;;  %v7824_v0 = vpack.c.bf16 %v7798_v55, %v7797_v2  ;;  %v8312_v2 = vld [vmem:[%s12294_s15 + $0x38] sm:$0xff] }
 0x55f   : > { %10259 = vmatmul.mubr.bf16.gmra.mrb[12].mxu1 %v7418_v32  ;;  %v7801_v32 = vld [vmem:[#allocation2 + $0xd6] sm:$0xff] }
 0x560   : > { %10262 = vmatprep.mubr.bf16.mxu1 %v7419_v34  ;;  %10295 = vmatpush3.bf16.msra.mxu1 %v11066_v28  ;;  %v7800_v28 = vld [vmem:[#allocation2 + $0xce] sm:$0xff]  ;;  %v7826_v34 = vpack.c.bf16 %v7802_v24, %v7801_v32 }
 0x561   : > { %10296 = vmatprep.subr.bf16.mxu1 %v11067_v33  ;;  %v7825_v31 = vpack.c.bf16 %v7800_v28, %v7799_v46  ;;  %v8310_v46 = vld [vmem:[%s12294_s15 + $0x28] sm:$0xff] }
 0x564   : > { %10297 = vmatpush3.bf16.msra.mxu1 %v11067_v33  ;;  %v7804_v33 = vld [vmem:[#allocation2 + $0xee] sm:$0xff] }
 0x565   : > { %v7827_v36 = vpack.c.bf16 %v7804_v33, %v7803_v35 }
 0x567   : > { %10263 = vmatmul.mubr.bf16.gmra.mrb[16].mxu1 %v7420_v38  ;;  %v7806_v38 = vld [vmem:[#allocation2 + $0xfe] sm:$0xff] }
 0x568   : > { %10266 = vmatprep.mubr.bf16.mxu1 %v7421_v29  ;;  %v7828_v29 = vpack.c.bf16 %v7806_v38, %v7805_v21 }
 0x56f   : > { %10267 = vmatmul.mubr.bf16.gmra.mrb[20].mxu1 %v7422_v41  ;;  %v7810_v41 = vld [vmem:[#allocation2 + $0x11e] sm:$0xff] }
 0x570   : > { %10270 = vmatprep.mubr.bf16.mxu1 %v7423_v45  ;;  %v7812_v45 = vld [vmem:[#allocation2 + $0x12e] sm:$0xff]  ;;  %v7830_v57 = vpack.c.bf16 %v7810_v41, %v7809_v40 }
 0x571   : > { %v7831_v49 = vpack.c.bf16 %v7812_v45, %v7811_v42  ;;  %v8313_v42 = vld [vmem:[%s12294_s15 + $0x40] sm:$0xff] }
 0x577   : > { %10271 = vmatmul.mubr.bf16.gmra.mrb[24].mxu1 %v7424_v47  ;;  %v7814_v47 = vld [vmem:[#allocation2 + $0x13e] sm:$0xff] }
 0x578   : > { %10274 = vmatprep.mubr.bf16.mxu1 %v7425_v52  ;;  %v7832_v50 = vpack.c.bf16 %v7814_v47, %v7813_v43  ;;  %v12289_v52 = vld [vmem:[%s12460_s7] ss:$0 sm:$0xff]  ;;  %v8316_v43 = vld [vmem:[%s12294_s15 + $0x58] sm:$0xff] }
 0x57f   : > { %10275 = vmatmul.mubr.bf16.gmra.mrb[28].mxu1 %v7426_v14  ;;  %v8307_v14 = vld [vmem:[%s12294_s15 + $0x10] sm:$0xff] }
 0x580   : > { %10278 = vmatprep.mubr.bf16.mxu1 %v7427_v60 }
 0x587   : > { %10279 = vmatmul.mubr.bf16.gmra.mrb[32].mxu1 %v7428_v48  ;;  %v8305_v48 = vld [vmem:[%s12294_s15] sm:$0xff] }
 0x588   : > { %10298 = vmatprep.mubr.bf16.mxu1 %v7815_v51 }
 0x58f   : > { %10299 = vmatmul.mubr.bf16.vlgmr.msra.gmra.mrb[0].mxu1 %v7816_v23 }
 0x590   : > { %10302 = vmatprep.mubr.bf16.mxu1 %v7817_v15 }
 0x597   : > { %10303 = vmatmul.mubr.bf16.gmra.mrb[4].mxu1 %v7818_v8 }
 0x598   : > { %10306 = vmatprep.mubr.bf16.mxu1 %v7819_v9 }
 0x59f   : > { %10307 = vmatmul.mubr.bf16.gmra.mrb[8].mxu1 %v7820_v19 }
 0x5a0   : > { %10310 = vmatprep.mubr.bf16.mxu1 %v7821_v12 }
 0x5a7   : > { %10311 = vmatmul.mubr.bf16.gmra.mrb[12].mxu1 %v7822_v6 }
 0x5a8   : > { %10314 = vmatprep.mubr.bf16.mxu1 %v7823_v26 }
 0x5af   : > { %10315 = vmatmul.mubr.bf16.gmra.mrb[16].mxu1 %v7824_v0 }
 0x5b0   : > { %10318 = vmatprep.mubr.bf16.mxu1 %v7825_v31 }
 0x5b7   : > { %10319 = vmatmul.mubr.bf16.gmra.mrb[20].mxu1 %v7826_v34 }
 0x5b8   : > { %10322 = vmatprep.mubr.bf16.mxu1 %v7827_v36 }
 0x5bf   : > { %10323 = vmatmul.mubr.bf16.gmra.mrb[24].mxu1 %v7828_v29 }
 0x5c0   : > { %10326 = vmatprep.mubr.bf16.mxu1 %v7829_v53 }
 0x5c7   : > { %10327 = vmatmul.mubr.bf16.gmra.mrb[28].mxu1 %v7830_v57 }
 0x5c8   : > { %10330 = vmatprep.mubr.bf16.mxu1 %v7831_v49 }
 0x5cf   : > { %10331 = vmatmul.mubr.bf16.gmra.mrb[32].mxu1 %v7832_v50 }
 0x662   : > { %v10300_v54 = vpop.f32.mrb[0].mxu1 }
 0x663   : > { %v8228_v30 = vmul.f32 %v10300_v54, %v12289_v52  ;;  %v7968_v59 = vpop.f32.mrb[1].mxu1 }
 0x664   : > { %v8226_v60 = vmul.f32 %v12289_v52, %v7968_v59  ;;  %v10301_v4 = vpop.f32.mrb[2].mxu1 }
 0x665   : > { %v8271_v62 = vadd.f32 %v12299_v56, %v8228_v30  ;;  %v8229_v58 = vmul.f32 %v10301_v4, %v12289_v52  ;;  %v7971_v3 = vpop.f32.mrb[3].mxu1  ;;  %v8314_v30 = vld [vmem:[%s12294_s15 + $0x48] sm:$0xff] }
 0x666   : > { %v8269_v51 = vadd.f32 %v12299_v56, %v8226_v60  ;;  %v8227_v13 = vmul.f32 %v12289_v52, %v7971_v3 }
 0x667   : > { %v8343_v22 = vadd.f32 %v8307_v14, %v8271_v62  ;;  %v8272_v23 = vadd.f32 %v12299_v56, %v8229_v58 }
 0x668   : > { %v8341_v15 = vadd.f32 %v8305_v48, %v8269_v51  ;;  %v8270_v5 = vadd.f32 %v12299_v56, %v8227_v13 }
 0x669   : > { %v8379_v63 = vmax.f32 %v8343_v22, 0.0  ;;  %v8344_v7 = vadd.f32 %v8308_v18, %v8272_v23  ;;  %v8319_v22 = vld [vmem:[%s12294_s15 + $0x70] sm:$0xff] }
 0x66a   : > { %v8377_v8 = vmax.f32 %v8341_v15, 0.0  ;;  %v8342_v37 = vadd.f32 %v8306_v27, %v8270_v5  ;;  %v10304_v9 = vpop.f32.mrb[4].mxu1  ;;  %v8317_v5 = vld [vmem:[%s12294_s15 + $0x60] sm:$0xff] }
 0x66b   : > { %8415 = vst [vmem:[%s12315_s19 + $0x10] sm:$0xff] %v8379_v63  ;;  %v8380_v10 = vmax.f32 %v8344_v7, 0.0  ;;  %v8232_v61 = vmul.f32 %v10304_v9, %v12289_v52  ;;  %v7984_v44 = vpop.f32.mrb[5].mxu1 }
 0x66c   : > { %8413 = vst [vmem:[%s12315_s19] sm:$0xff] %v8377_v8  ;;  %v8378_v19 = vmax.f32 %v8342_v37, 0.0  ;;  %v8230_v12 = vmul.f32 %v12289_v52, %v7984_v44  ;;  %v10305_v16 = vpop.f32.mrb[6].mxu1  ;;  %v8320_v37 = vld [vmem:[%s12294_s15 + $0x78] sm:$0xff]  ;;  %v8318_v44 = vld [vmem:[%s12294_s15 + $0x68] sm:$0xff] }
 0x66d   : > { %8416 = vst [vmem:[%s12315_s19 + $0x18] sm:$0xff] %v8380_v10  ;;  %v8275_v17 = vadd.f32 %v12299_v56, %v8232_v61  ;;  %v8233_v6 = vmul.f32 %v10305_v16, %v12289_v52  ;;  %v7987_v25 = vpop.f32.mrb[7].mxu1 }
 0x66e   : > { %8414 = vst [vmem:[%s12315_s19 + $0x8] sm:$0xff] %v8378_v19  ;;  %v8273_v26 = vadd.f32 %v12299_v56, %v8230_v12  ;;  %v8231_v55 = vmul.f32 %v12289_v52, %v7987_v25 }
 0x66f   : > { %v8347_v28 = vadd.f32 %v8311_v11, %v8275_v17  ;;  %v8276_v0 = vadd.f32 %v12299_v56, %v8233_v6 }
 0x670   : > { %v8345_v31 = vadd.f32 %v8309_v20, %v8273_v26  ;;  %v8274_v32 = vadd.f32 %v12299_v56, %v8231_v55 }
 0x671   : > { %v8383_v24 = vmax.f32 %v8347_v28, 0.0  ;;  %v8348_v33 = vadd.f32 %v8312_v2, %v8276_v0  ;;  %v8323_v28 = vld [vmem:[%s12294_s15 + $0x90] sm:$0xff] }
 0x672   : > { %v8381_v34 = vmax.f32 %v8345_v31, 0.0  ;;  %v8346_v35 = vadd.f32 %v8310_v46, %v8274_v32  ;;  %v10308_v36 = vpop.f32.mrb[8].mxu1  ;;  %v8321_v32 = vld [vmem:[%s12294_s15 + $0x80] sm:$0xff] }
 0x673   : > { %8419 = vst [vmem:[%s12315_s19 + $0x30] sm:$0xff] %v8383_v24  ;;  %v8384_v21 = vmax.f32 %v8348_v33, 0.0  ;;  %v8236_v38 = vmul.f32 %v10308_v36, %v12289_v52  ;;  %v8000_v1 = vpop.f32.mrb[9].mxu1 }
 0x674   : > { %8417 = vst [vmem:[%s12315_s19 + $0x20] sm:$0xff] %v8381_v34  ;;  %v8382_v29 = vmax.f32 %v8346_v35, 0.0  ;;  %v8234_v53 = vmul.f32 %v12289_v52, %v8000_v1  ;;  %v10309_v40 = vpop.f32.mrb[10].mxu1  ;;  %v8324_v35 = vld [vmem:[%s12294_s15 + $0x98] sm:$0xff]  ;;  %v8322_v1 = vld [vmem:[%s12294_s15 + $0x88] sm:$0xff] }
 0x675   : > { %8420 = vst [vmem:[%s12315_s19 + $0x38] sm:$0xff] %v8384_v21  ;;  %v8279_v41 = vadd.f32 %v12299_v56, %v8236_v38  ;;  %v8237_v45 = vmul.f32 %v10309_v40, %v12289_v52  ;;  %v8003_v57 = vpop.f32.mrb[11].mxu1 }
 0x676   : > { %8418 = vst [vmem:[%s12315_s19 + $0x28] sm:$0xff] %v8382_v29  ;;  %v8277_v49 = vadd.f32 %v12299_v56, %v8234_v53  ;;  %v8235_v47 = vmul.f32 %v12289_v52, %v8003_v57 }
 0x677   : > { %v8351_v50 = vadd.f32 %v8315_v39, %v8279_v41  ;;  %v8280_v54 = vadd.f32 %v12299_v56, %v8237_v45 }
 0x678   : > { %v8349_v59 = vadd.f32 %v8313_v42, %v8277_v49  ;;  %v8278_v14 = vadd.f32 %v12299_v56, %v8235_v47 }
 0x679   : > { %v8387_v60 = vmax.f32 %v8351_v50, 0.0  ;;  %v8352_v4 = vadd.f32 %v8316_v43, %v8280_v54  ;;  %v8327_v50 = vld [vmem:[%s12294_s15 + $0xb0] sm:$0xff] }
 0x67a   : > { %v8385_v62 = vmax.f32 %v8349_v59, 0.0  ;;  %v8350_v48 = vadd.f32 %v8314_v30, %v8278_v14  ;;  %v10312_v58 = vpop.f32.mrb[12].mxu1  ;;  %v8325_v14 = vld [vmem:[%s12294_s15 + $0xa0] sm:$0xff] }
 0x67b   : > { %8423 = vst [vmem:[%s12315_s19 + $0x50] sm:$0xff] %v8387_v60  ;;  %v8388_v3 = vmax.f32 %v8352_v4, 0.0  ;;  %v8240_v51 = vmul.f32 %v10312_v58, %v12289_v52  ;;  %v8016_v18 = vpop.f32.mrb[13].mxu1 }
 0x67c   : > { %8421 = vst [vmem:[%s12315_s19 + $0x40] sm:$0xff] %v8385_v62  ;;  %v8386_v13 = vmax.f32 %v8350_v48, 0.0  ;;  %v8238_v23 = vmul.f32 %v12289_v52, %v8016_v18  ;;  %v10313_v27 = vpop.f32.mrb[14].mxu1  ;;  %v8328_v48 = vld [vmem:[%s12294_s15 + $0xb8] sm:$0xff]  ;;  %v8326_v18 = vld [vmem:[%s12294_s15 + $0xa8] sm:$0xff] }
 0x67d   : > { %8424 = vst [vmem:[%s12315_s19 + $0x58] sm:$0xff] %v8388_v3  ;;  %v8283_v15 = vadd.f32 %v12299_v56, %v8240_v51  ;;  %v8241_v63 = vmul.f32 %v10313_v27, %v12289_v52  ;;  %v8019_v7 = vpop.f32.mrb[15].mxu1 }
 0x67e   : > { %8422 = vst [vmem:[%s12315_s19 + $0x48] sm:$0xff] %v8386_v13  ;;  %v8281_v8 = vadd.f32 %v12299_v56, %v8238_v23  ;;  %v8239_v9 = vmul.f32 %v12289_v52, %v8019_v7 }
 0x67f   : > { %v8355_v10 = vadd.f32 %v8319_v22, %v8283_v15  ;;  %v8284_v61 = vadd.f32 %v12299_v56, %v8241_v63 }
 0x680   : > { %v8353_v19 = vadd.f32 %v8317_v5, %v8281_v8  ;;  %v8282_v11 = vadd.f32 %v12299_v56, %v8239_v9 }
 0x681   : > { %v8391_v12 = vmax.f32 %v8355_v10, 0.0  ;;  %v8356_v16 = vadd.f32 %v8320_v37, %v8284_v61  ;;  %v8331_v10 = vld [vmem:[%s12294_s15 + $0xd0] sm:$0xff] }
 0x682   : > { %v8389_v17 = vmax.f32 %v8353_v19, 0.0  ;;  %v8354_v20 = vadd.f32 %v8318_v44, %v8282_v11  ;;  %v10316_v6 = vpop.f32.mrb[16].mxu1  ;;  %v8329_v11 = vld [vmem:[%s12294_s15 + $0xc0] sm:$0xff] }
 0x683   : > { %8427 = vst [vmem:[%s12315_s19 + $0x70] sm:$0xff] %v8391_v12  ;;  %v8392_v25 = vmax.f32 %v8356_v16, 0.0  ;;  %v8244_v26 = vmul.f32 %v10316_v6, %v12289_v52  ;;  %v8032_v2 = vpop.f32.mrb[17].mxu1 }
 0x684   : > { %8425 = vst [vmem:[%s12315_s19 + $0x60] sm:$0xff] %v8389_v17  ;;  %v8390_v55 = vmax.f32 %v8354_v20, 0.0  ;;  %v8242_v0 = vmul.f32 %v12289_v52, %v8032_v2  ;;  %v10317_v46 = vpop.f32.mrb[18].mxu1  ;;  %v8332_v20 = vld [vmem:[%s12294_s15 + $0xd8] sm:$0xff]  ;;  %v8330_v2 = vld [vmem:[%s12294_s15 + $0xc8] sm:$0xff] }
 0x685   : > { %8428 = vst [vmem:[%s12315_s19 + $0x78] sm:$0xff] %v8392_v25  ;;  %v8287_v31 = vadd.f32 %v12299_v56, %v8244_v26  ;;  %v8245_v24 = vmul.f32 %v10317_v46, %v12289_v52  ;;  %v8035_v33 = vpop.f32.mrb[19].mxu1 }
 0x686   : > { %8426 = vst [vmem:[%s12315_s19 + $0x68] sm:$0xff] %v8390_v55  ;;  %v8285_v34 = vadd.f32 %v12299_v56, %v8242_v0  ;;  %v8243_v36 = vmul.f32 %v12289_v52, %v8035_v33 }
 0x687   : > { %v8359_v21 = vadd.f32 %v8323_v28, %v8287_v31  ;;  %v8288_v38 = vadd.f32 %v12299_v56, %v8245_v24 }
 0x688   : > { %v8357_v29 = vadd.f32 %v8321_v32, %v8285_v34  ;;  %v8286_v39 = vadd.f32 %v12299_v56, %v8243_v36 }
 0x689   : > { %v8395_v53 = vmax.f32 %v8359_v21, 0.0  ;;  %v8360_v40 = vadd.f32 %v8324_v35, %v8288_v38  ;;  %v8335_v21 = vld [vmem:[%s12294_s15 + $0xf0] sm:$0xff] }
 0x68a   : > { %v8393_v41 = vmax.f32 %v8357_v29, 0.0  ;;  %v8358_v42 = vadd.f32 %v8322_v1, %v8286_v39  ;;  %v10320_v45 = vpop.f32.mrb[20].mxu1  ;;  %v8333_v39 = vld [vmem:[%s12294_s15 + $0xe0] sm:$0xff] }
 0x68b   : > { %8431 = vst [vmem:[%s12315_s19 + $0x90] sm:$0xff] %v8395_v53  ;;  %v8396_v57 = vmax.f32 %v8360_v40, 0.0  ;;  %v8248_v49 = vmul.f32 %v10320_v45, %v12289_v52  ;;  %v8048_v43 = vpop.f32.mrb[21].mxu1 }
 0x68c   : > { %8429 = vst [vmem:[%s12315_s19 + $0x80] sm:$0xff] %v8393_v41  ;;  %v8394_v47 = vmax.f32 %v8358_v42, 0.0  ;;  %v8246_v54 = vmul.f32 %v12289_v52, %v8048_v43  ;;  %v10321_v30 = vpop.f32.mrb[22].mxu1  ;;  %v8336_v42 = vld [vmem:[%s12294_s15 + $0xf8] sm:$0xff]  ;;  %v8334_v43 = vld [vmem:[%s12294_s15 + $0xe8] sm:$0xff] }
 0x68d   : > { %8432 = vst [vmem:[%s12315_s19 + $0x98] sm:$0xff] %v8396_v57  ;;  %v8291_v59 = vadd.f32 %v12299_v56, %v8248_v49  ;;  %v8249_v60 = vmul.f32 %v10321_v30, %v12289_v52  ;;  %v8051_v4 = vpop.f32.mrb[23].mxu1 }
 0x68e   : > { %8430 = vst [vmem:[%s12315_s19 + $0x88] sm:$0xff] %v8394_v47  ;;  %v8289_v62 = vadd.f32 %v12299_v56, %v8246_v54  ;;  %v8247_v58 = vmul.f32 %v12289_v52, %v8051_v4 }
 0x68f   : > { %v8363_v3 = vadd.f32 %v8327_v50, %v8291_v59  ;;  %v8292_v51 = vadd.f32 %v12299_v56, %v8249_v60 }
 0x690   : > { %v8361_v13 = vadd.f32 %v8325_v14, %v8289_v62  ;;  %v8290_v22 = vadd.f32 %v12299_v56, %v8247_v58 }
 0x691   : > { %v8399_v23 = vmax.f32 %v8363_v3, 0.0  ;;  %v8364_v27 = vadd.f32 %v8328_v48, %v8292_v51  ;;  %v8339_v3 = vld [vmem:[%s12294_s15 + $0x110] sm:$0xff] }
 0x692   : > { %v8397_v15 = vmax.f32 %v8361_v13, 0.0  ;;  %v8362_v5 = vadd.f32 %v8326_v18, %v8290_v22  ;;  %v10324_v63 = vpop.f32.mrb[24].mxu1  ;;  %v8337_v22 = vld [vmem:[%s12294_s15 + $0x100] sm:$0xff] }
 0x693   : > { %8435 = vst [vmem:[%s12315_s19 + $0xb0] sm:$0xff] %v8399_v23  ;;  %v8400_v7 = vmax.f32 %v8364_v27, 0.0  ;;  %v8252_v8 = vmul.f32 %v10324_v63, %v12289_v52  ;;  %v8064_v37 = vpop.f32.mrb[25].mxu1 }
 0x694   : > { %8433 = vst [vmem:[%s12315_s19 + $0xa0] sm:$0xff] %v8397_v15  ;;  %v8398_v9 = vmax.f32 %v8362_v5, 0.0  ;;  %v8250_v61 = vmul.f32 %v12289_v52, %v8064_v37  ;;  %v10325_v44 = vpop.f32.mrb[26].mxu1  ;;  %v8340_v5 = vld [vmem:[%s12294_s15 + $0x118] sm:$0xff]  ;;  %v8338_v37 = vld [vmem:[%s12294_s15 + $0x108] sm:$0xff] }
 0x695   : > { %8436 = vst [vmem:[%s12315_s19 + $0xb8] sm:$0xff] %v8400_v7  ;;  %v8295_v19 = vadd.f32 %v12299_v56, %v8252_v8  ;;  %v8253_v12 = vmul.f32 %v10325_v44, %v12289_v52  ;;  %v8067_v16 = vpop.f32.mrb[27].mxu1 }
 0x696   : > { %8434 = vst [vmem:[%s12315_s19 + $0xa8] sm:$0xff] %v8398_v9  ;;  %v8293_v17 = vadd.f32 %v12299_v56, %v8250_v61  ;;  %v8251_v6 = vmul.f32 %v12289_v52, %v8067_v16 }
 0x697   : > { %v8367_v25 = vadd.f32 %v8331_v10, %v8295_v19  ;;  %v8296_v26 = vadd.f32 %v12299_v56, %v8253_v12 }
 0x698   : > { %v8365_v55 = vadd.f32 %v8329_v11, %v8293_v17  ;;  %v8294_v28 = vadd.f32 %v12299_v56, %v8251_v6 }
 0x699   : > { %v8403_v0 = vmax.f32 %v8367_v25, 0.0  ;;  %v8368_v46 = vadd.f32 %v8332_v20, %v8296_v26 }
 0x69a   : > { %v8401_v31 = vmax.f32 %v8365_v55, 0.0  ;;  %v8366_v32 = vadd.f32 %v8330_v2, %v8294_v28  ;;  %v10328_v24 = vpop.f32.mrb[28].mxu1 }
 0x69b   : > { %8439 = vst [vmem:[%s12315_s19 + $0xd0] sm:$0xff] %v8403_v0  ;;  %v8404_v33 = vmax.f32 %v8368_v46, 0.0  ;;  %v8256_v34 = vmul.f32 %v10328_v24, %v12289_v52  ;;  %v8080_v35 = vpop.f32.mrb[29].mxu1 }
 0x69c   : > { %8437 = vst [vmem:[%s12315_s19 + $0xc0] sm:$0xff] %v8401_v31  ;;  %v8402_v36 = vmax.f32 %v8366_v32, 0.0  ;;  %v8254_v38 = vmul.f32 %v12289_v52, %v8080_v35  ;;  %v10329_v1 = vpop.f32.mrb[30].mxu1 }
 0x69d   : > { %8440 = vst [vmem:[%s12315_s19 + $0xd8] sm:$0xff] %v8404_v33  ;;  %v8299_v29 = vadd.f32 %v12299_v56, %v8256_v34  ;;  %v8257_v53 = vmul.f32 %v10329_v1, %v12289_v52  ;;  %v8083_v40 = vpop.f32.mrb[31].mxu1 }
 0x69e   : > { %8438 = vst [vmem:[%s12315_s19 + $0xc8] sm:$0xff] %v8402_v36  ;;  %v8297_v41 = vadd.f32 %v12299_v56, %v8254_v38  ;;  %v8255_v45 = vmul.f32 %v12289_v52, %v8083_v40 }
 0x69f   : > { %v8371_v57 = vadd.f32 %v8335_v21, %v8299_v29  ;;  %v8300_v49 = vadd.f32 %v12299_v56, %v8257_v53 }
 0x6a0   : > { %v8369_v47 = vadd.f32 %v8333_v39, %v8297_v41  ;;  %v8298_v50 = vadd.f32 %v12299_v56, %v8255_v45 }
 0x6a1   : > { %v8407_v54 = vmax.f32 %v8371_v57, 0.0  ;;  %v8372_v30 = vadd.f32 %v8336_v42, %v8300_v49 }
 0x6a2   : > { %v8405_v59 = vmax.f32 %v8369_v47, 0.0  ;;  %v8370_v14 = vadd.f32 %v8334_v43, %v8298_v50  ;;  %v10332_v60 = vpop.f32.mrb[32].mxu1 }
 0x6a3   : > { %8443 = vst [vmem:[%s12315_s19 + $0xf0] sm:$0xff] %v8407_v54  ;;  %v8408_v4 = vmax.f32 %v8372_v30, 0.0  ;;  %v8260_v62 = vmul.f32 %v10332_v60, %v12289_v52  ;;  %v8096_v48 = vpop.f32.mrb[33].mxu1 }
 0x6a4   : > { %8441 = vst [vmem:[%s12315_s19 + $0xe0] sm:$0xff] %v8405_v59  ;;  %v8406_v58 = vmax.f32 %v8370_v14, 0.0  ;;  %v8258_v51 = vmul.f32 %v12289_v52, %v8096_v48  ;;  %v10333_v18 = vpop.f32.mrb[34].mxu1 }
 0x6a5   : > { %8444 = vst [vmem:[%s12315_s19 + $0xf8] sm:$0xff] %v8408_v4  ;;  %v8303_v13 = vadd.f32 %v12299_v56, %v8260_v62  ;;  %v8261_v23 = vmul.f32 %v10333_v18, %v12289_v52  ;;  %v8099_v27 = vpop.f32.mrb[35].mxu1 }
 0x6a6   : > { %8442 = vst [vmem:[%s12315_s19 + $0xe8] sm:$0xff] %v8406_v58  ;;  %v8301_v15 = vadd.f32 %v12299_v56, %v8258_v51  ;;  %v8259_v63 = vmul.f32 %v12289_v52, %v8099_v27 }
 0x6a7   : > { %v8375_v7 = vadd.f32 %v8339_v3, %v8303_v13  ;;  %v8304_v8 = vadd.f32 %v12299_v56, %v8261_v23 }
 0x6a8   : > { %v8373_v9 = vadd.f32 %v8337_v22, %v8301_v15  ;;  %v8302_v10 = vadd.f32 %v12299_v56, %v8259_v63 }
 0x6a9   : > { %v8411_v61 = vmax.f32 %v8375_v7, 0.0  ;;  %v8376_v44 = vadd.f32 %v8340_v5, %v8304_v8 }
 0x6aa   : > { %v8409_v19 = vmax.f32 %v8373_v9, 0.0  ;;  %v8374_v11 = vadd.f32 %v8338_v37, %v8302_v10 }
 0x6ab   : > { %8447 = vst [vmem:[%s12315_s19 + $0x110] sm:$0xff] %v8411_v61  ;;  %v8412_v12 = vmax.f32 %v8376_v44, 0.0 }
 0x6ac   : > { %8445 = vst [vmem:[%s12315_s19 + $0x100] sm:$0xff] %v8409_v19  ;;  %v8410_v16 = vmax.f32 %v8374_v11, 0.0 }
 0x6ad   : > { %8448 = vst [vmem:[%s12315_s19 + $0x118] sm:$0xff] %v8412_v12 }
 0x6ae   : > { %8446 = vst [vmem:[%s12315_s19 + $0x108] sm:$0xff] %v8410_v16 }
 0x6af PF: > { %s19_s30 = sadd.s32 1, %s11074_s30  }
 0x6b0   : > { %p16_p4 = scmp.ge.s32.totalorder %s19_s30, 4  }
 0x6b2   :  { %18 = sbr.rel (!%p16_p4) target bundleno = 1 (0x1), region = 105 }

</bundles_post_ra>
